<compile_context>
chip_gen: v7x
topology: tpu7x:2x2x1
jax: 0.10.0
libtpu: 0.0.40
codegen_flags: <defaults>
</compile_context>

<pallas_src>
import functools

import jax
import jax.numpy as jnp
import numpy as np
from jax.experimental import pallas as pl
from jax.experimental.pallas import tpu as pltpu


# ----------------------------- fused Pallas kernel -----------------------------

def _mf_encoder_kernel(H, W, C, Cp,
                       xr_ref, xh_ref, xl_ref,      # (1, HW, C) each
                       gsw_ref, gsb_ref,            # (C, C//4), (1, C//4)
                       gatew_ref, gateb_ref,        # (C//4, 3C), (1, 3C)
                       w1_ref, b1_ref,              # (3, C, Cp), (1, Cp)
                       w3_ref, b3_ref,              # (9*Cp, Cp), (1, Cp)
                       o_ref):                      # (1, HW, Cp)
    C3 = 3 * C
    HW = H * W
    f32 = jnp.float32

    xr = xr_ref[0]                                   # (HW, C)
    xh = xh_ref[0]
    xl = xl_ref[0]

    # ---- MFBlock gate: GAP(sum) -> squeeze(1x1+ReLU) -> excitations -> softmax ----
    g = (jnp.mean(xr, axis=0, keepdims=True)
         + jnp.mean(xh, axis=0, keepdims=True)
         + jnp.mean(xl, axis=0, keepdims=True))      # (1, C) == GAP(xr+xh+xl)
    hsq = jnp.maximum(
        jnp.dot(g, gsw_ref[...], preferred_element_type=f32) + gsb_ref[...], 0.0)
    logits = (jnp.dot(hsq, gatew_ref[...], preferred_element_type=f32)
              + gateb_ref[...])                      # (1, 3C) = [rgb | hsv | lab]
    l0 = logits[:, 0:C]
    l1 = logits[:, C:2 * C]
    l2 = logits[:, 2 * C:C3]
    m = jnp.maximum(jnp.maximum(l0, l1), l2)
    e0 = jnp.exp(l0 - m)
    e1 = jnp.exp(l1 - m)
    e2 = jnp.exp(l2 - m)
    inv = 1.0 / (e0 + e1 + e2)                       # exact recip (one tiny row)
    wr, wh, wl = e0 * inv, e1 * inv, e2 * inv        # (1, C) each

    # ---- softmax-weighted mix (VPU) + slim fused 1x1 stage (MXU) ----
    sel = xr * wr + xh * wh + xl * wl                # (HW, C) == input of project()
    # Each matmul writes a disjoint 128-lane column block of t; the MFBlock
    # projection is folded into the rgb-branch 1x1 (both linear, no act between).
    t = (jnp.dot(sel, w1_ref[0], preferred_element_type=f32)
         + jnp.dot(xh, w1_ref[1], preferred_element_type=f32)
         + jnp.dot(xl, w1_ref[2], preferred_element_type=f32)
         + b1_ref[...])                              # (HW, Cp); pad cols stay 0

    # ---- reflect pad + 3x3 conv (tap-stacked matmul) + ReLU + residual ----
    t3 = t.reshape(H, W, Cp)
    # reflect rows (leading-dim concat: whole-tile moves, cheap)
    tp = jnp.concatenate([t3[1:2], t3, t3[H - 2:H - 1]], axis=0)   # (H+2, W, Cp)

    # Column shifts on the XLU: roll the flattened (rows, Cp) slab by +/-1 row,
    # then fix the single reflect boundary column (the fix also overwrites every
    # position that wrapped across an image-row boundary).
    H2W = (H + 2) * W
    tp2 = tp.reshape(H2W, Cp)
    col = jax.lax.broadcasted_iota(jnp.int32, (W, Cp), 0)[None]    # (1, W, Cp)
    first_col = jnp.broadcast_to(col == 0, tp.shape)
    last_col = jnp.broadcast_to(col == W - 1, tp.shape)
    refl_l = jnp.broadcast_to(tp[:, 1:2, :], tp.shape)             # reflect of col -1
    refl_r = jnp.broadcast_to(tp[:, W - 2:W - 1, :], tp.shape)     # reflect of col W
    left = jnp.where(first_col, refl_l,
                     pltpu.roll(tp2, 1, axis=0).reshape(tp.shape))
    right = jnp.where(last_col, refl_r,
                      pltpu.roll(tp2, H2W - 1, axis=0).reshape(tp.shape))
    shifted = (left, tp, right)                      # dw = 0, 1, 2

    # Stack the 9 taps along K (tile-aligned lane concat) -> ONE MXU matmul.
    # TODO(synk): at production C, de-zero further with 3 per-branch
    # (HW, 9C) x (9C, C) matmuls instead of the block-diagonal (9*Cp, Cp) weight.
    taps = jnp.concatenate(
        [shifted[dw][dh:dh + H].reshape(HW, Cp)
         for dh in range(3) for dw in range(3)], axis=-1)          # (HW, 9*Cp)
    y = jnp.maximum(
        jnp.dot(taps, w3_ref[...], preferred_element_type=f32) + b3_ref[...],
        0.0)                                         # (HW, Cp); pad cols stay 0

    # residual in the concatenated padded layout; single lane-dense store
    pieces = [xr, xh, xl]
    if Cp > C3:
        pieces.append(jnp.zeros((HW, Cp - C3), f32))
    xcat = jnp.concatenate(pieces, axis=-1)          # (HW, Cp)
    o_ref[0] = xcat + y


# ----------------------------- wrapper -----------------------------

def mf_encoder_forward(x_rgb, x_hsv, x_lab, p):
    """x_*: (B, H, W, C) float32. Returns (x_rgb_out, x_hsv_out, x_lab_out)."""
    B, H, W, C = x_rgb.shape
    assert H >= 2 and W >= 2, "reflect padding needs H, W >= 2"
    assert W % 8 == 0, "W must be a multiple of 8 (sublane-aligned tap reshape)"
    assert C % 4 == 0
    HW, C3 = H * W, 3 * C
    Cp = ((C3 + 127) // 128) * 128                   # lane-dense padded channel width
    f32 = jnp.float32

    # No wrapper-side concat: feed the three maps directly (reshape is free).
    xr = x_rgb.reshape(B, HW, C)
    xh = x_hsv.reshape(B, HW, C)
    xl = x_lab.reshape(B, HW, C)

    # --- gate weights (tiny, concatenated once) ---
    gate_w = jnp.concatenate([p["rgb_e_w"], p["hsv_e_w"], p["lab_e_w"]], axis=1)  # (C//4, 3C)
    gate_b = jnp.concatenate([p["rgb_e_b"], p["hsv_e_b"], p["lab_e_b"]], axis=1)  # (1, 3C)

    # --- slim 1x1 weights: each branch's (C,C) weight embedded in its own
    #     column block of a (C, Cp) matrix; projection folded into rgb branch ---
    def col_block(w, b):
        return jnp.zeros((C, Cp), f32).at[:, b * C:(b + 1) * C].set(w)

    w1 = jnp.stack([col_block(p["proj_w"] @ p["rgb_w1"], 0),
                    col_block(p["hsv_w1"], 1),
                    col_block(p["lab_w1"], 2)], axis=0)            # (3, C, Cp)
    b1 = jnp.zeros((1, Cp), f32)
    b1 = b1.at[:, 0:C].set(p["rgb_b1"] + p["proj_b"] @ p["rgb_w1"])
    b1 = b1.at[:, C:2 * C].set(p["hsv_b1"])
    b1 = b1.at[:, 2 * C:C3].set(p["lab_b1"])

    # --- tap-stacked 3x3 weights: rows = 9 taps x Cp input channels ---
    w3 = jnp.zeros((9 * Cp, Cp), f32)
    for dh in range(3):
        for dw in range(3):
            base = (dh * 3 + dw) * Cp
            w3 = w3.at[base + 0:base + C, 0:C].set(p["rgb_w3"][dh, dw])
            w3 = w3.at[base + C:base + 2 * C, C:2 * C].set(p["hsv_w3"][dh, dw])
            w3 = w3.at[base + 2 * C:base + C3, 2 * C:C3].set(p["lab_w3"][dh, dw])
    b3 = jnp.zeros((1, Cp), f32)
    b3 = b3.at[:, 0:C].set(p["rgb_b3"])
    b3 = b3.at[:, C:2 * C].set(p["hsv_b3"])
    b3 = b3.at[:, 2 * C:C3].set(p["lab_b3"])

    def _wspec(arr):
        nd = arr.ndim
        return pl.BlockSpec(arr.shape, lambda b, _nd=nd: (0,) * _nd)

    x_spec = pl.BlockSpec((1, HW, C), lambda b: (b, 0, 0))
    o_spec = pl.BlockSpec((1, HW, Cp), lambda b: (b, 0, 0))
    kernel = functools.partial(_mf_encoder_kernel, H, W, C, Cp)

    # TODO(synk): at production H*W add an H-row tile grid axis (+1-row reflect
    # halo) and pipeline_mode=pl.Buffered(1) on the weight specs for v7x VMEM.
    out = pl.pallas_call(
        kernel,
        out_shape=jax.ShapeDtypeStruct((B, HW, Cp), f32),
        grid=(B,),
        in_specs=[x_spec, x_spec, x_spec,
                  _wspec(p["gs_w"]), _wspec(p["gs_b"]),
                  _wspec(gate_w), _wspec(gate_b),
                  _wspec(w1), _wspec(b1), _wspec(w3), _wspec(b3)],
        out_specs=o_spec,
        compiler_params=pltpu.CompilerParams(dimension_semantics=("parallel",)),
    )(xr, xh, xl, p["gs_w"], p["gs_b"], gate_w, gate_b, w1, b1, w3, b3)

    # NOTE: a full network would keep consuming the lane-dense (B, HW, Cp)
    # concatenated layout; this split exists only for this module's API.
    return (out[:, :, 0:C].reshape(B, H, W, C),
            out[:, :, C:2 * C].reshape(B, H, W, C),
            out[:, :, 2 * C:C3].reshape(B, H, W, C))


# ----------------------------- Pure-JAX reference -----------------------------

def ref_forward(x_rgb, x_hsv, x_lab, p):
    s = x_rgb + x_hsv + x_lab
    g = jnp.mean(s, axis=(1, 2))                                        # (B, C)
    h = jax.nn.relu(g @ p["gs_w"] + p["gs_b"])
    lr = h @ p["rgb_e_w"] + p["rgb_e_b"]
    lh = h @ p["hsv_e_w"] + p["hsv_e_b"]
    ll = h @ p["lab_e_w"] + p["lab_e_b"]
    wts = jax.nn.softmax(jnp.stack([lr, lh, ll], axis=1), axis=1)       # (B, 3, C)
    sel = (x_rgb * wts[:, 0][:, None, None, :]
           + x_hsv * wts[:, 1][:, None, None, :]
           + x_lab * wts[:, 2][:, None, None, :])
    agg = jnp.einsum("bhwc,cd->bhwd", sel, p["proj_w"]) + p["proj_b"]

    def crb(x, w1, b1, w3, b3):
        t = jnp.einsum("bhwc,cd->bhwd", x, w1) + b1
        tp = jnp.pad(t, ((0, 0), (1, 1), (1, 1), (0, 0)), mode="reflect")
        y = jax.lax.conv_general_dilated(
            tp, w3, window_strides=(1, 1), padding="VALID",
            dimension_numbers=("NHWC", "HWIO", "NHWC")) + b3
        return jax.nn.relu(y)

    return (x_rgb + crb(agg, p["rgb_w1"], p["rgb_b1"], p["rgb_w3"], p["rgb_b3"]),
            x_hsv + crb(x_hsv, p["hsv_w1"], p["hsv_b1"], p["hsv_w3"], p["hsv_b3"]),
            x_lab + crb(x_lab, p["lab_w1"], p["lab_b1"], p["lab_w3"], p["lab_b3"]))


# ----------------------------- Parameters -----------------------------

def init_params(c, key):
    cr = c // 4
    ks = iter(jax.random.split(key, 32))

    def mat(shape, fan_in):
        return (jax.random.normal(next(ks), shape, jnp.float32)
                / jnp.sqrt(jnp.float32(fan_in)))

    def vec(n):
        return 0.05 * jax.random.normal(next(ks), (1, n), jnp.float32)

    p = {
        # MFBlock
        "gs_w": mat((c, cr), c), "gs_b": vec(cr),
        "rgb_e_w": mat((cr, c), cr), "rgb_e_b": vec(c),
        "hsv_e_w": mat((cr, c), cr), "hsv_e_b": vec(c),
        "lab_e_w": mat((cr, c), cr), "lab_e_b": vec(c),
        "proj_w": mat((c, c), c), "proj_b": vec(c),
    }
    # ConvReLUBlocks
    for name in ("rgb", "hsv", "lab"):
        p[f"{name}_w1"] = mat((c, c), c)
        p[f"{name}_b1"] = vec(c)
        p[f"{name}_w3"] = mat((3, 3, c, c), 9 * c)
        p[f"{name}_b3"] = vec(c)
    return p


# ----------------------------- Main -----------------------------

if __name__ == "__main__":
    B, H, W, C = 2, 16, 16, 32          # small shapes; C // 4 == 8
    key = jax.random.PRNGKey(0)
    k1, k2, k3, kp = jax.random.split(key, 4)
    x_rgb = jax.random.normal(k1, (B, H, W, C), jnp.float32)
    x_hsv = jax.random.normal(k2, (B, H, W, C), jnp.float32)
    x_lab = jax.random.normal(k3, (B, H, W, C), jnp.float32)
    params = init_params(C, kp)

    fwd = jax.jit(mf_encoder_forward)
    out = jax.block_until_ready(fwd(x_rgb, x_hsv, x_lab, params))
    ref = jax.block_until_ready(ref_forward(x_rgb, x_hsv, x_lab, params))

    for o, r in zip(out, ref):
        np.testing.assert_allclose(np.asarray(o), np.asarray(r), rtol=5e-3, atol=5e-3)

    print("KERNEL_OK")
</pallas_src>

<mosaic_0001>
module attributes {stable_mosaic.version = 11 : i64} {
  func.func @_mf_encoder_kernel(%arg0: i32, %arg1: memref<1x256x32xf32, #tpu.memory_space<vmem>>, %arg2: memref<1x256x32xf32, #tpu.memory_space<vmem>>, %arg3: memref<1x256x32xf32, #tpu.memory_space<vmem>>, %arg4: memref<32x8xf32, #tpu.memory_space<vmem>>, %arg5: memref<1x8xf32, #tpu.memory_space<vmem>>, %arg6: memref<8x96xf32, #tpu.memory_space<vmem>>, %arg7: memref<1x96xf32, #tpu.memory_space<vmem>>, %arg8: memref<3x32x128xf32, #tpu.memory_space<vmem>>, %arg9: memref<1x128xf32, #tpu.memory_space<vmem>>, %arg10: memref<1152x128xf32, #tpu.memory_space<vmem>>, %arg11: memref<1x128xf32, #tpu.memory_space<vmem>>, %arg12: memref<1x256x128xf32, #tpu.memory_space<vmem>>) attributes {dimension_semantics = [#tpu.dimension_semantics<parallel>], iteration_bounds = array<i64: 2>, scalar_prefetch = 0 : i64, scratch_operands = 0 : i64, tpu.core_type = #tpu.core_type<tc>, window_params = [{transform_indices = @transform_0, window_bounds = array<i64: 1, 256, 32>}, {transform_indices = @transform_1, window_bounds = array<i64: 1, 256, 32>}, {transform_indices = @transform_2, window_bounds = array<i64: 1, 256, 32>}, {pipeline_mode = #tpu.pipeline_mode<synchronous>, transform_indices = @transform_3, window_bounds = array<i64: 32, 8>}, {pipeline_mode = #tpu.pipeline_mode<synchronous>, transform_indices = @transform_4, window_bounds = array<i64: 1, 8>}, {pipeline_mode = #tpu.pipeline_mode<synchronous>, transform_indices = @transform_5, window_bounds = array<i64: 8, 96>}, {pipeline_mode = #tpu.pipeline_mode<synchronous>, transform_indices = @transform_6, window_bounds = array<i64: 1, 96>}, {pipeline_mode = #tpu.pipeline_mode<synchronous>, transform_indices = @transform_7, window_bounds = array<i64: 3, 32, 128>}, {pipeline_mode = #tpu.pipeline_mode<synchronous>, transform_indices = @transform_8, window_bounds = array<i64: 1, 128>}, {pipeline_mode = #tpu.pipeline_mode<synchronous>, transform_indices = @transform_9, window_bounds = array<i64: 1152, 128>}, {pipeline_mode = #tpu.pipeline_mode<synchronous>, transform_indices = @transform_10, window_bounds = array<i64: 1, 128>}, {transform_indices = @transform_11, window_bounds = array<i64: 1, 256, 128>}]} {
    %c0 = arith.constant 0 : index
    %c0_0 = arith.constant 0 : index
    %c0_1 = arith.constant 0 : index
    %0 = vector.load %arg1[%c0, %c0_0, %c0_1] : memref<1x256x32xf32, #tpu.memory_space<vmem>>, vector<1x256x32xf32>
    %1 = vector.shape_cast %0 : vector<1x256x32xf32> to vector<256x32xf32>
    %c0_2 = arith.constant 0 : index
    %c0_3 = arith.constant 0 : index
    %c0_4 = arith.constant 0 : index
    %2 = vector.load %arg2[%c0_2, %c0_3, %c0_4] : memref<1x256x32xf32, #tpu.memory_space<vmem>>, vector<1x256x32xf32>
    %3 = vector.shape_cast %2 : vector<1x256x32xf32> to vector<256x32xf32>
    %c0_5 = arith.constant 0 : index
    %c0_6 = arith.constant 0 : index
    %c0_7 = arith.constant 0 : index
    %4 = vector.load %arg3[%c0_5, %c0_6, %c0_7] : memref<1x256x32xf32, #tpu.memory_space<vmem>>, vector<1x256x32xf32>
    %5 = vector.shape_cast %4 : vector<1x256x32xf32> to vector<256x32xf32>
    %cst = arith.constant dense<0.000000e+00> : vector<32xf32>
    %6 = vector.multi_reduction <add>, %1, %cst [0] : vector<256x32xf32> to vector<32xf32>
    %7 = vector.shape_cast %6 : vector<32xf32> to vector<1x32xf32>
    %cst_8 = arith.constant 2.560000e+02 : f32
    %8 = vector.broadcast %cst_8 : f32 to vector<1x32xf32>
    %9 = arith.divf %7, %8 : vector<1x32xf32>
    %cst_9 = arith.constant dense<0.000000e+00> : vector<32xf32>
    %10 = vector.multi_reduction <add>, %3, %cst_9 [0] : vector<256x32xf32> to vector<32xf32>
    %11 = vector.shape_cast %10 : vector<32xf32> to vector<1x32xf32>
    %cst_10 = arith.constant 2.560000e+02 : f32
    %12 = vector.broadcast %cst_10 : f32 to vector<1x32xf32>
    %13 = arith.divf %11, %12 : vector<1x32xf32>
    %14 = arith.addf %9, %13 : vector<1x32xf32>
    %cst_11 = arith.constant dense<0.000000e+00> : vector<32xf32>
    %15 = vector.multi_reduction <add>, %5, %cst_11 [0] : vector<256x32xf32> to vector<32xf32>
    %16 = vector.shape_cast %15 : vector<32xf32> to vector<1x32xf32>
    %cst_12 = arith.constant 2.560000e+02 : f32
    %17 = vector.broadcast %cst_12 : f32 to vector<1x32xf32>
    %18 = arith.divf %16, %17 : vector<1x32xf32>
    %19 = arith.addf %14, %18 : vector<1x32xf32>
    %c0_13 = arith.constant 0 : index
    %c0_14 = arith.constant 0 : index
    %20 = vector.load %arg4[%c0_13, %c0_14] : memref<32x8xf32, #tpu.memory_space<vmem>>, vector<32x8xf32>
    %cst_15 = arith.constant dense<0.000000e+00> : vector<1x8xf32>
    %21 = tpu.matmul %19, %20, %cst_15 {dimension_numbers = #tpu.dot_dimension_numbers<[1], [0], [0], [1], [0, 0, 1, 1], [], []>} : vector<1x32xf32>, vector<32x8xf32>, vector<1x8xf32> -> vector<1x8xf32>
    %c0_16 = arith.constant 0 : index
    %c0_17 = arith.constant 0 : index
    %22 = vector.load %arg5[%c0_16, %c0_17] : memref<1x8xf32, #tpu.memory_space<vmem>>, vector<1x8xf32>
    %23 = arith.addf %21, %22 : vector<1x8xf32>
    %cst_18 = arith.constant 0.000000e+00 : f32
    %24 = vector.broadcast %cst_18 : f32 to vector<1x8xf32>
    %25 = arith.maximumf %23, %24 : vector<1x8xf32>
    %c0_19 = arith.constant 0 : index
    %c0_20 = arith.constant 0 : index
    %26 = vector.load %arg6[%c0_19, %c0_20] : memref<8x96xf32, #tpu.memory_space<vmem>>, vector<8x96xf32>
    %cst_21 = arith.constant dense<0.000000e+00> : vector<1x96xf32>
    %27 = tpu.matmul %25, %26, %cst_21 {dimension_numbers = #tpu.dot_dimension_numbers<[1], [0], [0], [1], [0, 0, 1, 1], [], []>} : vector<1x8xf32>, vector<8x96xf32>, vector<1x96xf32> -> vector<1x96xf32>
    %c0_22 = arith.constant 0 : index
    %c0_23 = arith.constant 0 : index
    %28 = vector.load %arg7[%c0_22, %c0_23] : memref<1x96xf32, #tpu.memory_space<vmem>>, vector<1x96xf32>
    %29 = arith.addf %27, %28 : vector<1x96xf32>
    %30 = vector.extract_strided_slice %29 {offsets = [0, 0], sizes = [1, 32], strides = [1, 1]} : vector<1x96xf32> to vector<1x32xf32>
    %31 = vector.extract_strided_slice %29 {offsets = [0, 32], sizes = [1, 32], strides = [1, 1]} : vector<1x96xf32> to vector<1x32xf32>
    %32 = vector.extract_strided_slice %29 {offsets = [0, 64], sizes = [1, 32], strides = [1, 1]} : vector<1x96xf32> to vector<1x32xf32>
    %33 = arith.maximumf %30, %31 : vector<1x32xf32>
    %34 = arith.maximumf %33, %32 : vector<1x32xf32>
    %35 = arith.subf %30, %34 : vector<1x32xf32>
    %36 = math.exp %35 : vector<1x32xf32>
    %37 = arith.subf %31, %34 : vector<1x32xf32>
    %38 = math.exp %37 : vector<1x32xf32>
    %39 = arith.subf %32, %34 : vector<1x32xf32>
    %40 = math.exp %39 : vector<1x32xf32>
    %41 = arith.addf %36, %38 : vector<1x32xf32>
    %42 = arith.addf %41, %40 : vector<1x32xf32>
    %cst_24 = arith.constant 1.000000e+00 : f32
    %43 = vector.broadcast %cst_24 : f32 to vector<1x32xf32>
    %44 = arith.divf %43, %42 : vector<1x32xf32>
    %45 = arith.mulf %36, %44 : vector<1x32xf32>
    %46 = arith.mulf %38, %44 : vector<1x32xf32>
    %47 = arith.mulf %40, %44 : vector<1x32xf32>
    %48 = vector.broadcast %45 : vector<1x32xf32> to vector<256x32xf32>
    %49 = arith.mulf %1, %48 : vector<256x32xf32>
    %50 = vector.broadcast %46 : vector<1x32xf32> to vector<256x32xf32>
    %51 = arith.mulf %3, %50 : vector<256x32xf32>
    %52 = arith.addf %49, %51 : vector<256x32xf32>
    %53 = vector.broadcast %47 : vector<1x32xf32> to vector<256x32xf32>
    %54 = arith.mulf %5, %53 : vector<256x32xf32>
    %55 = arith.addf %52, %54 : vector<256x32xf32>
    %c0_25 = arith.constant 0 : index
    %c0_26 = arith.constant 0 : index
    %c0_27 = arith.constant 0 : index
    %56 = vector.load %arg8[%c0_25, %c0_26, %c0_27] : memref<3x32x128xf32, #tpu.memory_space<vmem>>, vector<1x32x128xf32>
    %57 = vector.shape_cast %56 : vector<1x32x128xf32> to vector<32x128xf32>
    %cst_28 = arith.constant dense<0.000000e+00> : vector<256x128xf32>
    %58 = tpu.matmul %55, %57, %cst_28 {dimension_numbers = #tpu.dot_dimension_numbers<[1], [0], [0], [1], [0, 0, 1, 1], [], []>} : vector<256x32xf32>, vector<32x128xf32>, vector<256x128xf32> -> vector<256x128xf32>
    %c1 = arith.constant 1 : index
    %c0_29 = arith.constant 0 : index
    %c0_30 = arith.constant 0 : index
    %59 = vector.load %arg8[%c1, %c0_29, %c0_30] : memref<3x32x128xf32, #tpu.memory_space<vmem>>, vector<1x32x128xf32>
    %60 = vector.shape_cast %59 : vector<1x32x128xf32> to vector<32x128xf32>
    %cst_31 = arith.constant dense<0.000000e+00> : vector<256x128xf32>
    %61 = tpu.matmul %3, %60, %cst_31 {dimension_numbers = #tpu.dot_dimension_numbers<[1], [0], [0], [1], [0, 0, 1, 1], [], []>} : vector<256x32xf32>, vector<32x128xf32>, vector<256x128xf32> -> vector<256x128xf32>
    %62 = arith.addf %58, %61 : vector<256x128xf32>
    %c2 = arith.constant 2 : index
    %c0_32 = arith.constant 0 : index
    %c0_33 = arith.constant 0 : index
    %63 = vector.load %arg8[%c2, %c0_32, %c0_33] : memref<3x32x128xf32, #tpu.memory_space<vmem>>, vector<1x32x128xf32>
    %64 = vector.shape_cast %63 : vector<1x32x128xf32> to vector<32x128xf32>
    %cst_34 = arith.constant dense<0.000000e+00> : vector<256x128xf32>
    %65 = tpu.matmul %5, %64, %cst_34 {dimension_numbers = #tpu.dot_dimension_numbers<[1], [0], [0], [1], [0, 0, 1, 1], [], []>} : vector<256x32xf32>, vector<32x128xf32>, vector<256x128xf32> -> vector<256x128xf32>
    %66 = arith.addf %62, %65 : vector<256x128xf32>
    %c0_35 = arith.constant 0 : index
    %c0_36 = arith.constant 0 : index
    %67 = vector.load %arg9[%c0_35, %c0_36] : memref<1x128xf32, #tpu.memory_space<vmem>>, vector<1x128xf32>
    %68 = vector.broadcast %67 : vector<1x128xf32> to vector<256x128xf32>
    %69 = arith.addf %66, %68 : vector<256x128xf32>
    %70 = vector.shape_cast %69 : vector<256x128xf32> to vector<16x16x128xf32>
    %71 = vector.extract_strided_slice %70 {offsets = [1, 0, 0], sizes = [1, 16, 128], strides = [1, 1, 1]} : vector<16x16x128xf32> to vector<1x16x128xf32>
    %72 = vector.extract_strided_slice %70 {offsets = [14, 0, 0], sizes = [1, 16, 128], strides = [1, 1, 1]} : vector<16x16x128xf32> to vector<1x16x128xf32>
    %73 = tpu.concatenate %71, %70, %72 in 0 : vector<1x16x128xf32>, vector<16x16x128xf32>, vector<1x16x128xf32> -> vector<18x16x128xf32>
    %74 = vector.shape_cast %73 : vector<18x16x128xf32> to vector<288x128xf32>
    %75 = tpu.iota {dimensions = array<i32: 0>} : vector<16x128xi32>
    %76 = vector.shape_cast %75 : vector<16x128xi32> to vector<1x16x128xi32>
    %c0_i32 = arith.constant 0 : i32
    %77 = vector.broadcast %c0_i32 : i32 to vector<1x16x128xi32>
    %78 = arith.cmpi eq, %76, %77 : vector<1x16x128xi32>
    %79 = vector.shape_cast %78 : vector<1x16x128xi1> to vector<1x16x128xi1>
    %80 = vector.broadcast %79 : vector<1x16x128xi1> to vector<18x16x128xi1>
    %c15_i32 = arith.constant 15 : i32
    %81 = vector.broadcast %c15_i32 : i32 to vector<1x16x128xi32>
    %82 = arith.cmpi eq, %76, %81 : vector<1x16x128xi32>
    %83 = vector.shape_cast %82 : vector<1x16x128xi1> to vector<1x16x128xi1>
    %84 = vector.broadcast %83 : vector<1x16x128xi1> to vector<18x16x128xi1>
    %85 = vector.extract_strided_slice %73 {offsets = [0, 1, 0], sizes = [18, 1, 128], strides = [1, 1, 1]} : vector<18x16x128xf32> to vector<18x1x128xf32>
    %86 = vector.shape_cast %85 : vector<18x1x128xf32> to vector<18x1x128xf32>
    %87 = vector.broadcast %86 : vector<18x1x128xf32> to vector<18x16x128xf32>
    %88 = vector.extract_strided_slice %73 {offsets = [0, 14, 0], sizes = [18, 1, 128], strides = [1, 1, 1]} : vector<18x16x128xf32> to vector<18x1x128xf32>
    %89 = vector.shape_cast %88 : vector<18x1x128xf32> to vector<18x1x128xf32>
    %90 = vector.broadcast %89 : vector<18x1x128xf32> to vector<18x16x128xf32>
    %c1_i32 = arith.constant 1 : i32
    %91 = tpu.dynamic_rotate %74 by %c1_i32 dim 0 : vector<288x128xf32>, i32 -> vector<288x128xf32>
    %92 = vector.shape_cast %91 : vector<288x128xf32> to vector<18x16x128xf32>
    %93 = arith.select %80, %87, %92 : vector<18x16x128xi1>, vector<18x16x128xf32>
    %c287_i32 = arith.constant 287 : i32
    %94 = tpu.dynamic_rotate %74 by %c287_i32 dim 0 : vector<288x128xf32>, i32 -> vector<288x128xf32>
    %95 = vector.shape_cast %94 : vector<288x128xf32> to vector<18x16x128xf32>
    %96 = arith.select %84, %90, %95 : vector<18x16x128xi1>, vector<18x16x128xf32>
    %97 = vector.extract_strided_slice %93 {offsets = [0, 0, 0], sizes = [16, 16, 128], strides = [1, 1, 1]} : vector<18x16x128xf32> to vector<16x16x128xf32>
    %98 = vector.shape_cast %97 : vector<16x16x128xf32> to vector<256x128xf32>
    %99 = vector.extract_strided_slice %73 {offsets = [0, 0, 0], sizes = [16, 16, 128], strides = [1, 1, 1]} : vector<18x16x128xf32> to vector<16x16x128xf32>
    %100 = vector.shape_cast %99 : vector<16x16x128xf32> to vector<256x128xf32>
    %101 = vector.extract_strided_slice %96 {offsets = [0, 0, 0], sizes = [16, 16, 128], strides = [1, 1, 1]} : vector<18x16x128xf32> to vector<16x16x128xf32>
    %102 = vector.shape_cast %101 : vector<16x16x128xf32> to vector<256x128xf32>
    %103 = vector.extract_strided_slice %93 {offsets = [1, 0, 0], sizes = [16, 16, 128], strides = [1, 1, 1]} : vector<18x16x128xf32> to vector<16x16x128xf32>
    %104 = vector.shape_cast %103 : vector<16x16x128xf32> to vector<256x128xf32>
    %105 = vector.extract_strided_slice %73 {offsets = [1, 0, 0], sizes = [16, 16, 128], strides = [1, 1, 1]} : vector<18x16x128xf32> to vector<16x16x128xf32>
    %106 = vector.shape_cast %105 : vector<16x16x128xf32> to vector<256x128xf32>
    %107 = vector.extract_strided_slice %96 {offsets = [1, 0, 0], sizes = [16, 16, 128], strides = [1, 1, 1]} : vector<18x16x128xf32> to vector<16x16x128xf32>
    %108 = vector.shape_cast %107 : vector<16x16x128xf32> to vector<256x128xf32>
    %109 = vector.extract_strided_slice %93 {offsets = [2, 0, 0], sizes = [16, 16, 128], strides = [1, 1, 1]} : vector<18x16x128xf32> to vector<16x16x128xf32>
    %110 = vector.shape_cast %109 : vector<16x16x128xf32> to vector<256x128xf32>
    %111 = vector.extract_strided_slice %73 {offsets = [2, 0, 0], sizes = [16, 16, 128], strides = [1, 1, 1]} : vector<18x16x128xf32> to vector<16x16x128xf32>
    %112 = vector.shape_cast %111 : vector<16x16x128xf32> to vector<256x128xf32>
    %113 = vector.extract_strided_slice %96 {offsets = [2, 0, 0], sizes = [16, 16, 128], strides = [1, 1, 1]} : vector<18x16x128xf32> to vector<16x16x128xf32>
    %114 = vector.shape_cast %113 : vector<16x16x128xf32> to vector<256x128xf32>
    %115 = tpu.concatenate %98, %100, %102, %104, %106, %108, %110, %112, %114 in 1 : vector<256x128xf32>, vector<256x128xf32>, vector<256x128xf32>, vector<256x128xf32>, vector<256x128xf32>, vector<256x128xf32>, vector<256x128xf32>, vector<256x128xf32>, vector<256x128xf32> -> vector<256x1152xf32>
    %c0_37 = arith.constant 0 : index
    %c0_38 = arith.constant 0 : index
    %116 = vector.load %arg10[%c0_37, %c0_38] : memref<1152x128xf32, #tpu.memory_space<vmem>>, vector<1152x128xf32>
    %cst_39 = arith.constant dense<0.000000e+00> : vector<256x128xf32>
    %117 = tpu.matmul %115, %116, %cst_39 {dimension_numbers = #tpu.dot_dimension_numbers<[1], [0], [0], [1], [0, 0, 1, 1], [], []>} : vector<256x1152xf32>, vector<1152x128xf32>, vector<256x128xf32> -> vector<256x128xf32>
    %c0_40 = arith.constant 0 : index
    %c0_41 = arith.constant 0 : index
    %118 = vector.load %arg11[%c0_40, %c0_41] : memref<1x128xf32, #tpu.memory_space<vmem>>, vector<1x128xf32>
    %119 = vector.broadcast %118 : vector<1x128xf32> to vector<256x128xf32>
    %120 = arith.addf %117, %119 : vector<256x128xf32>
    %cst_42 = arith.constant 0.000000e+00 : f32
    %121 = vector.broadcast %cst_42 : f32 to vector<256x128xf32>
    %122 = arith.maximumf %120, %121 : vector<256x128xf32>
    %cst_43 = arith.constant 0.000000e+00 : f32
    %123 = vector.broadcast %cst_43 : f32 to vector<256x32xf32>
    %124 = tpu.concatenate %1, %3, %5, %123 in 1 : vector<256x32xf32>, vector<256x32xf32>, vector<256x32xf32>, vector<256x32xf32> -> vector<256x128xf32>
    %125 = arith.addf %124, %122 : vector<256x128xf32>
    %c0_44 = arith.constant 0 : index
    %c0_45 = arith.constant 0 : index
    %c0_46 = arith.constant 0 : index
    %126 = vector.load %arg12[%c0_44, %c0_45, %c0_46] : memref<1x256x128xf32, #tpu.memory_space<vmem>>, vector<1x256x128xf32>
    %127 = vector.shape_cast %126 : vector<1x256x128xf32> to vector<256x128xf32>
    %128 = vector.shape_cast %125 : vector<256x128xf32> to vector<1x256x128xf32>
    tpu.vector_store %arg12[%c0_44, %c0_45, %c0_46], %128 {strides = array<i32>} : memref<1x256x128xf32, #tpu.memory_space<vmem>>, vector<1x256x128xf32>,
    return
  }
  func.func @transform_0(%arg0: i32) -> (i32, i32, i32) {
    %c0_i32 = arith.constant 0 : i32
    %c0_i32_0 = arith.constant 0 : i32
    %c0_i32_1 = arith.constant 0 : i32
    return %arg0, %c0_i32, %c0_i32_0 : i32, i32, i32
  }
  func.func @transform_1(%arg0: i32) -> (i32, i32, i32) {
    %c0_i32 = arith.constant 0 : i32
    %c0_i32_0 = arith.constant 0 : i32
    %c0_i32_1 = arith.constant 0 : i32
    return %arg0, %c0_i32, %c0_i32_0 : i32, i32, i32
  }
  func.func @transform_2(%arg0: i32) -> (i32, i32, i32) {
    %c0_i32 = arith.constant 0 : i32
    %c0_i32_0 = arith.constant 0 : i32
    %c0_i32_1 = arith.constant 0 : i32
    return %arg0, %c0_i32, %c0_i32_0 : i32, i32, i32
  }
  func.func @transform_3(%arg0: i32) -> (i32, i32) {
    %c0_i32 = arith.constant 0 : i32
    %c0_i32_0 = arith.constant 0 : i32
    %c0_i32_1 = arith.constant 0 : i32
    return %c0_i32, %c0_i32_0 : i32, i32
  }
  func.func @transform_4(%arg0: i32) -> (i32, i32) {
    %c0_i32 = arith.constant 0 : i32
    %c0_i32_0 = arith.constant 0 : i32
    %c0_i32_1 = arith.constant 0 : i32
    return %c0_i32, %c0_i32_0 : i32, i32
  }
  func.func @transform_5(%arg0: i32) -> (i32, i32) {
    %c0_i32 = arith.constant 0 : i32
    %c0_i32_0 = arith.constant 0 : i32
    %c0_i32_1 = arith.constant 0 : i32
    return %c0_i32, %c0_i32_0 : i32, i32
  }
  func.func @transform_6(%arg0: i32) -> (i32, i32) {
    %c0_i32 = arith.constant 0 : i32
    %c0_i32_0 = arith.constant 0 : i32
    %c0_i32_1 = arith.constant 0 : i32
    return %c0_i32, %c0_i32_0 : i32, i32
  }
  func.func @transform_7(%arg0: i32) -> (i32, i32, i32) {
    %c0_i32 = arith.constant 0 : i32
    %c0_i32_0 = arith.constant 0 : i32
    %c0_i32_1 = arith.constant 0 : i32
    %c0_i32_2 = arith.constant 0 : i32
    return %c0_i32, %c0_i32_0, %c0_i32_1 : i32, i32, i32
  }
  func.func @transform_8(%arg0: i32) -> (i32, i32) {
    %c0_i32 = arith.constant 0 : i32
    %c0_i32_0 = arith.constant 0 : i32
    %c0_i32_1 = arith.constant 0 : i32
    return %c0_i32, %c0_i32_0 : i32, i32
  }
  func.func @transform_9(%arg0: i32) -> (i32, i32) {
    %c0_i32 = arith.constant 0 : i32
    %c0_i32_0 = arith.constant 0 : i32
    %c0_i32_1 = arith.constant 0 : i32
    return %c0_i32, %c0_i32_0 : i32, i32
  }
  func.func @transform_10(%arg0: i32) -> (i32, i32) {
    %c0_i32 = arith.constant 0 : i32
    %c0_i32_0 = arith.constant 0 : i32
    %c0_i32_1 = arith.constant 0 : i32
    return %c0_i32, %c0_i32_0 : i32, i32
  }
  func.func @transform_11(%arg0: i32) -> (i32, i32, i32) {
    %c0_i32 = arith.constant 0 : i32
    %c0_i32_0 = arith.constant 0 : i32
    %c0_i32_1 = arith.constant 0 : i32
    return %arg0, %c0_i32, %c0_i32_0 : i32, i32, i32
  }
}

</mosaic_0001>

<bundles_post_ra>
// kernel: mf_encoder_forward.1
= control target key start
LH: loop header
LB: loop body
LE: loop exit
PB: predicated region body
PF: predicated region fallthrough
CT: control target
= control target key end

     0   :  { %s5484_s17 = smov 0   ;;  %s8725_s0 = inlined_call_operand.vmem [shape: f32[2,256,32], index: 0, kind: input, shape index: {}]   ;;  %s8726_s1 = inlined_call_operand.vmem [shape: f32[2,256,32], index: 1, kind: input, shape index: {}]   ;;  %s8727_s2 = inlined_call_operand.vmem [shape: f32[2,256,32], index: 2, kind: input, shape index: {}]   ;;  %s8728_s3 = inlined_call_operand.vmem [shape: f32[32,8], index: 3, kind: input, shape index: {}]   ;;  %s8729_s4 = inlined_call_operand.vmem [shape: f32[1,8], index: 4, kind: input, shape index: {}]   ;;  %s8730_s5 = inlined_call_operand.vmem [shape: f32[8,96], index: 5, kind: input, shape index: {}]   ;;  %s8731_s6 = inlined_call_operand.vmem [shape: f32[1,96], index: 6, kind: input, shape index: {}]   ;;  %s8732_s7 = inlined_call_operand.vmem [shape: f32[3,32,128], index: 7, kind: input, shape index: {}]   ;;  %s8733_s8 = inlined_call_operand.vmem [shape: f32[1,128], index: 8, kind: input, shape index: {}]   ;;  %s8734_s9 = inlined_call_operand.vmem [shape: f32[1152,128], index: 9, kind: input, shape index: {}]   ;;  %s8735_s10 = inlined_call_operand.vmem [shape: f32[1,128], index: 10, kind: input, shape index: {}]   ;;  %s8736_s11 = inlined_call_operand.vmem [shape: f32[2,256,128], index: 11, kind: output, shape index: {}]  }
   0x1 LB: > { %s4253_s18 = sadd.s32 4294967295, %s5416_s17   ;;  %p4257_p0 = scmp.ge.s32.totalorder %s5416_s17, 1  ;;  %s5416_s17 = sphi %s5484_s17, %s21_s17  }
   0x2   : > { %p357_p1 = scmp.lt.s32.totalorder %s5416_s17, 3 }
   0x4   : > { %p358_p2 = pnand %p4257_p0, %p357_p1 }
   0x6   : > { %361 = sbr.rel (%p358_p2) target bundleno = 2066 (0x812), region = 64 }
   0xd   : > { %v737_v0 = vld [vmem:[%s8728_s3] sm:$0xff]  ;;  %v738_v1 = vld [vmem:[%s8728_s3 + $0x8] sm:$0xff]  ;;  %v739_v2 = vld [vmem:[%s8728_s3 + $0x10] sm:$0xff]  ;;  %v8737_v3 = vmov 0.0|0.0   ;;  %vm5419_vm0 = vmmov 0   ;;  %v8739_v6 = vmov 0.0  }
   0xe   : > { %4807 = vmatprep.subr.bf16.mxu1 %v8737_v3  ;;  %v4808_v4 = vpack.c.bf16 %v738_v1, %v737_v0  ;;  %v740_v5 = vld [vmem:[%s8728_s3 + $0x18] sm:$0xff]  ;;  %4551 = vmatprep.mubr.msk.f32.mxu1 %vm5419_vm0, %v8739_v6  ;;  %p407_p3 = scmp.lt.s32.totalorder %s4253_s18, 1  ;;  %vm523_vm1 = vcmask 261120   ;;  %vm818_vm2 = vcmask 64512   ;;  %s5421_s25 = smov 96   ;;  %vm4044_vm7 = vcmask 523264  }
   0xf   : > { %4885 = vmatprep.subr.bf16.mxu0 %v8737_v3  ;;  %v4811_v7 = vpack.c.bf16 %v740_v5, %v739_v2  ;;  %s5422_s26 = smov 64   ;;  %s5423_s28 = smov 32   ;;  %vm4077_vm8 = vcmask 785408  }
  0x10   : > { %4809 = vmatpush3.bf16.msra.mxu1 %v4808_v4  ;;  %s9369_s18 = smov (!%p407_p3, %s4253_s18), 1 }
  0x11   : > { %4810 = vmatprep.subr.bf16.mxu1 %v8737_v3  ;;  %s5509_s27 = sshll.u32 %s9369_s18, 8 }
  0x12   : > { %s5515_s30 = scalar_lea.vmem %s8725_s0, %s5509_s27  ;;  %s5553_s14 = scalar_lea.vmem %s8726_s1, %s5509_s27 }
  0x13   : > { %v5518_v8 = vld [vmem:[%s5515_s30] sm:$0xff]  ;;  %v5521_v9 = vld [vmem:[%s5515_s30 + $0x8] sm:$0xff]  ;;  %v5524_v10 = vld [vmem:[%s5515_s30 + $0x10] sm:$0xff]  ;;  %s5603_s18 = scalar_lea.vmem %s8727_s2, %s5509_s27  ;;  %s8445_s19 = scalar_lea.vmem %s8736_s11, %s5509_s27 }
  0x14   : > { %4812 = vmatpush3.bf16.msra.mxu1 %v4811_v7  ;;  %8936 = vst [vmem:[#allocation2_spill] sm:$0xff] %v5518_v8  ;;  %8937 = vst [vmem:[#allocation3_spill] sm:$0xff] %v5521_v9  ;;  %v5527_v11 = vld [vmem:[%s5515_s30 + $0x18] sm:$0xff]  ;;  %v524_v12 = vsel %vm523_vm1, %v5518_v8, 0.0  ;;  %v525_v13 = vsel %vm523_vm1, %v5521_v9, 0.0  ;;  %v527_v14 = vsel %vm523_vm1, %v5524_v10, 0.0 }
  0x15   : > { %8938 = vst [vmem:[#allocation4_spill] sm:$0xff] %v5524_v10  ;;  %8939 = vst [vmem:[#allocation5_spill] sm:$0xff] %v5527_v11  ;;  %4554 = vmatprep.subr.mxu1 %v8739_v6  ;;  %v5537_v15 = vld [vmem:[%s5515_s30 + $0x20] sm:$0xff]  ;;  %v526_v16 = vadd.f32 %v525_v13, %v524_v12  ;;  %v529_v17 = vsel %vm523_vm1, %v5527_v11, 0.0  ;;  %v5542_v18 = vld [vmem:[%s5515_s30 + $0x28] sm:$0xff] }
  0x16   : > { %8940 = vst [vmem:[#allocation6_spill] sm:$0xff] %v5537_v15  ;;  %8941 = vst [vmem:[#allocation7_spill] sm:$0xff] %v5542_v18  ;;  %v531_v20 = vsel %vm523_vm1, %v5537_v15, 0.0  ;;  %v5547_v21 = vld [vmem:[%s5515_s30 + $0x30] sm:$0xff]  ;;  %v533_v23 = vsel %vm523_vm1, %v5542_v18, 0.0  ;;  %v434_v24 = vld [vmem:[%s5515_s30 + $0x38] sm:$0xff] }
  0x17   : > { %v528_v19 = vadd.f32 %v527_v14, %v526_v16  ;;  %8942 = vst [vmem:[#allocation8_spill] sm:$0xff] %v5547_v21  ;;  %v535_v26 = vsel %vm523_vm1, %v5547_v21, 0.0  ;;  %v435_v27 = vld [vmem:[%s5515_s30 + $0x40] sm:$0xff]  ;;  %v5565_v30 = vld [vmem:[%s5553_s14 + $0x8] sm:$0xff]  ;;  %v5568_v31 = vld [vmem:[%s5553_s14 + $0x10] sm:$0xff]  ;;  %v537_v33 = vsel %vm523_vm1, %v434_v24, 0.0 }
  0x18   : > { %v5562_v28 = vld [vmem:[%s5553_s14] sm:$0xff]  ;;  %v5571_v32 = vld [vmem:[%s5553_s14 + $0x18] sm:$0xff]  ;;  %v436_v35 = vld [vmem:[%s5515_s30 + $0x48] sm:$0xff]  ;;  %v596_v37 = vsel %vm523_vm1, %v5565_v30, 0.0  ;;  %v598_v38 = vsel %vm523_vm1, %v5568_v31, 0.0  ;;  %v539_v40 = vsel %vm523_vm1, %v435_v27, 0.0 }
  0x19   : > { %v530_v22 = vadd.f32 %v529_v17, %v528_v19  ;;  %v595_v34 = vsel %vm523_vm1, %v5562_v28, 0.0  ;;  %v5582_v39 = vld [vmem:[%s5553_s14 + $0x20] sm:$0xff]  ;;  %v437_v42 = vld [vmem:[%s5515_s30 + $0x50] sm:$0xff]  ;;  %v600_v44 = vsel %vm523_vm1, %v5571_v32, 0.0  ;;  %v5589_v45 = vld [vmem:[%s5553_s14 + $0x28] sm:$0xff]  ;;  %v541_v46 = vsel %vm523_vm1, %v436_v35, 0.0 }
  0x1a   : > { %v597_v41 = vadd.f32 %v596_v37, %v595_v34  ;;  %v438_v48 = vld [vmem:[%s5515_s30 + $0x58] sm:$0xff]  ;;  %v602_v50 = vsel %vm523_vm1, %v5582_v39, 0.0  ;;  %v5596_v51 = vld [vmem:[%s5553_s14 + $0x30] sm:$0xff]  ;;  %v543_v52 = vsel %vm523_vm1, %v437_v42, 0.0  ;;  %v439_v54 = vld [vmem:[%s5515_s30 + $0x60] sm:$0xff]  ;;  %v604_v56 = vsel %vm523_vm1, %v5589_v45, 0.0 }
  0x1b   : > { %v532_v25 = vadd.f32 %v531_v20, %v530_v22  ;;  %v5609_v57 = vld [vmem:[%s5553_s14 + $0x38] sm:$0xff]  ;;  %v545_v58 = vsel %vm523_vm1, %v438_v48, 0.0  ;;  %v440_v60 = vld [vmem:[%s5515_s30 + $0x68] sm:$0xff]  ;;  %v606_v62 = vsel %vm523_vm1, %v5596_v51, 0.0  ;;  %v5616_v63 = vld [vmem:[%s5553_s14 + $0x40] sm:$0xff]  ;;  %v547_v2 = vsel %vm523_vm1, %v439_v54, 0.0 }
  0x1c   : > { %v599_v47 = vadd.f32 %v598_v38, %v597_v41  ;;  %v5619_v0 = vld [vmem:[%s5603_s18] sm:$0xff]  ;;  %v5622_v1 = vld [vmem:[%s5603_s18 + $0x8] sm:$0xff]  ;;  %v441_v5 = vld [vmem:[%s5515_s30 + $0x70] sm:$0xff]  ;;  %v608_v14 = vsel %vm523_vm1, %v5609_v57, 0.0  ;;  %v549_v22 = vsel %vm523_vm1, %v440_v60, 0.0 }
  0x1d   : > { %v534_v29 = vadd.f32 %v533_v23, %v532_v25  ;;  %v5627_v7 = vld [vmem:[%s5603_s18 + $0x10] sm:$0xff]  ;;  %v5630_v12 = vld [vmem:[%s5603_s18 + $0x18] sm:$0xff]  ;;  %v666_v16 = vsel %vm523_vm1, %v5619_v0, 0.0  ;;  %v667_v17 = vsel %vm523_vm1, %v5622_v1, 0.0  ;;  %v5639_v19 = vld [vmem:[%s5553_s14 + $0x48] sm:$0xff] }
  0x1e   : > { %v601_v53 = vadd.f32 %v600_v44, %v599_v47  ;;  %v5642_v20 = vld [vmem:[%s5603_s18 + $0x20] sm:$0xff]  ;;  %v668_v24 = vadd.f32 %v667_v17, %v666_v16  ;;  %v669_v25 = vsel %vm523_vm1, %v5627_v7, 0.0  ;;  %v5653_v34 = vld [vmem:[%s5553_s14 + $0x50] sm:$0xff]  ;;  %v5656_v35 = vld [vmem:[%s5603_s18 + $0x28] sm:$0xff]  ;;  %v612_v42 = vsel %vm523_vm1, %v5639_v19, 0.0 }
  0x1f   : > { %v536_v36 = vadd.f32 %v535_v26, %v534_v29  ;;  %v442_v26 = vld [vmem:[%s5515_s30 + $0x78] sm:$0xff]  ;;  %v610_v29 = vsel %vm523_vm1, %v5616_v63, 0.0  ;;  %v675_v54 = vsel %vm523_vm1, %v5656_v35, 0.0  ;;  %v5834_v21 = vld [vmem:[%s5603_s18 + $0x88] sm:$0xff]  ;;  %v5849_v15 = vld [vmem:[%s5603_s18 + $0x90] sm:$0xff] }
  0x20   : > { %v603_v59 = vadd.f32 %v602_v50, %v601_v53  ;;  %v670_v38 = vadd.f32 %v669_v25, %v668_v24  ;;  %v5667_v44 = vld [vmem:[%s5553_s14 + $0x58] sm:$0xff]  ;;  %v553_v47 = vsel %vm523_vm1, %v442_v26, 0.0  ;;  %v5674_v50 = vld [vmem:[%s5515_s30 + $0x88] sm:$0xff]  ;;  %v614_v53 = vsel %vm523_vm1, %v5653_v34, 0.0  ;;  %v5711_v26 = vld [vmem:[%s5553_s14 + $0x70] sm:$0xff]  ;;  %8965 = vst [vmem:[#allocation31_spill] sm:$0xff] %v5834_v21 }
  0x21   : > { %v538_v43 = vadd.f32 %v537_v33, %v536_v36  ;;  %v671_v33 = vsel %vm523_vm1, %v5630_v12, 0.0  ;;  %v551_v36 = vsel %vm523_vm1, %v441_v5, 0.0  ;;  %8945 = vst [vmem:[#allocation11_spill] sm:$0xff] %v5674_v50  ;;  %v5696_v5 = vld [vmem:[%s5553_s14 + $0x68] sm:$0xff]  ;;  %v5786_v6 = vld [vmem:[%s5553_s14 + $0x98] sm:$0xff]  ;;  %8968 = vst [vmem:[#allocation34_spill] sm:$0xff] %v5849_v15 }
  0x22   : > { %v605_v4 = vadd.f32 %v604_v56, %v603_v59  ;;  %v5684_v56 = vld [vmem:[%s5603_s18 + $0x38] sm:$0xff]  ;;  %v5861_v11 = vld [vmem:[%s5553_s14 + $0xc0] sm:$0xff]  ;;  %v5876_v9 = vld [vmem:[%s5553_s14 + $0xc8] sm:$0xff] }
  0x23   : > { %v540_v49 = vadd.f32 %v539_v40, %v538_v43  ;;  %v5660_v40 = vld [vmem:[%s5515_s30 + $0x80] sm:$0xff]  ;;  %v673_v43 = vsel %vm523_vm1, %v5642_v20, 0.0  ;;  %v679_v25 = vsel %vm523_vm1, %v5684_v56, 0.0  ;;  %v5846_v18 = vld [vmem:[%s5553_s14 + $0xb8] sm:$0xff]  ;;  %8970 = vst [vmem:[#allocation36_spill] sm:$0xff] %v5861_v11  ;;  %8973 = vst [vmem:[#allocation39_spill] sm:$0xff] %v5876_v9 }
  0x24   : > { %v607_v23 = vadd.f32 %v606_v62, %v605_v4  ;;  %8943 = vst [vmem:[#allocation9_spill] sm:$0xff] %v5660_v40  ;;  %8967 = vst [vmem:[#allocation33_spill] sm:$0xff] %v5846_v18  ;;  %v5864_v10 = vld [vmem:[%s5603_s18 + $0x98] sm:$0xff]  ;;  %v5879_v8 = vld [vmem:[%s5603_s18 + $0xa0] sm:$0xff] }
  0x25   : > { %v542_v55 = vadd.f32 %v541_v46, %v540_v49  ;;  %v5670_v46 = vld [vmem:[%s5603_s18 + $0x30] sm:$0xff]  ;;  %v672_v49 = vadd.f32 %v671_v33, %v670_v38  ;;  %8971 = vst [vmem:[#allocation37_spill] sm:$0xff] %v5864_v10  ;;  %8974 = vst [vmem:[#allocation40_spill] sm:$0xff] %v5879_v8 }
  0x26   : > { %v609_v37 = vadd.f32 %v608_v14, %v607_v23  ;;  %8944 = vst [vmem:[#allocation10_spill] sm:$0xff] %v5670_v46  ;;  %v677_v4 = vsel %vm523_vm1, %v5670_v46, 0.0  ;;  %v557_v14 = vsel %vm523_vm1, %v5674_v50, 0.0  ;;  %v5819_v50 = vld [vmem:[%s5603_s18 + $0x80] sm:$0xff] }
  0x27   : > { %v544_v61 = vadd.f32 %v543_v52, %v542_v55  ;;  %v5681_v55 = vld [vmem:[%s5553_s14 + $0x60] sm:$0xff]  ;;  %v674_v60 = vadd.f32 %v673_v43, %v672_v49  ;;  %v5726_v43 = vld [vmem:[%s5553_s14 + $0x78] sm:$0xff]  ;;  %8963 = vst [vmem:[#allocation29_spill] sm:$0xff] %v5819_v50 }
  0x28   : > { %v611_v48 = vadd.f32 %v610_v29, %v609_v37  ;;  %v618_v24 = vsel %vm523_vm1, %v5681_v55, 0.0  ;;  %v5719_v37 = vld [vmem:[%s5515_s30 + $0xa0] sm:$0xff] }
  0x29   : > { %v546_v13 = vadd.f32 %v545_v58, %v544_v61  ;;  %v555_v58 = vsel %vm523_vm1, %v5660_v40, 0.0  ;;  %v5689_v61 = vld [vmem:[%s5515_s30 + $0x90] sm:$0xff]  ;;  %v676_v17 = vadd.f32 %v675_v54, %v674_v60  ;;  %8950 = vst [vmem:[#allocation16_spill] sm:$0xff] %v5719_v37  ;;  %v5741_v60 = vld [vmem:[%s5553_s14 + $0x80] sm:$0xff] }
  0x2a   : > { %v613_v59 = vadd.f32 %v612_v42, %v611_v48  ;;  %8946 = vst [vmem:[#allocation12_spill] sm:$0xff] %v5689_v61  ;;  %v559_v29 = vsel %vm523_vm1, %v5689_v61, 0.0  ;;  %v5816_v61 = vld [vmem:[%s5553_s14 + $0xa8] sm:$0xff]  ;;  %v5831_v40 = vld [vmem:[%s5553_s14 + $0xb0] sm:$0xff] }
  0x2b   : > { %v548_v27 = vadd.f32 %v547_v2, %v546_v13  ;;  %v616_v2 = vsel %vm523_vm1, %v5667_v44, 0.0  ;;  %v5699_v13 = vld [vmem:[%s5603_s18 + $0x40] sm:$0xff] }
  0x2c   : > { %8947 = vst [vmem:[#allocation13_spill] sm:$0xff] %v5699_v13  ;;  %v615_v16 = vadd.f32 %v614_v53, %v613_v59  ;;  %v681_v42 = vsel %vm523_vm1, %v5699_v13, 0.0  ;;  %v5734_v53 = vld [vmem:[%s5515_s30 + $0xa8] sm:$0xff] }
  0x2d   : > { %v550_v41 = vadd.f32 %v549_v22, %v548_v27  ;;  %v5704_v22 = vld [vmem:[%s5515_s30 + $0x98] sm:$0xff]  ;;  %v5714_v27 = vld [vmem:[%s5603_s18 + $0x48] sm:$0xff]  ;;  %8952 = vst [vmem:[#allocation18_spill] sm:$0xff] %v5734_v53 }
  0x2e   : > { %8948 = vst [vmem:[#allocation14_spill] sm:$0xff] %v5704_v22  ;;  %8949 = vst [vmem:[#allocation15_spill] sm:$0xff] %v5714_v27  ;;  %v617_v33 = vadd.f32 %v616_v2, %v615_v16  ;;  %v561_v48 = vsel %vm523_vm1, %v5704_v22, 0.0  ;;  %v683_v59 = vsel %vm523_vm1, %v5714_v27, 0.0  ;;  %v563_v2 = vsel %vm523_vm1, %v5719_v37, 0.0  ;;  %v5749_v16 = vld [vmem:[%s5515_s30 + $0xb0] sm:$0xff] }
  0x2f   : > { %v552_v52 = vadd.f32 %v551_v36, %v550_v41  ;;  %v678_v36 = vadd.f32 %v677_v4, %v676_v17  ;;  %v620_v41 = vsel %vm523_vm1, %v5696_v5, 0.0  ;;  %8954 = vst [vmem:[#allocation20_spill] sm:$0xff] %v5749_v16  ;;  %v567_v3 = vsel %vm523_vm1, %v5749_v16, 0.0  ;;  %v5801_v37 = vld [vmem:[%s5553_s14 + $0xa0] sm:$0xff]  ;;  %v5804_v22 = vld [vmem:[%s5603_s18 + $0x78] sm:$0xff] }
  0x30   : > { %v619_v49 = vadd.f32 %v618_v24, %v617_v33  ;;  %v565_v33 = vsel %vm523_vm1, %v5734_v53, 0.0  ;;  %v5789_v53 = vld [vmem:[%s5603_s18 + $0x70] sm:$0xff]  ;;  %8961 = vst [vmem:[#allocation27_spill] sm:$0xff] %v5804_v22 }
  0x31   : > { %v554_v62 = vadd.f32 %v553_v47, %v552_v52  ;;  %v5729_v47 = vld [vmem:[%s5603_s18 + $0x50] sm:$0xff]  ;;  %v680_v52 = vadd.f32 %v679_v25, %v678_v36  ;;  %v5756_v25 = vld [vmem:[%s5553_s14 + $0x88] sm:$0xff]  ;;  %8959 = vst [vmem:[#allocation25_spill] sm:$0xff] %v5789_v53 }
  0x32   : > { %8951 = vst [vmem:[#allocation17_spill] sm:$0xff] %v5729_v47  ;;  %v621_v4 = vadd.f32 %v620_v41, %v619_v49  ;;  %v685_v24 = vsel %vm523_vm1, %v5729_v47, 0.0  ;;  %v5764_v41 = vld [vmem:[%s5515_s30 + $0xb8] sm:$0xff] }
  0x33   : > { %v556_v23 = vadd.f32 %v555_v58, %v554_v62  ;;  %v622_v58 = vsel %vm523_vm1, %v5711_v26, 0.0  ;;  %v5744_v62 = vld [vmem:[%s5603_s18 + $0x58] sm:$0xff]  ;;  %8956 = vst [vmem:[#allocation22_spill] sm:$0xff] %v5764_v41  ;;  %v569_v16 = vsel %vm523_vm1, %v5764_v41, 0.0 }
  0x34   : > { %8953 = vst [vmem:[#allocation19_spill] sm:$0xff] %v5744_v62  ;;  %v623_v36 = vadd.f32 %v622_v58, %v621_v4  ;;  %v687_v49 = vsel %vm523_vm1, %v5744_v62, 0.0  ;;  %v5779_v4 = vld [vmem:[%s5515_s30 + $0xc0] sm:$0xff] }
  0x35   : > { %v558_v38 = vadd.f32 %v557_v14, %v556_v23  ;;  %v682_v14 = vadd.f32 %v681_v42, %v680_v52  ;;  %v624_v23 = vsel %vm523_vm1, %v5726_v43, 0.0  ;;  %v5771_v52 = vld [vmem:[%s5553_s14 + $0x90] sm:$0xff]  ;;  %8958 = vst [vmem:[#allocation24_spill] sm:$0xff] %v5779_v4  ;;  %v571_v41 = vsel %vm523_vm1, %v5779_v4, 0.0 }
  0x36   : > { %v625_v58 = vadd.f32 %v624_v23, %v623_v36  ;;  %v5794_v36 = vld [vmem:[%s5515_s30 + $0xc8] sm:$0xff] }
  0x37   : > { %v560_v54 = vadd.f32 %v559_v29, %v558_v38  ;;  %v5759_v29 = vld [vmem:[%s5603_s18 + $0x60] sm:$0xff]  ;;  %v684_v38 = vadd.f32 %v683_v59, %v682_v14  ;;  %v628_v14 = vsel %vm523_vm1, %v5756_v25, 0.0  ;;  %8960 = vst [vmem:[#allocation26_spill] sm:$0xff] %v5794_v36  ;;  %v573_v4 = vsel %vm523_vm1, %v5794_v36, 0.0 }
  0x38   : > { %8955 = vst [vmem:[#allocation21_spill] sm:$0xff] %v5759_v29 }
  0x39   : > { %v562_v17 = vadd.f32 %v561_v48, %v560_v54  ;;  %v626_v48 = vsel %vm523_vm1, %v5741_v60, 0.0  ;;  %v5774_v54 = vld [vmem:[%s5603_s18 + $0x68] sm:$0xff]  ;;  %v686_v59 = vadd.f32 %v685_v24, %v684_v38  ;;  %v630_v38 = vsel %vm523_vm1, %v5771_v52, 0.0 }
  0x3a   : > { %8957 = vst [vmem:[#allocation23_spill] sm:$0xff] %v5774_v54  ;;  %v627_v23 = vadd.f32 %v626_v48, %v625_v58  ;;  %v5809_v58 = vld [vmem:[%s5515_s30 + $0xd0] sm:$0xff] }
  0x3b   : > { %v564_v42 = vadd.f32 %v563_v2, %v562_v17  ;;  %v689_v17 = vsel %vm523_vm1, %v5759_v29, 0.0  ;;  %v688_v24 = vadd.f32 %v687_v49, %v686_v59  ;;  %8962 = vst [vmem:[#allocation28_spill] sm:$0xff] %v5809_v58  ;;  %v632_v59 = vsel %vm523_vm1, %v5786_v6, 0.0 }
  0x3c   : > { %v629_v48 = vadd.f32 %v628_v14, %v627_v23  ;;  %v5824_v23 = vld [vmem:[%s5515_s30 + $0xd8] sm:$0xff]  ;;  %v575_v36 = vsel %vm523_vm1, %v5809_v58, 0.0 }
  0x3d   : > { %v566_v2 = vadd.f32 %v565_v33, %v564_v42  ;;  %v691_v42 = vsel %vm523_vm1, %v5774_v54, 0.0  ;;  %v690_v49 = vadd.f32 %v689_v17, %v688_v24  ;;  %8964 = vst [vmem:[#allocation30_spill] sm:$0xff] %v5824_v23  ;;  %v634_v24 = vsel %vm523_vm1, %v5801_v37, 0.0 }
  0x3e   : > { %v631_v14 = vadd.f32 %v630_v38, %v629_v48  ;;  %v5839_v48 = vld [vmem:[%s5515_s30 + $0xe0] sm:$0xff]  ;;  %v577_v58 = vsel %vm523_vm1, %v5824_v23, 0.0 }
  0x3f   : > { %v568_v33 = vadd.f32 %v567_v3, %v566_v2  ;;  %v693_v2 = vsel %vm523_vm1, %v5789_v53, 0.0  ;;  %v692_v17 = vadd.f32 %v691_v42, %v690_v49  ;;  %8966 = vst [vmem:[#allocation32_spill] sm:$0xff] %v5839_v48  ;;  %v636_v49 = vsel %vm523_vm1, %v5816_v61, 0.0 }
  0x40   : > { %v633_v38 = vadd.f32 %v632_v59, %v631_v14  ;;  %v5854_v14 = vld [vmem:[%s5515_s30 + $0xe8] sm:$0xff]  ;;  %v579_v23 = vsel %vm523_vm1, %v5839_v48, 0.0 }
  0x41   : > { %v570_v3 = vadd.f32 %v569_v16, %v568_v33  ;;  %v695_v33 = vsel %vm523_vm1, %v5804_v22, 0.0  ;;  %v694_v42 = vadd.f32 %v693_v2, %v692_v17  ;;  %8969 = vst [vmem:[#allocation35_spill] sm:$0xff] %v5854_v14  ;;  %v638_v17 = vsel %vm523_vm1, %v5831_v40, 0.0 }
  0x42   : > { %v635_v59 = vadd.f32 %v634_v24, %v633_v38  ;;  %v5869_v38 = vld [vmem:[%s5515_s30 + $0xf0] sm:$0xff]  ;;  %v581_v48 = vsel %vm523_vm1, %v5854_v14, 0.0 }
  0x43   : > { %v572_v16 = vadd.f32 %v571_v41, %v570_v3  ;;  %v697_v3 = vsel %vm523_vm1, %v5819_v50, 0.0  ;;  %v696_v2 = vadd.f32 %v695_v33, %v694_v42  ;;  %8972 = vst [vmem:[#allocation38_spill] sm:$0xff] %v5869_v38  ;;  %v640_v42 = vsel %vm523_vm1, %v5846_v18, 0.0  ;;  %v5894_v50 = vld [vmem:[%s5603_s18 + $0xa8] sm:$0xff] }
  0x44   : > { %v637_v24 = vadd.f32 %v636_v49, %v635_v59  ;;  %8977 = vst [vmem:[#allocation43_spill] sm:$0xff] %v5894_v50  ;;  %v583_v14 = vsel %vm523_vm1, %v5869_v38, 0.0 }
  0x45   : > { %v574_v41 = vadd.f32 %v573_v4, %v572_v16  ;;  %v699_v16 = vsel %vm523_vm1, %v5834_v21, 0.0  ;;  %v698_v33 = vadd.f32 %v697_v3, %v696_v2  ;;  %v703_v2 = vsel %vm523_vm1, %v5864_v10, 0.0  ;;  %v5906_v10 = vld [vmem:[%s5603_s18 + $0xb0] sm:$0xff] }
  0x46   : > { %v639_v49 = vadd.f32 %v638_v17, %v637_v24  ;;  %v644_v24 = vsel %vm523_vm1, %v5876_v9, 0.0  ;;  %8979 = vst [vmem:[#allocation45_spill] sm:$0xff] %v5906_v10 }
  0x47   : > { %v576_v4 = vadd.f32 %v575_v36, %v574_v41  ;;  %v701_v41 = vsel %vm523_vm1, %v5849_v15, 0.0  ;;  %v700_v3 = vadd.f32 %v699_v16, %v698_v33  ;;  %v5891_v15 = vld [vmem:[%s5553_s14 + $0xd0] sm:$0xff]  ;;  %v705_v33 = vsel %vm523_vm1, %v5879_v8, 0.0 }
  0x48   : > { %8976 = vst [vmem:[#allocation42_spill] sm:$0xff] %v5891_v15  ;;  %v641_v17 = vadd.f32 %v640_v42, %v639_v49  ;;  %v5915_v49 = vld [vmem:[%s5553_s14 + $0xe0] sm:$0xff] }
  0x49   : > { %v578_v36 = vadd.f32 %v577_v58, %v576_v4  ;;  %v642_v58 = vsel %vm523_vm1, %v5861_v11, 0.0  ;;  %v5888_v4 = vld [vmem:[%s5515_s30 + $0xf8] sm:$0xff]  ;;  %v702_v16 = vadd.f32 %v701_v41, %v700_v3  ;;  %v707_v41 = vsel %vm523_vm1, %v5894_v50, 0.0  ;;  %8980 = vst [vmem:[#allocation46_spill] sm:$0xff] %v5915_v49 }
  0x4a   : > { %8975 = vst [vmem:[#allocation41_spill] sm:$0xff] %v5888_v4  ;;  %v643_v21 = vadd.f32 %v642_v58, %v641_v17  ;;  %v585_v42 = vsel %vm523_vm1, %v5888_v4, 0.0  ;;  %v5918_v3 = vld [vmem:[%s5603_s18 + $0xb8] sm:$0xff]  ;;  %v709_v58 = vsel %vm523_vm1, %v5906_v10, 0.0  ;;  %v5928_v17 = vld [vmem:[%s5603_s18 + $0xc0] sm:$0xff] }
  0x4b   : > { %v580_v59 = vadd.f32 %v579_v23, %v578_v36  ;;  %v5903_v36 = vld [vmem:[%s5553_s14 + $0xd8] sm:$0xff]  ;;  %v704_v53 = vadd.f32 %v703_v2, %v702_v16  ;;  %8981 = vst [vmem:[#allocation47_spill] sm:$0xff] %v5918_v3  ;;  %v5925_v2 = vld [vmem:[%s5553_s14 + $0xe8] sm:$0xff]  ;;  %8983 = vst [vmem:[#allocation49_spill] sm:$0xff] %v5928_v17 }
  0x4c   : > { %8978 = vst [vmem:[#allocation44_spill] sm:$0xff] %v5903_v36  ;;  %8982 = vst [vmem:[#allocation48_spill] sm:$0xff] %v5925_v2  ;;  %v652_v50 = vsel %vm523_vm1, %v5925_v2, 0.0 }
  0x4d   : > { %v582_v23 = vadd.f32 %v581_v48, %v580_v59  ;;  %v646_v48 = vsel %vm523_vm1, %v5891_v15, 0.0  ;;  %v645_v59 = vadd.f32 %v644_v24, %v643_v21  ;;  %v706_v38 = vadd.f32 %v705_v33, %v704_v53  ;;  %v5935_v24 = vld [vmem:[%s5553_s14 + $0xf0] sm:$0xff]  ;;  %v5938_v33 = vld [vmem:[%s5603_s18 + $0xc8] sm:$0xff] }
  0x4e   : > { %v650_v21 = vsel %vm523_vm1, %v5915_v49, 0.0  ;;  %v711_v53 = vsel %vm523_vm1, %v5918_v3, 0.0  ;;  %8984 = vst [vmem:[#allocation50_spill] sm:$0xff] %v5935_v24  ;;  %8985 = vst [vmem:[#allocation51_spill] sm:$0xff] %v5938_v33  ;;  %v654_v3 = vsel %vm523_vm1, %v5935_v24, 0.0 }
  0x4f   : > { %v584_v22 = vadd.f32 %v583_v14, %v582_v23  ;;  %v648_v14 = vsel %vm523_vm1, %v5903_v36, 0.0  ;;  %v647_v23 = vadd.f32 %v646_v48, %v645_v59  ;;  %v708_v4 = vadd.f32 %v707_v41, %v706_v38  ;;  %v5945_v38 = vld [vmem:[%s5553_s14 + $0xf8] sm:$0xff] }
  0x50   : > { %8986 = vst [vmem:[#allocation52_spill] sm:$0xff] %v5945_v38 }
  0x51   : > { %v586_v16 = vadd.f32 %v585_v42, %v584_v22  ;;  %v649_v8 = vadd.f32 %v648_v14, %v647_v23  ;;  %v710_v10 = vadd.f32 %v709_v58, %v708_v4  ;;  %v713_v22 = vsel %vm523_vm1, %v5928_v17, 0.0  ;;  %v5948_v42 = vld [vmem:[%s5603_s18 + $0xd0] sm:$0xff]  ;;  %v5955_v14 = vld [vmem:[%s5603_s18 + $0xd8] sm:$0xff] }
  0x52   : > { %8987 = vst [vmem:[#allocation53_spill] sm:$0xff] %v5948_v42  ;;  %v715_v4 = vsel %vm523_vm1, %v5938_v33, 0.0  ;;  %8988 = vst [vmem:[#allocation54_spill] sm:$0xff] %v5955_v14  ;;  %v656_v17 = vsel %vm523_vm1, %v5945_v38, 0.0  ;;  %v717_v29 = vsel %vm523_vm1, %v5948_v42, 0.0  ;;  %v719_v54 = vsel %vm523_vm1, %v5955_v14, 0.0 }
  0x53   : > { %v587_v48 = vrot.slane %v586_v16, 4  ;;  %v651_v41 = vadd.f32 %v650_v21, %v649_v8  ;;  %v712_v59 = vadd.f32 %v711_v53, %v710_v10  ;;  %v5962_v8 = vld [vmem:[%s5603_s18 + $0xe0] sm:$0xff]  ;;  %v5967_v33 = vld [vmem:[%s5603_s18 + $0xe8] sm:$0xff] }
  0x54   : > { %8989 = vst [vmem:[#allocation55_spill] sm:$0xff] %v5962_v8  ;;  %8990 = vst [vmem:[#allocation56_spill] sm:$0xff] %v5967_v33 }
  0x55   : > { %v653_v58 = vadd.f32 %v652_v50, %v651_v41  ;;  %v714_v23 = vadd.f32 %v713_v22, %v712_v59  ;;  %v588_v10 = vadd.f32 %v587_v48, %v586_v16  ;;  %v721_v22 = vsel %vm523_vm1, %v5962_v8, 0.0  ;;  %v5972_v41 = vld [vmem:[%s5603_s18 + $0xf0] sm:$0xff] }
  0x56   : > { %8991 = vst [vmem:[#allocation57_spill] sm:$0xff] %v5972_v41  ;;  %v723_v16 = vsel %vm523_vm1, %v5967_v33, 0.0 }
  0x57   : > { %v655_v21 = vadd.f32 %v654_v3, %v653_v58  ;;  %v716_v53 = vadd.f32 %v715_v4, %v714_v23  ;;  %v589_v59 = vrot.slane %v588_v10, 2  ;;  %v5977_v3 = vld [vmem:[%s5603_s18 + $0xf8] sm:$0xff]  ;;  %v725_v58 = vsel %vm523_vm1, %v5972_v41, 0.0 }
  0x59   : > { %v657_v47 = vadd.f32 %v656_v17, %v655_v21  ;;  %v718_v50 = vadd.f32 %v717_v29, %v716_v53  ;;  %v590_v17 = vadd.f32 %v589_v59, %v588_v10  ;;  %v727_v21 = vsel %vm523_vm1, %v5977_v3, 0.0 }
  0x5b   : > { %v658_v62 = vrot.slane %v657_v47, 4  ;;  %v720_v42 = vadd.f32 %v719_v54, %v718_v50  ;;  %v591_v14 = vrot.slane %v590_v17, 1 }
  0x5d   : > { %v659_v48 = vadd.f32 %v658_v62, %v657_v47  ;;  %v722_v4 = vadd.f32 %v721_v22, %v720_v42  ;;  %v592_v33 = vadd.f32 %v591_v14, %v590_v17  ;;  %v816_v14 = vld [vmem:[%s8730_s5] sm:$0xff] }
  0x5f   : > { %v660_v29 = vrot.slane %v659_v48, 2  ;;  %v724_v23 = vadd.f32 %v723_v16, %v722_v4  ;;  %v594_v62 = vmul.f32 0.00390625, %v592_v33 }
  0x61   : > { %v661_v53 = vadd.f32 %v660_v29, %v659_v48  ;;  %v726_v8 = vadd.f32 %v725_v58, %v724_v23  ;;  %v8992_v48 = vmov 0.0  }
  0x63   : > { %v662_v54 = vrot.slane %v661_v53, 1  ;;  %v728_v50 = vadd.f32 %v727_v21, %v726_v8 }
  0x65   : > { %v729_v13 = vrot.slane %v728_v50, 4  ;;  %v663_v27 = vadd.f32 %v662_v54, %v661_v53 }
  0x67   : > { %v730_v46 = vadd.f32 %v729_v13, %v728_v50  ;;  %v664_v42 = vmul.f32 0.00390625, %v663_v27  ;;  %v741_v13 = vld [vmem:[%s8729_s4] sm:$0x1] }
  0x69   : > { %v731_v47 = vrot.slane %v730_v46, 2  ;;  %v665_v10 = vadd.f32 %v664_v42, %v594_v62 }
  0x6b   : > { %v732_v22 = vadd.f32 %v731_v47, %v730_v46 }
  0x6d   : > { %v733_v41 = vrot.slane %v732_v22, 1 }
  0x6f   : > { %v734_v59 = vadd.f32 %v733_v41, %v732_v22  ;;  %v817_v41 = vld [vmem:[%s8731_s6] sm:$0x1] }
  0x71   : > { %v735_v16 = vmul.f32 0.00390625, %v734_v59 }
  0x73   : > { %v736_v4 = vadd.f32 %v735_v16, %v665_v10 }
  0x75   : > { %4552 = vmatmul.mubr.msk.f32.vlgmr.msra.gmra.mrb[0].mxu1 %vm523_vm1, %v736_v4 }
  0x76   : > { %4556 = vmatprep.mubr.msk.f32.mxu1 %vm5419_vm0, %v8992_v48  ;;  %4555 = vmatpush3.msra.mxu1 %v816_v14 }
 0x148   : > { %v811_v46 = vpop.f32.mrb[0].mxu1 }
 0x149   : > { %v812_v27 = vadd.f32 %v811_v46, %v741_v13  ;;  %v4553_v33 = vpop.f32.mrb[1].mxu1 }
 0x14b   : > { %v815_v8 = vmax.f32 %v812_v27, 0.0 }
 0x14d   : > { %4557 = vmatmul.mubr.msk.f32.vlgmr.msra.gmra.mrb[2].mxu1 %vm818_vm2, %v815_v8  ;;  %v4268_v8 = vld [vmem:[%s8732_s7 + $0x20] sm:$0xff] }
 0x14e   : > { %4567 = vmatprep.mubr.msk.f32.mxu1 %vm523_vm1, %v5562_v28 }
 0x220   : > { %v888_v58 = vpop.f32.mrb[2].mxu1 }
 0x221   : > { %v889_v17 = vadd.f32 %v888_v58, %v817_v41  ;;  %v4558_v29 = vpop.f32.mrb[3].mxu1  ;;  %v4269_v41 = vld [vmem:[%s8732_s7 + $0x28] sm:$0xff]  ;;  %v4270_v58 = vld [vmem:[%s8732_s7 + $0x30] sm:$0xff] }
 0x222   : > { %v4271_v29 = vld [vmem:[%s8732_s7 + $0x38] sm:$0xff] }
 0x223   : > { %893 = vrot.lane.b32.xlu0 %v889_v17, %s5421_s25 }
 0x227   : > { %897 = vrot.lane.b32.xlu0 %v889_v17, %s5422_s26 }
 0x295   : > { %v894_v23 = vpop.permute.xlu0 %893 }
 0x296   : > { %v896_v21 = vmax.f32 %v889_v17, %v894_v23  ;;  %v4817_v23 = vpack.c.bf16 %v4271_v29, %v4270_v58  ;;  %v8996_v29 = vld [vmem:[#allocation13_spill] sm:$0xff] }
 0x299   : > { %v898_v53 = vpop.permute.xlu0 %897 }
 0x29a   : > { %v900_v54 = vmax.f32 %v896_v21, %v898_v53  ;;  %v1119_v21 = vld [vmem:[%s8732_s7] sm:$0xff]  ;;  %v1120_v53 = vld [vmem:[%s8732_s7 + $0x8] sm:$0xff] }
 0x29c   : > { %905 = vrot.lane.b32.xlu1 %v900_v54, %s5423_s28  ;;  %v901_v4 = vsub.f32 %v889_v17, %v900_v54 }
 0x29e   : > { %v902_v48 = vmul.f32 1.442695, %v901_v4 }
 0x2a0   : > { %911 = vrot.lane.b32.xlu1 %v900_v54, %s5422_s26  ;;  %v4821_v54 = vpack.c.bf16 %v1120_v53, %v1119_v21  ;;  %v8998_v21 = vld [vmem:[#allocation17_spill] sm:$0xff]  ;;  %v8999_v53 = vld [vmem:[#allocation23_spill] sm:$0xff] }
 0x30e   : > { %v906_v50 = vpop.permute.xlu1 %905 }
 0x30f   : > { %v908_v47 = vsub.f32 %v889_v17, %v906_v50  ;;  %v1121_v50 = vld [vmem:[%s8732_s7 + $0x10] sm:$0xff] }
 0x311   : > { %v909_v62 = vmul.f32 1.442695, %v908_v47  ;;  %v1122_v47 = vld [vmem:[%s8732_s7 + $0x18] sm:$0xff] }
 0x312   : > { %v912_v42 = vpop.permute.xlu1 %911 }
 0x313   : > { %5331 = vpow2.f32 %v909_v62  ;;  %v914_v22 = vsub.f32 %v889_v17, %v912_v42  ;;  %v4813_v17 = vpack.c.bf16 %v4269_v41, %v4268_v8 }
 0x315   : > { %v915_v10 = vmul.f32 1.442695, %v914_v22  ;;  %4814 = vmatprep.subr.bf16.mxu1 %v4813_v17  ;;  %v4825_v22 = vpack.c.bf16 %v1122_v47, %v1121_v50  ;;  %v9001_v50 = vld [vmem:[#allocation27_spill] sm:$0xff]  ;;  %v9002_v47 = vld [vmem:[#allocation25_spill] sm:$0xff] }
 0x316   : > { %4816 = vmatpush3.bf16.msra.mxu1 %v4813_v17 }
 0x317   : > { %5333 = vpow2.f32 %v915_v10  ;;  %4818 = vmatprep.subr.bf16.mxu1 %v4817_v23  ;;  %v939_v10 = vlaneseq }
 0x318   : > { %5335 = vpow2.f32 %v902_v48  ;;  %v4336_v48 = vld [vmem:[%s8732_s7 + $0x40] sm:$0xff] }
 0x319   : > { %v6099_v4 = vshrl.u32 %v939_v10, 7  ;;  %v9005_v10 = vld [vmem:[#allocation37_spill] sm:$0xff] }
 0x31a   : > { %4820 = vmatpush3.bf16.msra.mxu1 %v4817_v23  ;;  %v8997_v23 = vld [vmem:[#allocation19_spill] sm:$0xff] }
 0x31b   : > { %4822 = vmatprep.subr.bf16.mxu1 %v4821_v54  ;;  %8993 = vst [vmem:[#allocation58_spill] sm:$0xff] %v6099_v4 }
 0x31d   : > { %v6001_v59 = vpop.eup %5331  ;;  %4568 = vmatmul.mubr.msk.f32.vlgmr.msra.gmra.mrb[4].mxu1 %vm523_vm1, %v5565_v30 }
 0x31e   : > { %918 = vrot.lane.b32.xlu0 %v6001_v59, %s5421_s25  ;;  %4824 = vmatpush3.bf16.msra.mxu1 %v4821_v54  ;;  %v9000_v54 = vld [vmem:[#allocation21_spill] sm:$0xff] }
 0x31f   : > { %4570 = vmatprep.mubr.msk.f32.mxu1 %vm523_vm1, %v5568_v31  ;;  %4826 = vmatprep.subr.bf16.mxu1 %v4825_v22 }
 0x321   : > { %v6005_v16 = vpop.eup %5333  ;;  %4571 = vmatmul.mubr.msk.f32.gmra.mrb[6].mxu1 %vm523_vm1, %v5571_v32 }
 0x322   : > { %923 = vrot.lane.b32.xlu1 %v6005_v16, %s5422_s26  ;;  %v5336_v13 = vpop.eup %5335  ;;  %4573 = vmatprep.mubr.msk.f32.mxu1 %vm523_vm1, %v5582_v39 }
 0x323   : > { %4828 = vmatpush3.bf16.msra.mxu1 %v4825_v22  ;;  %v9004_v22 = vld [vmem:[#allocation29_spill] sm:$0xff] }
 0x325   : > { %4574 = vmatmul.mubr.msk.f32.gmra.mrb[8].mxu1 %vm523_vm1, %v5589_v45 }
 0x326   : > { %4576 = vmatprep.mubr.msk.f32.mxu1 %vm523_vm1, %v5596_v51 }
 0x329   : > { %4577 = vmatmul.mubr.msk.f32.gmra.mrb[10].mxu1 %vm523_vm1, %v5609_v57 }
 0x32a   : > { %4579 = vmatprep.mubr.msk.f32.mxu1 %vm523_vm1, %v5616_v63 }
 0x32d   : > { %4580 = vmatmul.mubr.msk.f32.gmra.mrb[12].mxu1 %vm523_vm1, %v5639_v19 }
 0x32e   : > { %4582 = vmatprep.mubr.msk.f32.mxu1 %vm523_vm1, %v5653_v34 }
 0x331   : > { %4583 = vmatmul.mubr.msk.f32.gmra.mrb[14].mxu1 %vm523_vm1, %v5667_v44 }
 0x332   : > { %4585 = vmatprep.mubr.msk.f32.mxu1 %vm523_vm1, %v5681_v55 }
 0x335   : > { %4586 = vmatmul.mubr.msk.f32.gmra.mrb[16].mxu1 %vm523_vm1, %v5696_v5 }
 0x336   : > { %4588 = vmatprep.mubr.msk.f32.mxu1 %vm523_vm1, %v5711_v26 }
 0x339   : > { %4589 = vmatmul.mubr.msk.f32.gmra.mrb[18].mxu1 %vm523_vm1, %v5726_v43 }
 0x33a   : > { %4591 = vmatprep.mubr.msk.f32.mxu1 %vm523_vm1, %v5741_v60 }
 0x33d   : > { %4592 = vmatmul.mubr.msk.f32.gmra.mrb[20].mxu1 %vm523_vm1, %v5756_v25 }
 0x33e   : > { %4594 = vmatprep.mubr.msk.f32.mxu1 %vm523_vm1, %v5771_v52 }
 0x341   : > { %4595 = vmatmul.mubr.msk.f32.gmra.mrb[22].mxu1 %vm523_vm1, %v5786_v6 }
 0x342   : > { %4597 = vmatprep.mubr.msk.f32.mxu1 %vm523_vm1, %v5801_v37 }
 0x345   : > { %4598 = vmatmul.mubr.msk.f32.gmra.mrb[24].mxu1 %vm523_vm1, %v5816_v61 }
 0x346   : > { %4600 = vmatprep.mubr.msk.f32.mxu1 %vm523_vm1, %v5831_v40 }
 0x349   : > { %4601 = vmatmul.mubr.msk.f32.gmra.mrb[26].mxu1 %vm523_vm1, %v5846_v18 }
 0x34a   : > { %4603 = vmatprep.mubr.msk.f32.mxu1 %vm523_vm1, %v5861_v11 }
 0x34d   : > { %4604 = vmatmul.mubr.msk.f32.gmra.mrb[28].mxu1 %vm523_vm1, %v5876_v9 }
 0x34e   : > { %4606 = vmatprep.mubr.msk.f32.mxu1 %vm523_vm1, %v5891_v15 }
 0x351   : > { %4607 = vmatmul.mubr.msk.f32.gmra.mrb[30].mxu1 %vm523_vm1, %v5903_v36 }
 0x352   : > { %4609 = vmatprep.mubr.msk.f32.mxu1 %vm523_vm1, %v5915_v49 }
 0x355   : > { %4610 = vmatmul.mubr.msk.f32.gmra.mrb[32].mxu1 %vm523_vm1, %v5925_v2 }
 0x356   : > { %4612 = vmatprep.mubr.msk.f32.mxu1 %vm523_vm1, %v5935_v24 }
 0x359   : > { %4613 = vmatmul.mubr.msk.f32.gmra.mrb[34].mxu1 %vm523_vm1, %v5945_v38 }
 0x390   : > { %v919_v14 = vpop.permute.xlu0 %918 }
 0x391   : > { %v921_v46 = vadd.f32 %v5336_v13, %v919_v14  ;;  %v4337_v14 = vld [vmem:[%s8732_s7 + $0x48] sm:$0xff] }
 0x394   : > { %v924_v27 = vpop.permute.xlu1 %923 }
 0x395   : > { %v926_v33 = vadd.f32 %v924_v27, %v921_v46 }
 0x397   : > { %5337 = vrcp.f32 %v926_v33  ;;  %v941_v33 = vsub.s32 0, %v6099_v4  ;;  %v9011_v4 = vld [vmem:[#allocation2_spill] sm:$0xff] }
 0x3a1   : > { %v5338_v62 = vpop.eup %5337 }
 0x3a2   : > { %v6033_v42 = vmul.f32 %v5338_v62, %v5336_v13  ;;  %935 = vrot.lane.b32.xlu1 %v5338_v62, %s5422_s26  ;;  %931 = vrot.lane.b32.xlu0 %v5338_v62, %s5423_s28  ;;  %v6107_v13 = vpack.c.bf16 %v4337_v14, %v4336_v48  ;;  %v9003_v62 = vld [vmem:[#allocation31_spill] sm:$0xff]  ;;  %v9006_v48 = vld [vmem:[#allocation34_spill] sm:$0xff] }
 0x3a3   : > { %v9007_v14 = vld [vmem:[#allocation43_spill] sm:$0xff] }
 0x3a4   : > { %4830 = vmatprep.subr.bf16.mxu1 %v6107_v13 }
 0x414   : > { %v936_v46 = vpop.permute.xlu1 %935  ;;  %v932_v27 = vpop.permute.xlu0 %931 }
 0x415   : > { %v938_v8 = vmul.f32 %v6005_v16, %v936_v46  ;;  %v934_v41 = vmul.f32 %v6001_v59, %v932_v27  ;;  %v8994_v59 = vld [vmem:[#allocation10_spill] sm:$0xff]  ;;  %v8995_v16 = vld [vmem:[#allocation15_spill] sm:$0xff]  ;;  %v9008_v46 = vld [vmem:[#allocation40_spill] sm:$0xff]  ;;  %v6224_v27 = vrot.slane %v6033_v42, %v941_v33 }
 0x417   : > { %v1050_v58 = vrot.slane %v938_v8, %v941_v33  ;;  %v978_v17 = vrot.slane %v934_v41, %v941_v33  ;;  %v9009_v8 = vld [vmem:[#allocation47_spill] sm:$0xff]  ;;  %v9010_v41 = vld [vmem:[#allocation45_spill] sm:$0xff] }
 0x419   : > { %1052 = vrot.lane.b32.xlu1 %v1050_v58, %s5422_s26  ;;  %980 = vrot.lane.b32.xlu0 %v978_v17, %s5421_s25 }
 0x41d   : > { %3820 = vrot.lane.b32.xlu0 %v5562_v28, %s5423_s28  ;;  %3822 = vrot.lane.b32.xlu1 %v5565_v30, %s5423_s28 }
 0x421   : > { %3824 = vrot.lane.b32.xlu0 %v5568_v31, %s5423_s28  ;;  %3826 = vrot.lane.b32.xlu1 %v5571_v32, %s5423_s28 }
 0x425   : > { %3828 = vrot.lane.b32.xlu0 %v5582_v39, %s5423_s28  ;;  %3830 = vrot.lane.b32.xlu1 %v5589_v45, %s5423_s28 }
 0x429   : > { %3832 = vrot.lane.b32.xlu0 %v5596_v51, %s5423_s28  ;;  %3834 = vrot.lane.b32.xlu1 %v5609_v57, %s5423_s28 }
 0x42d   : > { %3836 = vrot.lane.b32.xlu0 %v5616_v63, %s5423_s28  ;;  %3838 = vrot.lane.b32.xlu1 %v5639_v19, %s5423_s28 }
 0x431   : > { %3840 = vrot.lane.b32.xlu0 %v5653_v34, %s5423_s28  ;;  %3842 = vrot.lane.b32.xlu1 %v5667_v44, %s5423_s28 }
 0x435   : > { %3844 = vrot.lane.b32.xlu0 %v5681_v55, %s5423_s28  ;;  %3846 = vrot.lane.b32.xlu1 %v5696_v5, %s5423_s28 }
 0x439   : > { %3848 = vrot.lane.b32.xlu0 %v5711_v26, %s5423_s28  ;;  %3850 = vrot.lane.b32.xlu1 %v5726_v43, %s5423_s28 }
 0x43d   : > { %3852 = vrot.lane.b32.xlu0 %v5741_v60, %s5423_s28  ;;  %3854 = vrot.lane.b32.xlu1 %v5756_v25, %s5423_s28 }
 0x441   : > { %3856 = vrot.lane.b32.xlu0 %v5771_v52, %s5423_s28  ;;  %3858 = vrot.lane.b32.xlu1 %v5786_v6, %s5423_s28 }
 0x445   : > { %3860 = vrot.lane.b32.xlu0 %v5801_v37, %s5423_s28  ;;  %3862 = vrot.lane.b32.xlu1 %v5816_v61, %s5423_s28 }
 0x449   : > { %3864 = vrot.lane.b32.xlu0 %v5831_v40, %s5423_s28  ;;  %3866 = vrot.lane.b32.xlu1 %v5846_v18, %s5423_s28 }
 0x44d   : > { %3868 = vrot.lane.b32.xlu0 %v5861_v11, %s5423_s28  ;;  %3870 = vrot.lane.b32.xlu1 %v5876_v9, %s5423_s28 }
 0x451   : > { %3872 = vrot.lane.b32.xlu0 %v5891_v15, %s5423_s28  ;;  %3874 = vrot.lane.b32.xlu1 %v5903_v36, %s5423_s28  ;;  %v9013_v36 = vld [vmem:[#allocation4_spill] sm:$0xff] }
 0x455   : > { %3876 = vrot.lane.b32.xlu0 %v5915_v49, %s5423_s28  ;;  %3878 = vrot.lane.b32.xlu1 %v5925_v2, %s5423_s28  ;;  %v9012_v2 = vld [vmem:[#allocation3_spill] sm:$0xff] }
 0x456   : > { %v944_v42 = vmul.f32 %v6224_v27, %v9012_v2 }
 0x459   : > { %3880 = vrot.lane.b32.xlu0 %v5935_v24, %s5423_s28  ;;  %3882 = vrot.lane.b32.xlu1 %v5945_v38, %s5423_s28  ;;  %v943_v38 = vmul.f32 %v6224_v27, %v9011_v4 }
 0x45d   : > { %3916 = vrot.lane.b32.xlu0 %v5619_v0, %s5422_s26  ;;  %3918 = vrot.lane.b32.xlu1 %v5622_v1, %s5422_s26 }
 0x461   : > { %3922 = vrot.lane.b32.xlu1 %v5630_v12, %s5422_s26  ;;  %3920 = vrot.lane.b32.xlu0 %v5627_v7, %s5422_s26 }
 0x465   : > { %3926 = vrot.lane.b32.xlu1 %v5656_v35, %s5422_s26  ;;  %3924 = vrot.lane.b32.xlu0 %v5642_v20, %s5422_s26 }
 0x469   : > { %3930 = vrot.lane.b32.xlu1 %v5684_v56, %s5422_s26  ;;  %3928 = vrot.lane.b32.xlu0 %v8994_v59, %s5422_s26 }
 0x46d   : > { %3934 = vrot.lane.b32.xlu1 %v8995_v16, %s5422_s26  ;;  %3932 = vrot.lane.b32.xlu0 %v8996_v29, %s5422_s26 }
 0x471   : > { %3938 = vrot.lane.b32.xlu1 %v8997_v23, %s5422_s26  ;;  %3936 = vrot.lane.b32.xlu0 %v8998_v21, %s5422_s26 }
 0x475   : > { %3942 = vrot.lane.b32.xlu1 %v8999_v53, %s5422_s26  ;;  %3940 = vrot.lane.b32.xlu0 %v9000_v54, %s5422_s26 }
 0x479   : > { %3946 = vrot.lane.b32.xlu1 %v9001_v50, %s5422_s26  ;;  %3944 = vrot.lane.b32.xlu0 %v9002_v47, %s5422_s26 }
 0x47d   : > { %3950 = vrot.lane.b32.xlu1 %v9003_v62, %s5422_s26  ;;  %3948 = vrot.lane.b32.xlu0 %v9004_v22, %s5422_s26 }
 0x481   : > { %3954 = vrot.lane.b32.xlu1 %v9005_v10, %s5422_s26  ;;  %3952 = vrot.lane.b32.xlu0 %v9006_v48, %s5422_s26 }
 0x485   : > { %3958 = vrot.lane.b32.xlu1 %v9007_v14, %s5422_s26  ;;  %3956 = vrot.lane.b32.xlu0 %v9008_v46, %s5422_s26  ;;  %v9018_v46 = vld [vmem:[#allocation54_spill] sm:$0xff] }
 0x489   : > { %3962 = vrot.lane.b32.xlu1 %v9009_v8, %s5422_s26  ;;  %3960 = vrot.lane.b32.xlu0 %v9010_v41, %s5422_s26  ;;  %v945_v8 = vmul.f32 %v6224_v27, %v9013_v36  ;;  %v4338_v36 = vld [vmem:[%s8732_s7 + $0x50] sm:$0xff] }
 0x48b   : > { %v6230_v58 = vpop.permute.xlu1 %1052  ;;  %v6232_v17 = vpop.permute.xlu0 %980 }
 0x48c   : > { %v983_v24 = vmul.f32 %v6232_v17, %v5562_v28  ;;  %v984_v33 = vmul.f32 %v6232_v17, %v5565_v30  ;;  %v1055_v49 = vmul.f32 %v6230_v58, %v5619_v0  ;;  %v985_v15 = vmul.f32 %v6232_v17, %v5568_v31  ;;  %v9014_v28 = vld [vmem:[#allocation51_spill] sm:$0xff]  ;;  %v4339_v31 = vld [vmem:[%s8732_s7 + $0x58] sm:$0xff] }
 0x48d   : > { %v986_v4 = vmul.f32 %v6232_v17, %v5571_v32  ;;  %3966 = vrot.lane.b32.xlu1 %v9014_v28, %s5422_s26  ;;  %v1056_v30 = vmul.f32 %v6230_v58, %v5622_v1  ;;  %v987_v0 = vmul.f32 %v6232_v17, %v5582_v39  ;;  %v9015_v32 = vld [vmem:[#allocation49_spill] sm:$0xff]  ;;  %v1057_v39 = vmul.f32 %v6230_v58, %v5627_v7 }
 0x48e   : > { %v1015_v9 = vadd.f32 %v983_v24, %v943_v38  ;;  %v1016_v2 = vadd.f32 %v984_v33, %v944_v42  ;;  %3964 = vrot.lane.b32.xlu0 %v9015_v32, %s5422_s26  ;;  %v1017_v28 = vadd.f32 %v985_v15, %v945_v8  ;;  %v9016_v24 = vld [vmem:[#allocation5_spill] sm:$0xff]  ;;  %v9017_v33 = vld [vmem:[#allocation6_spill] sm:$0xff]  ;;  %v988_v11 = vmul.f32 %v6232_v17, %v5589_v45 }
 0x48f   : > { %v946_v38 = vmul.f32 %v6224_v27, %v9016_v24  ;;  %v947_v41 = vmul.f32 %v6224_v27, %v9017_v33  ;;  %v4833_v18 = vpack.c.bf16 %v4339_v31, %v4338_v36  ;;  %v1058_v7 = vmul.f32 %v6230_v58, %v5630_v12  ;;  %v9021_v36 = vld [vmem:[#allocation53_spill] sm:$0xff] }
 0x490   : > { %v1087_v42 = vadd.f32 %v1055_v49, %v1015_v9  ;;  %v1088_v1 = vadd.f32 %v1056_v30, %v1016_v2  ;;  %v1089_v15 = vadd.f32 %v1057_v39, %v1017_v28  ;;  %v989_v9 = vmul.f32 %v6232_v17, %v5596_v51  ;;  %v9019_v49 = vld [vmem:[#allocation7_spill] sm:$0xff]  ;;  %v5339_v31 = vld [vmem:[%s5515_s30 + $0x38] sm:$0xff] }
 0x491   : > { %v1018_v14 = vadd.f32 %v986_v4, %v946_v38  ;;  %3970 = vrot.lane.b32.xlu1 %v9018_v46, %s5422_s26  ;;  %v1019_v8 = vadd.f32 %v987_v0, %v947_v41  ;;  %v948_v45 = vmul.f32 %v6224_v27, %v9019_v49  ;;  %v1059_v4 = vmul.f32 %v6230_v58, %v5642_v20  ;;  %v9020_v41 = vld [vmem:[#allocation8_spill] sm:$0xff] }
 0x492   : > { %4623 = vmatprep.mubr.msk.f32.mxu1 %vm523_vm1, %v1087_v42  ;;  %v949_v51 = vmul.f32 %v6224_v27, %v9020_v41  ;;  %v990_v12 = vmul.f32 %v6232_v17, %v5609_v57  ;;  %3968 = vrot.lane.b32.xlu0 %v9021_v36, %s5422_s26  ;;  %v1060_v20 = vmul.f32 %v6230_v58, %v5656_v35  ;;  %v9022_v33 = vmov 0.0|0.0  }
 0x493   : > { %4624 = vmatmul.mubr.msk.f32.vlgmr.msra.gmra.mrb[4].mxu1 %vm523_vm1, %v1088_v1  ;;  %v1090_v28 = vadd.f32 %v1058_v7, %v1018_v14  ;;  %v1020_v2 = vadd.f32 %v988_v11, %v948_v45  ;;  %v1091_v30 = vadd.f32 %v1059_v4, %v1019_v8  ;;  %v950_v11 = vmul.f32 %v5339_v31, %v6224_v27  ;;  %v5340_v14 = vld [vmem:[%s5515_s30 + $0x40] sm:$0xff] }
 0x494   : > { %4832 = vmatpush3.bf16.msra.mxu1 %v6107_v13  ;;  %4626 = vmatprep.mubr.msk.f32.mxu1 %vm523_vm1, %v1089_v15  ;;  %v1021_v0 = vadd.f32 %v989_v9, %v949_v51  ;;  %v991_v13 = vmul.f32 %v6232_v17, %v5616_v63  ;;  %v1061_v57 = vmul.f32 %v6230_v58, %v8994_v59  ;;  %v5341_v15 = vld [vmem:[%s5515_s30 + $0x48] sm:$0xff] }
 0x495   : > { %4834 = vmatprep.subr.bf16.mxu1 %v4833_v18  ;;  %v951_v63 = vmul.f32 %v5340_v14, %v6224_v27  ;;  %v1092_v24 = vadd.f32 %v1060_v20, %v1020_v2  ;;  %v1022_v38 = vadd.f32 %v990_v12, %v950_v11  ;;  %v992_v42 = vmul.f32 %v6232_v17, %v5639_v19  ;;  %v5342_v19 = vld [vmem:[%s5515_s30 + $0x50] sm:$0xff]  ;;  %v9024_v51 = vld [vmem:[#allocation55_spill] sm:$0xff]  ;;  %v5344_v12 = vld [vmem:[%s5515_s30 + $0x60] sm:$0xff] }
 0x496   : > { %v1093_v35 = vadd.f32 %v1061_v57, %v1021_v0  ;;  %v993_v39 = vmul.f32 %v6232_v17, %v5653_v34  ;;  %v1062_v59 = vmul.f32 %v6230_v58, %v5684_v56  ;;  %v952_v8 = vmul.f32 %v5341_v15, %v6224_v27  ;;  %v9023_v56 = vld [vmem:[#allocation56_spill] sm:$0xff]  ;;  %3972 = vrot.lane.b32.xlu0 %v9024_v51, %s5422_s26  ;;  %v9025_v11 = vld [vmem:[#allocation57_spill] sm:$0xff]  ;;  %v5345_v57 = vld [vmem:[%s5515_s30 + $0x68] sm:$0xff] }
 0x497   : > { %4627 = vmatmul.mubr.msk.f32.gmra.mrb[6].mxu1 %vm523_vm1, %v1090_v28  ;;  %v1023_v1 = vadd.f32 %v991_v13, %v951_v63  ;;  %v953_v34 = vmul.f32 %v5342_v19, %v6224_v27  ;;  %v994_v49 = vmul.f32 %v6232_v17, %v5667_v44  ;;  %3974 = vrot.lane.b32.xlu1 %v9023_v56, %s5422_s26  ;;  %v5343_v28 = vld [vmem:[%s5515_s30 + $0x58] sm:$0xff]  ;;  %v5346_v63 = vld [vmem:[%s5515_s30 + $0x70] sm:$0xff] }
 0x498   : > { %4629 = vmatprep.mubr.msk.f32.mxu1 %vm523_vm1, %v1091_v30  ;;  %4836 = vmatpush3.bf16.msra.mxu1 %v4833_v18  ;;  %v1063_v18 = vmul.f32 %v6230_v58, %v8996_v29  ;;  %v1094_v9 = vadd.f32 %v1062_v59, %v1022_v38  ;;  %v1024_v7 = vadd.f32 %v992_v42, %v952_v8  ;;  %v5347_v59 = vld [vmem:[%s5515_s30 + $0x78] sm:$0xff] }
 0x499   : > { %4837 = vmatprep.subr.bf16.mxu1 %v9022_v33  ;;  %v1025_v4 = vadd.f32 %v993_v39, %v953_v34  ;;  %v995_v41 = vmul.f32 %v6232_v17, %v5681_v55  ;;  %v1064_v29 = vmul.f32 %v6230_v58, %v8995_v16  ;;  %v954_v44 = vmul.f32 %v5343_v28, %v6224_v27  ;;  %v9026_v8 = vld [vmem:[#allocation9_spill] sm:$0xff]  ;;  %v9028_v28 = vld [vmem:[#allocation12_spill] sm:$0xff] }
 0x49a   : > { %v1095_v45 = vadd.f32 %v1063_v18, %v1023_v1  ;;  %v1065_v2 = vmul.f32 %v6230_v58, %v8998_v21  ;;  %v955_v55 = vmul.f32 %v5344_v12, %v6224_v27  ;;  %v996_v13 = vmul.f32 %v6232_v17, %v5696_v5  ;;  %3976 = vrot.lane.b32.xlu0 %v9025_v11, %s5422_s26  ;;  %v2545_v18 = vld [vmem:[%s8734_s9 + $0x108] sm:$0xff] }
 0x49b   : > { %4630 = vmatmul.mubr.msk.f32.gmra.mrb[8].mxu1 %vm523_vm1, %v1092_v24  ;;  %v1096_v30 = vadd.f32 %v1064_v29, %v1024_v7  ;;  %v1026_v0 = vadd.f32 %v994_v49, %v954_v44  ;;  %3978 = vrot.lane.b32.xlu1 %v5977_v3, %s5422_s26  ;;  %v997_v31 = vmul.f32 %v6232_v17, %v5711_v26  ;;  %v2546_v49 = vld [vmem:[%s8734_s9 + $0x110] sm:$0xff] }
 0x49c   : > { %4632 = vmatprep.mubr.msk.f32.mxu1 %vm523_vm1, %v1093_v35  ;;  %v1097_v16 = vadd.f32 %v1065_v2, %v1025_v4  ;;  %v1027_v20 = vadd.f32 %v995_v41, %v955_v55  ;;  %v1066_v21 = vmul.f32 %v6230_v58, %v8997_v23  ;;  %v956_v5 = vmul.f32 %v5345_v57, %v6224_v27  ;;  %v9027_v41 = vld [vmem:[#allocation11_spill] sm:$0xff] }
 0x49d   : > { %v1067_v14 = vmul.f32 %v6230_v58, %v9000_v54  ;;  %v957_v26 = vmul.f32 %v5346_v63, %v6224_v27  ;;  %v998_v42 = vmul.f32 %v6232_v17, %v5726_v43  ;;  %v999_v23 = vmul.f32 %v6232_v17, %v5741_v60  ;;  %v2544_v60 = vld [vmem:[%s8734_s9 + $0x100] sm:$0xff] }
 0x49e   : > { %v1098_v24 = vadd.f32 %v1066_v21, %v1026_v0  ;;  %v1028_v38 = vadd.f32 %v996_v13, %v956_v5  ;;  %v1068_v39 = vmul.f32 %v6230_v58, %v8999_v53  ;;  %v958_v54 = vmul.f32 %v5347_v59, %v6224_v27  ;;  %v9030_v21 = vld [vmem:[#allocation16_spill] sm:$0xff] }
 0x49f   : > { %4633 = vmatmul.mubr.msk.f32.gmra.mrb[10].mxu1 %vm523_vm1, %v1094_v9  ;;  %v1099_v35 = vadd.f32 %v1067_v14, %v1027_v20  ;;  %v1029_v1 = vadd.f32 %v997_v31, %v957_v26  ;;  %v1069_v15 = vmul.f32 %v6230_v58, %v9002_v47  ;;  %v959_v43 = vmul.f32 %v6224_v27, %v9026_v8  ;;  %v9029_v20 = vld [vmem:[#allocation14_spill] sm:$0xff]  ;;  %v9034_v8 = vld [vmem:[#allocation33_spill] sm:$0xff] }
 0x4a0   : > { %4635 = vmatprep.mubr.msk.f32.mxu1 %vm523_vm1, %v1095_v45  ;;  %v1100_v53 = vadd.f32 %v1068_v39, %v1028_v38  ;;  %v1030_v19 = vadd.f32 %v998_v42, %v958_v54  ;;  %v1000_v34 = vmul.f32 %v6232_v17, %v5756_v25  ;;  %v1001_v47 = vmul.f32 %v6232_v17, %v5771_v52  ;;  %v2547_v45 = vld [vmem:[%s8734_s9 + $0x118] sm:$0xff]  ;;  %v9033_v39 = vld [vmem:[#allocation20_spill] sm:$0xff] }
 0x4a1   : > { %v1101_v9 = vadd.f32 %v1069_v15, %v1029_v1  ;;  %v1031_v7 = vadd.f32 %v999_v23, %v959_v43  ;;  %v1070_v4 = vmul.f32 %v6230_v58, %v9001_v50  ;;  %v960_v25 = vmul.f32 %v6224_v27, %v9027_v41  ;;  %v2551_v42 = vld [vmem:[%s8734_s9 + $0x138] sm:$0xff] }
 0x4a2   : > { %v4886_v29 = vpack.c.bf16 %v2545_v18, %v2544_v60  ;;  %v1071_v52 = vmul.f32 %v6230_v58, %v9004_v22  ;;  %v961_v44 = vmul.f32 %v6224_v27, %v9028_v28  ;;  %v1002_v55 = vmul.f32 %v6232_v17, %v5786_v6  ;;  %v2548_v22 = vld [vmem:[%s8734_s9 + $0x120] sm:$0xff] }
 0x4a3   : > { %4636 = vmatmul.mubr.msk.f32.gmra.mrb[12].mxu1 %vm523_vm1, %v1096_v30  ;;  %v1102_v2 = vadd.f32 %v1070_v4, %v1030_v19  ;;  %v1032_v12 = vadd.f32 %v1000_v34, %v960_v25  ;;  %v4889_v30 = vpack.c.bf16 %v2547_v45, %v2546_v49  ;;  %v1003_v13 = vmul.f32 %v6232_v17, %v5801_v37  ;;  %v2552_v34 = vld [vmem:[%s8734_s9 + $0x140] sm:$0xff]  ;;  %v9038_v4 = vld [vmem:[#allocation45_spill] sm:$0xff]  ;;  %v9039_v25 = vld [vmem:[#allocation24_spill] sm:$0xff] }
 0x4a4   : > { %4638 = vmatprep.mubr.msk.f32.mxu1 %vm523_vm1, %v1097_v16  ;;  %4887 = vmatpush1.bf16.msra.mxu0 %v4886_v29  ;;  %v1103_v50 = vadd.f32 %v1071_v52, %v1031_v7  ;;  %v1033_v0 = vadd.f32 %v1001_v47, %v961_v44  ;;  %v2549_v16 = vld [vmem:[%s8734_s9 + $0x128] sm:$0xff]  ;;  %v1072_v6 = vmul.f32 %v6230_v58, %v9003_v62  ;;  %v9037_v49 = vld [vmem:[#allocation22_spill] sm:$0xff] }
 0x4a5   : > { %4888 = vmatprep.subr.bf16.mxu0 %v9022_v33  ;;  %v962_v31 = vmul.f32 %v6224_v27, %v9029_v20  ;;  %v1073_v37 = vmul.f32 %v6230_v58, %v9006_v48  ;;  %v963_v57 = vmul.f32 %v6224_v27, %v9030_v21  ;;  %v1004_v63 = vmul.f32 %v6232_v17, %v5816_v61  ;;  %v2550_v48 = vld [vmem:[%s8734_s9 + $0x130] sm:$0xff]  ;;  %v9036_v7 = vld [vmem:[#allocation43_spill] sm:$0xff]  ;;  %v9043_v20 = vld [vmem:[#allocation26_spill] sm:$0xff] }
 0x4a6   : > { %v1104_v5 = vadd.f32 %v1072_v6, %v1032_v12  ;;  %v4892_v26 = vpack.c.bf16 %v2549_v16, %v2548_v22  ;;  %v1005_v38 = vmul.f32 %v6232_v17, %v5831_v40  ;;  %v1074_v61 = vmul.f32 %v6230_v58, %v9005_v10  ;;  %v9032_v40 = vld [vmem:[#allocation40_spill] sm:$0xff]  ;;  %v9040_v44 = vld [vmem:[#allocation39_spill] sm:$0xff]  ;;  %v2555_v22 = vld [vmem:[%s8734_s9 + $0x158] sm:$0xff] }
 0x4a7   : > { %4639 = vmatmul.mubr.msk.f32.gmra.mrb[14].mxu1 %vm523_vm1, %v1098_v24  ;;  %v1034_v14 = vadd.f32 %v1002_v55, %v962_v31  ;;  %v1105_v24 = vadd.f32 %v1073_v37, %v1033_v0  ;;  %v1035_v62 = vadd.f32 %v1003_v13, %v963_v57  ;;  %v1075_v23 = vmul.f32 %v6230_v58, %v9032_v40  ;;  %v2554_v13 = vld [vmem:[%s8734_s9 + $0x150] sm:$0xff]  ;;  %v9042_v16 = vld [vmem:[#allocation47_spill] sm:$0xff]  ;;  %v9048_v40 = vld [vmem:[#allocation30_spill] sm:$0xff] }
 0x4a8   : > { %4641 = vmatprep.mubr.msk.f32.mxu1 %vm523_vm1, %v1099_v35  ;;  %4890 = vmatpush1.bf16.msra.mxu0 %v4889_v30  ;;  %v9031_v35 = vld [vmem:[#allocation18_spill] sm:$0xff]  ;;  %v965_v59 = vmul.f32 %v6224_v27, %v9033_v39  ;;  %v1006_v43 = vmul.f32 %v6232_v17, %v9034_v8  ;;  %v4895_v60 = vpack.c.bf16 %v2551_v42, %v2550_v48  ;;  %v9044_v21 = vld [vmem:[#allocation28_spill] sm:$0xff] }
 0x4a9   : > { %4891 = vmatprep.subr.bf16.mxu0 %v9022_v33  ;;  %v964_v1 = vmul.f32 %v6224_v27, %v9031_v35  ;;  %v1106_v54 = vadd.f32 %v1074_v61, %v1034_v14  ;;  %v1107_v18 = vadd.f32 %v1075_v23, %v1035_v62  ;;  %v1076_v47 = vmul.f32 %v6230_v58, %v9036_v7  ;;  %v9046_v48 = vld [vmem:[#allocation46_spill] sm:$0xff]  ;;  %v2557_v61 = vld [vmem:[%s8734_s9 + $0x168] sm:$0xff] }
 0x4aa   : > { %v1037_v10 = vadd.f32 %v1005_v38, %v965_v59  ;;  %v966_v45 = vmul.f32 %v6224_v27, %v9037_v49  ;;  %v1077_v41 = vmul.f32 %v6230_v58, %v9038_v4  ;;  %v967_v29 = vmul.f32 %v6224_v27, %v9039_v25  ;;  %v9047_v35 = vld [vmem:[#allocation51_spill] sm:$0xff]  ;;  %v9049_v59 = vld [vmem:[#allocation32_spill] sm:$0xff]  ;;  %v9053_v4 = vld [vmem:[#allocation38_spill] sm:$0xff] }
 0x4ab   : > { %4642 = vmatmul.mubr.msk.f32.gmra.mrb[16].mxu1 %vm523_vm1, %v1100_v53  ;;  %v1036_v15 = vadd.f32 %v1004_v63, %v964_v1  ;;  %v9035_v53 = vld [vmem:[#allocation36_spill] sm:$0xff]  ;;  %v1078_v6 = vmul.f32 %v6230_v58, %v9042_v16  ;;  %v968_v31 = vmul.f32 %v6224_v27, %v9043_v20  ;;  %v1079_v37 = vmul.f32 %v6230_v58, %v9015_v32  ;;  %v2556_v32 = vld [vmem:[%s8734_s9 + $0x160] sm:$0xff] }
 0x4ac   : > { %4644 = vmatprep.mubr.msk.f32.mxu1 %vm523_vm1, %v1101_v9  ;;  %4893 = vmatpush1.bf16.msra.mxu0 %v4892_v26  ;;  %v1007_v19 = vmul.f32 %v6232_v17, %v9035_v53  ;;  %v2553_v9 = vld [vmem:[%s8734_s9 + $0x148] sm:$0xff]  ;;  %v1038_v28 = vadd.f32 %v1006_v43, %v966_v45  ;;  %v1109_v55 = vadd.f32 %v1077_v41, %v1037_v10  ;;  %v9045_v63 = vld [vmem:[#allocation44_spill] sm:$0xff] }
 0x4ad   : > { %4894 = vmatprep.subr.bf16.mxu0 %v9022_v33  ;;  %v1108_v52 = vadd.f32 %v1076_v47, %v1036_v15  ;;  %v4898_v12 = vpack.c.bf16 %v2553_v9, %v2552_v34  ;;  %v969_v57 = vmul.f32 %v6224_v27, %v9044_v21  ;;  %v1010_v26 = vmul.f32 %v6232_v17, %v9045_v63  ;;  %v9050_v43 = vld [vmem:[#allocation48_spill] sm:$0xff]  ;;  %v2559_v9 = vld [vmem:[%s8734_s9 + $0x178] sm:$0xff]  ;;  %v9052_v47 = vld [vmem:[#allocation35_spill] sm:$0xff] }
 0x4ae   : > { %v1039_v30 = vadd.f32 %v1007_v19, %v967_v29  ;;  %v1011_v42 = vmul.f32 %v6232_v17, %v9046_v48  ;;  %v1080_v1 = vmul.f32 %v6230_v58, %v9047_v35  ;;  %v970_v23 = vmul.f32 %v6224_v27, %v9048_v40  ;;  %v9051_v19 = vld [vmem:[#allocation50_spill] sm:$0xff]  ;;  %v2565_v21 = vld [vmem:[%s8734_s9 + $0x1a8] sm:$0xff]  ;;  %v5351_v48 = vld [vmem:[%s5603_s18 + $0x18] sm:$0xff] }
 0x4af   : > { %4645 = vmatmul.mubr.msk.f32.gmra.mrb[18].mxu1 %vm523_vm1, %v1102_v2  ;;  %v1008_v2 = vmul.f32 %v6232_v17, %v9040_v44  ;;  %v1081_v39 = vmul.f32 %v6230_v58, %v9021_v36  ;;  %v1013_v34 = vmul.f32 %v6232_v17, %v9051_v19  ;;  %v2558_v36 = vld [vmem:[%s8734_s9 + $0x170] sm:$0xff]  ;;  %v1082_v7 = vmul.f32 %v6230_v58, %v9018_v46  ;;  %v5349_v63 = vld [vmem:[%s5603_s18 + $0x8] sm:$0xff]  ;;  %v5356_v40 = vld [vmem:[%s5603_s18 + $0x40] sm:$0xff] }
 0x4b0   : > { %4647 = vmatprep.mubr.msk.f32.mxu1 %vm523_vm1, %v1103_v50  ;;  %4896 = vmatpush1.bf16.msra.mxu0 %v4895_v60  ;;  %v9041_v50 = vld [vmem:[#allocation42_spill] sm:$0xff]  ;;  %v1111_v62 = vadd.f32 %v1079_v37, %v1039_v30  ;;  %v1042_v8 = vadd.f32 %v1010_v26, %v970_v23  ;;  %v1012_v60 = vmul.f32 %v6232_v17, %v9050_v43  ;;  %v5350_v26 = vld [vmem:[%s5603_s18 + $0x10] sm:$0xff]  ;;  %v5357_v23 = vld [vmem:[%s5603_s18 + $0x48] sm:$0xff] }
 0x4b1   : > { %v1009_v0 = vmul.f32 %v6232_v17, %v9041_v50  ;;  %4897 = vmatprep.subr.bf16.mxu0 %v9022_v33  ;;  %v1040_v14 = vadd.f32 %v1008_v2, %v968_v31  ;;  %v972_v49 = vmul.f32 %v6224_v27, %v9052_v47  ;;  %v1083_v45 = vmul.f32 %v6230_v58, %v9024_v51  ;;  %v2561_v51 = vld [vmem:[%s8734_s9 + $0x188] sm:$0xff]  ;;  %v2564_v37 = vld [vmem:[%s8734_s9 + $0x1a0] sm:$0xff]  ;;  %v5354_v35 = vld [vmem:[%s5603_s18 + $0x30] sm:$0xff] }
 0x4b2   : > { %v973_v41 = vmul.f32 %v6224_v27, %v9053_v4  ;;  %v1114_v25 = vadd.f32 %v1082_v7, %v1042_v8  ;;  %v4907_v44 = vpack.c.bf16 %v2559_v9, %v2558_v36  ;;  %v1085_v50 = vmul.f32 %v6230_v58, %v9025_v11  ;;  %v5362_v8 = vld [vmem:[%s5603_s18 + $0x70] sm:$0xff]  ;;  %v5363_v43 = vld [vmem:[%s5603_s18 + $0x78] sm:$0xff]  ;;  %v5368_v19 = vld [vmem:[%s5603_s18 + $0xa0] sm:$0xff] }
 0x4b3   : > { %4648 = vmatmul.mubr.msk.f32.gmra.mrb[20].mxu1 %vm523_vm1, %v1104_v5  ;;  %v1110_v5 = vadd.f32 %v1078_v6, %v1038_v28  ;;  %v1041_v38 = vadd.f32 %v1009_v0, %v969_v57  ;;  %v1112_v15 = vadd.f32 %v1080_v1, %v1040_v14  ;;  %v1044_v29 = vadd.f32 %v1012_v60, %v972_v49  ;;  %v2567_v14 = vld [vmem:[%s8734_s9 + $0x1b8] sm:$0xff]  ;;  %v5364_v60 = vld [vmem:[%s5603_s18 + $0x80] sm:$0xff]  ;;  %v5370_v36 = vld [vmem:[%s5603_s18 + $0xb0] sm:$0xff] }
 0x4b4   : > { %4650 = vmatprep.mubr.msk.f32.mxu1 %vm523_vm1, %v1105_v24  ;;  %4899 = vmatpush1.bf16.msra.mxu0 %v4898_v12  ;;  %v4901_v24 = vpack.c.bf16 %v2555_v22, %v2554_v13  ;;  %v1045_v46 = vadd.f32 %v1013_v34, %v973_v41  ;;  %v2560_v12 = vld [vmem:[%s8734_s9 + $0x180] sm:$0xff]  ;;  %v1086_v6 = vmul.f32 %v6230_v58, %v5977_v3  ;;  %v5355_v1 = vld [vmem:[%s5603_s18 + $0x38] sm:$0xff]  ;;  %v5369_v34 = vld [vmem:[%s5603_s18 + $0xa8] sm:$0xff] }
 0x4b5   : > { %4900 = vmatprep.subr.bf16.mxu0 %v9022_v33  ;;  %v1113_v10 = vadd.f32 %v1081_v39, %v1041_v38  ;;  %v4910_v22 = vpack.c.bf16 %v2561_v51, %v2560_v12  ;;  %v4916_v57 = vpack.c.bf16 %v2565_v21, %v2564_v37  ;;  %v2569_v38 = vld [vmem:[%s8734_s9 + $0x1c8] sm:$0xff]  ;;  %v5358_v39 = vld [vmem:[%s5603_s18 + $0x50] sm:$0xff]  ;;  %v5371_v9 = vld [vmem:[%s5603_s18 + $0xb8] sm:$0xff] }
 0x4b6   : > { %v1117_v16 = vadd.f32 %v1085_v50, %v1045_v46  ;;  %v5372_v7 = vld [vmem:[%s5603_s18 + $0xc0] sm:$0xff]  ;;  %v5373_v47 = vld [vmem:[%s5603_s18 + $0xc8] sm:$0xff]  ;;  %v5374_v49 = vld [vmem:[%s5603_s18 + $0xd0] sm:$0xff] }
 0x4b7   : > { %4651 = vmatmul.mubr.msk.f32.gmra.mrb[22].mxu1 %vm523_vm1, %v1106_v54  ;;  %v971_v54 = vmul.f32 %v6224_v27, %v9049_v59  ;;  %v5359_v59 = vld [vmem:[%s5603_s18 + $0x58] sm:$0xff]  ;;  %v5376_v4 = vld [vmem:[%s5603_s18 + $0xe0] sm:$0xff]  ;;  %v5377_v41 = vld [vmem:[%s5603_s18 + $0xe8] sm:$0xff] }
 0x4b8   : > { %4653 = vmatprep.mubr.msk.f32.mxu1 %vm523_vm1, %v1107_v18  ;;  %4902 = vmatpush1.bf16.msra.mxu0 %v4901_v24  ;;  %v4904_v18 = vpack.c.bf16 %v2557_v61, %v2556_v32  ;;  %v5353_v61 = vld [vmem:[%s5603_s18 + $0x28] sm:$0xff]  ;;  %v2572_v46 = vld [vmem:[%s8734_s9 + $0x1e0] sm:$0xff]  ;;  %v2574_v50 = vld [vmem:[%s8734_s9 + $0x1f0] sm:$0xff] }
 0x4b9   : > { %v1043_v53 = vadd.f32 %v1011_v42, %v971_v54  ;;  %4903 = vmatprep.subr.bf16.mxu0 %v9022_v33  ;;  %v5352_v42 = vld [vmem:[%s5603_s18 + $0x20] sm:$0xff]  ;;  %v2573_v51 = vld [vmem:[%s8734_s9 + $0x1e8] sm:$0xff]  ;;  %v2522_v37 = vld [vmem:[%s8734_s9 + $0x50] sm:$0xff] }
 0x4ba   : > { %v5360_v54 = vld [vmem:[%s5603_s18 + $0x60] sm:$0xff]  ;;  %v2523_v21 = vld [vmem:[%s8734_s9 + $0x58] sm:$0xff] }
 0x4bb   : > { %4654 = vmatmul.mubr.msk.f32.gmra.mrb[24].mxu1 %vm523_vm1, %v1108_v52  ;;  %v9054_v52 = vld [vmem:[#allocation52_spill] sm:$0xff]  ;;  %v1115_v2 = vadd.f32 %v1083_v45, %v1043_v53  ;;  %v5367_v53 = vld [vmem:[%s5603_s18 + $0x98] sm:$0xff] }
 0x4bc   : > { %4656 = vmatprep.mubr.msk.f32.mxu1 %vm523_vm1, %v1109_v55  ;;  %v1014_v28 = vmul.f32 %v6232_v17, %v9054_v52  ;;  %4905 = vmatpush1.bf16.msra.mxu0 %v4904_v18  ;;  %v1084_v55 = vmul.f32 %v6230_v58, %v9023_v56  ;;  %v9055_v17 = vld [vmem:[#allocation41_spill] sm:$0xff]  ;;  %v2562_v56 = vld [vmem:[%s8734_s9 + $0x190] sm:$0xff]  ;;  %v5348_v58 = vld [vmem:[%s5603_s18] sm:$0xff] }
 0x4bd   : > { %4906 = vmatprep.subr.bf16.mxu0 %v9022_v33  ;;  %v974_v30 = vmul.f32 %v6224_v27, %v9055_v17  ;;  %v2563_v27 = vld [vmem:[%s8734_s9 + $0x198] sm:$0xff]  ;;  %v5365_v18 = vld [vmem:[%s5603_s18 + $0x88] sm:$0xff]  ;;  %v2570_v52 = vld [vmem:[%s8734_s9 + $0x1d0] sm:$0xff] }
 0x4be   : > { %v1116_v0 = vadd.f32 %v1084_v55, %v1044_v29  ;;  %v4913_v31 = vpack.c.bf16 %v2563_v27, %v2562_v56  ;;  %v5375_v45 = vld [vmem:[%s5603_s18 + $0xd8] sm:$0xff]  ;;  %v2513_v29 = vld [vmem:[%s8734_s9 + $0x8] sm:$0xff]  ;;  %v4928_v55 = vpack.c.bf16 %v2573_v51, %v2572_v46  ;;  %v2516_v17 = vld [vmem:[%s8734_s9 + $0x20] sm:$0xff] }
 0x4bf   : > { %4657 = vmatmul.mubr.msk.f32.gmra.mrb[26].mxu1 %vm523_vm1, %v1110_v5  ;;  %v1046_v13 = vadd.f32 %v1014_v28, %v974_v30  ;;  %v2566_v5 = vld [vmem:[%s8734_s9 + $0x1b0] sm:$0xff]  ;;  %v2517_v30 = vld [vmem:[%s8734_s9 + $0x28] sm:$0xff]  ;;  %v2519_v56 = vld [vmem:[%s8734_s9 + $0x38] sm:$0xff] }
 0x4c0   : > { %4659 = vmatprep.mubr.msk.f32.mxu1 %vm523_vm1, %v1111_v62  ;;  %4908 = vmatpush1.bf16.msra.mxu0 %v4907_v44  ;;  %v4919_v24 = vpack.c.bf16 %v2567_v14, %v2566_v5  ;;  %v2568_v62 = vld [vmem:[%s8734_s9 + $0x1c0] sm:$0xff]  ;;  %v2525_v5 = vld [vmem:[%s8734_s9 + $0x68] sm:$0xff] }
 0x4c1   : > { %4909 = vmatprep.subr.bf16.mxu0 %v9022_v33  ;;  %v1118_v20 = vadd.f32 %v1086_v6, %v1046_v13  ;;  %v4922_v32 = vpack.c.bf16 %v2569_v38, %v2568_v62  ;;  %v2575_v13 = vld [vmem:[%s8734_s9 + $0x1f8] sm:$0xff]  ;;  %v2520_v6 = vld [vmem:[%s8734_s9 + $0x40] sm:$0xff]  ;;  %v2529_v38 = vld [vmem:[%s8734_s9 + $0x88] sm:$0xff] }
 0x4c2   : > { %v2528_v62 = vld [vmem:[%s8734_s9 + $0x80] sm:$0xff] }
 0x4c3   : > { %4660 = vmatmul.mubr.msk.f32.gmra.mrb[28].mxu1 %vm523_vm1, %v1112_v15  ;;  %v5361_v15 = vld [vmem:[%s5603_s18 + $0x68] sm:$0xff] }
 0x4c4   : > { %4662 = vmatprep.mubr.msk.f32.mxu1 %vm523_vm1, %v1113_v10  ;;  %4911 = vmatpush1.bf16.msra.mxu0 %v4910_v22  ;;  %v5366_v10 = vld [vmem:[%s5603_s18 + $0x90] sm:$0xff]  ;;  %v4931_v22 = vpack.c.bf16 %v2575_v13, %v2574_v50 }
 0x4c5   : > { %4912 = vmatprep.subr.bf16.mxu0 %v9022_v33 }
 0x4c7   : > { %4663 = vmatmul.mubr.msk.f32.gmra.mrb[30].mxu1 %vm523_vm1, %v1114_v25  ;;  %v2512_v25 = vld [vmem:[%s8734_s9] sm:$0xff] }
 0x4c8   : > { %4665 = vmatprep.mubr.msk.f32.mxu1 %vm523_vm1, %v1115_v2  ;;  %4914 = vmatpush1.bf16.msra.mxu0 %v4913_v31  ;;  %v4838_v28 = vpack.c.bf16 %v2513_v29, %v2512_v25  ;;  %v2515_v2 = vld [vmem:[%s8734_s9 + $0x18] sm:$0xff] }
 0x4c9   : > { %4915 = vmatprep.subr.bf16.mxu0 %v9022_v33 }
 0x4cb   : > { %4666 = vmatmul.mubr.msk.f32.gmra.mrb[32].mxu1 %vm523_vm1, %v1116_v0  ;;  %v4844_v0 = vpack.c.bf16 %v2517_v30, %v2516_v17 }
 0x4cc   : > { %4668 = vmatprep.mubr.msk.f32.mxu1 %vm523_vm1, %v1117_v16  ;;  %4917 = vmatpush1.bf16.msra.mxu0 %v4916_v57  ;;  %v2518_v16 = vld [vmem:[%s8734_s9 + $0x30] sm:$0xff]  ;;  %v2524_v57 = vld [vmem:[%s8734_s9 + $0x60] sm:$0xff] }
 0x4cd   : > { %4918 = vmatprep.subr.bf16.mxu0 %v9022_v33  ;;  %v4847_v27 = vpack.c.bf16 %v2519_v56, %v2518_v16  ;;  %v4856_v14 = vpack.c.bf16 %v2525_v5, %v2524_v57 }
 0x4cf   : > { %4669 = vmatmul.mubr.msk.f32.gmra.mrb[34].mxu1 %vm523_vm1, %v1118_v20  ;;  %v2521_v20 = vld [vmem:[%s8734_s9 + $0x48] sm:$0xff] }
 0x4d0   : > { %4679 = vmatprep.mubr.msk.f32.mxu1 %vm523_vm1, %v5348_v58  ;;  %4920 = vmatpush1.bf16.msra.mxu0 %v4919_v24  ;;  %v4850_v31 = vpack.c.bf16 %v2521_v20, %v2520_v6  ;;  %v4853_v58 = vpack.c.bf16 %v2523_v21, %v2522_v37  ;;  %v2579_v37 = vld [vmem:[%s8734_s9 + $0x218] sm:$0xff] }
 0x4d1   : > { %4921 = vmatprep.subr.bf16.mxu0 %v9022_v33 }
 0x4d3   : > { %4680 = vmatmul.mubr.msk.f32.vlgmr.msra.gmra.mrb[4].mxu1 %vm523_vm1, %v5349_v63  ;;  %v2526_v63 = vld [vmem:[%s8734_s9 + $0x70] sm:$0xff] }
 0x4d4   : > { %4682 = vmatprep.mubr.msk.f32.mxu1 %vm523_vm1, %v5350_v26  ;;  %4923 = vmatpush1.bf16.msra.mxu0 %v4922_v32  ;;  %v2527_v26 = vld [vmem:[%s8734_s9 + $0x78] sm:$0xff] }
 0x4d5   : > { %4924 = vmatprep.subr.bf16.mxu0 %v9022_v33  ;;  %4839 = vmatpush1.bf16.msra.mxu1 %v4838_v28  ;;  %v4859_v24 = vpack.c.bf16 %v2527_v26, %v2526_v63  ;;  %v2531_v32 = vld [vmem:[%s8734_s9 + $0x98] sm:$0xff]  ;;  %v6864_v63 = vld [vmem:[%s8734_s9 + $0x220] sm:$0xff]  ;;  %v2581_v26 = vld [vmem:[%s8734_s9 + $0x228] sm:$0xff] }
 0x4d6   : > { %4840 = vmatprep.subr.bf16.mxu1 %v9022_v33 }
 0x4d7   : > { %4683 = vmatmul.mubr.msk.f32.gmra.mrb[6].mxu1 %vm523_vm1, %v5351_v48  ;;  %v4862_v48 = vpack.c.bf16 %v2529_v38, %v2528_v62  ;;  %v6877_v62 = vld [vmem:[%s8734_s9 + $0x238] sm:$0xff] }
 0x4d8   : > { %4685 = vmatprep.mubr.msk.f32.mxu1 %vm523_vm1, %v5352_v42  ;;  %v2530_v42 = vld [vmem:[%s8734_s9 + $0x90] sm:$0xff] }
 0x4db   : > { %4686 = vmatmul.mubr.msk.f32.gmra.mrb[8].mxu1 %vm523_vm1, %v5353_v61  ;;  %v4865_v61 = vpack.c.bf16 %v2531_v32, %v2530_v42 }
 0x4dc   : > { %4688 = vmatprep.mubr.msk.f32.mxu1 %vm523_vm1, %v5354_v35  ;;  %v2532_v35 = vld [vmem:[%s8734_s9 + $0xa0] sm:$0xff] }
 0x4df   : > { %4689 = vmatmul.mubr.msk.f32.gmra.mrb[10].mxu1 %vm523_vm1, %v5355_v1  ;;  %v2533_v1 = vld [vmem:[%s8734_s9 + $0xa8] sm:$0xff] }
 0x4e0   : > { %4691 = vmatprep.mubr.msk.f32.mxu1 %vm523_vm1, %v5356_v40  ;;  %v4868_v40 = vpack.c.bf16 %v2533_v1, %v2532_v35  ;;  %v6894_v35 = vld [vmem:[%s8734_s9 + $0x248] sm:$0xff]  ;;  %v6899_v1 = vld [vmem:[%s8734_s9 + $0x250] sm:$0xff] }
 0x4e3   : > { %4692 = vmatmul.mubr.msk.f32.gmra.mrb[12].mxu1 %vm523_vm1, %v5357_v23  ;;  %v2534_v23 = vld [vmem:[%s8734_s9 + $0xb0] sm:$0xff] }
 0x4e4   : > { %4694 = vmatprep.mubr.msk.f32.mxu1 %vm523_vm1, %v5358_v39  ;;  %v2535_v39 = vld [vmem:[%s8734_s9 + $0xb8] sm:$0xff] }
 0x4e7   : > { %4695 = vmatmul.mubr.msk.f32.gmra.mrb[14].mxu1 %vm523_vm1, %v5359_v59  ;;  %v4871_v59 = vpack.c.bf16 %v2535_v39, %v2534_v23  ;;  %v6910_v23 = vld [vmem:[%s8734_s9 + $0x260] sm:$0xff]  ;;  %v6915_v39 = vld [vmem:[%s8734_s9 + $0x268] sm:$0xff] }
 0x4e8   : > { %4697 = vmatprep.mubr.msk.f32.mxu1 %vm523_vm1, %v5360_v54  ;;  %v2536_v54 = vld [vmem:[%s8734_s9 + $0xc0] sm:$0xff] }
 0x4eb   : > { %4698 = vmatmul.mubr.msk.f32.gmra.mrb[16].mxu1 %vm523_vm1, %v5361_v15  ;;  %v2537_v15 = vld [vmem:[%s8734_s9 + $0xc8] sm:$0xff] }
 0x4ec   : > { %4700 = vmatprep.mubr.msk.f32.mxu1 %vm523_vm1, %v5362_v8  ;;  %v4874_v8 = vpack.c.bf16 %v2537_v15, %v2536_v54  ;;  %v6924_v15 = vld [vmem:[%s8734_s9 + $0x270] sm:$0xff] }
 0x4ef   : > { %4701 = vmatmul.mubr.msk.f32.gmra.mrb[18].mxu1 %vm523_vm1, %v5363_v43  ;;  %v2538_v43 = vld [vmem:[%s8734_s9 + $0xd0] sm:$0xff] }
 0x4f0   : > { %4703 = vmatprep.mubr.msk.f32.mxu1 %vm523_vm1, %v5364_v60  ;;  %v2539_v60 = vld [vmem:[%s8734_s9 + $0xd8] sm:$0xff] }
 0x4f3   : > { %4704 = vmatmul.mubr.msk.f32.gmra.mrb[20].mxu1 %vm523_vm1, %v5365_v18  ;;  %v4877_v18 = vpack.c.bf16 %v2539_v60, %v2538_v43  ;;  %v6934_v43 = vld [vmem:[%s8734_s9 + $0x280] sm:$0xff] }
 0x4f4   : > { %4706 = vmatprep.mubr.msk.f32.mxu1 %vm523_vm1, %v5366_v10  ;;  %v2540_v10 = vld [vmem:[%s8734_s9 + $0xe0] sm:$0xff] }
 0x4f7   : > { %4707 = vmatmul.mubr.msk.f32.gmra.mrb[22].mxu1 %vm523_vm1, %v5367_v53  ;;  %v2541_v53 = vld [vmem:[%s8734_s9 + $0xe8] sm:$0xff] }
 0x4f8   : > { %4709 = vmatprep.mubr.msk.f32.mxu1 %vm523_vm1, %v5368_v19  ;;  %v4880_v19 = vpack.c.bf16 %v2541_v53, %v2540_v10  ;;  %v6944_v10 = vld [vmem:[%s8734_s9 + $0x288] sm:$0xff]  ;;  %v6949_v53 = vld [vmem:[%s8734_s9 + $0x290] sm:$0xff] }
 0x4fb   : > { %4710 = vmatmul.mubr.msk.f32.gmra.mrb[24].mxu1 %vm523_vm1, %v5369_v34  ;;  %v2542_v34 = vld [vmem:[%s8734_s9 + $0xf0] sm:$0xff] }
 0x4fc   : > { %4712 = vmatprep.mubr.msk.f32.mxu1 %vm523_vm1, %v5370_v36  ;;  %v2543_v36 = vld [vmem:[%s8734_s9 + $0xf8] sm:$0xff] }
 0x4ff   : > { %4713 = vmatmul.mubr.msk.f32.gmra.mrb[26].mxu1 %vm523_vm1, %v5371_v9  ;;  %v4883_v9 = vpack.c.bf16 %v2543_v36, %v2542_v34 }
 0x500   : > { %4715 = vmatprep.mubr.msk.f32.mxu1 %vm523_vm1, %v5372_v7 }
 0x503   : > { %4716 = vmatmul.mubr.msk.f32.gmra.mrb[28].mxu1 %vm523_vm1, %v5373_v47  ;;  %v6772_v47 = vld [vmem:[%s8733_s8] ss:$0 sm:$0xff] }
 0x504   : > { %4718 = vmatprep.mubr.msk.f32.mxu1 %vm523_vm1, %v5374_v49 }
 0x507   : > { %4719 = vmatmul.mubr.msk.f32.gmra.mrb[30].mxu1 %vm523_vm1, %v5375_v45 }
 0x508   : > { %4721 = vmatprep.mubr.msk.f32.mxu1 %vm523_vm1, %v5376_v4  ;;  %v9056_v4 = vld [vmem:[#allocation58_spill] sm:$0xff] }
 0x509   : > { %vm2170_vm3 = vcmp.eq.s32.totalorder %v9056_v4, 0  ;;  %v6800_v46 = vsub.s32 6, %v9056_v4  ;;  %vm2342_vm4 = vcmp.lt.s32.totalorder %v9056_v4, 1  ;;  %vm2443_vm5 = vcmp.lt.s32.totalorder %v9056_v4, 7 }
 0x50b   : > { %4722 = vmatmul.mubr.msk.f32.gmra.mrb[32].mxu1 %vm523_vm1, %v5377_v41  ;;  %v6778_v41 = vsub.s32 1, %v9056_v4 }
 0x50c   : > { %4724 = vmatprep.mubr.msk.f32.mxu1 %vm523_vm1, %v9025_v11  ;;  %v2571_v11 = vld [vmem:[%s8734_s9 + $0x1d8] sm:$0xff] }
 0x50d   : > { %v4925_v44 = vpack.c.bf16 %v2571_v11, %v2570_v52  ;;  %v6787_v11 = vadd.s32 8, %v9056_v4 }
 0x50f   : > { %4725 = vmatmul.mubr.msk.f32.gmra.mrb[34].mxu1 %vm523_vm1, %v5977_v3  ;;  %4926 = vmatpush1.bf16.msra.mxu0 %v4925_v44  ;;  %v2514_v3 = vld [vmem:[%s8734_s9 + $0x10] sm:$0xff]  ;;  %vm2177_vm6 = vcmp.eq.s32.totalorder %v6787_v11, 15  ;;  %v2648_v11 = vld [vmem:[%s8734_s9 + $0x440] sm:$0xff] }
 0x510   : > { %4927 = vmatprep.subr.bf16.mxu0 %v9022_v33  ;;  %v4841_v12 = vpack.c.bf16 %v2515_v2, %v2514_v3  ;;  %v2576_v3 = vld [vmem:[%s8734_s9 + $0x200] sm:$0xff]  ;;  %v2577_v2 = vld [vmem:[%s8734_s9 + $0x208] sm:$0xff] }
 0x511   : > { %v4934_v16 = vpack.c.bf16 %v2577_v2, %v2576_v3  ;;  %v6973_v2 = vld [vmem:[%s8734_s9 + $0x2a0] sm:$0xff]  ;;  %v7077_v3 = vld [vmem:[%s8734_s9 + $0x2f8] sm:$0xff] }
 0x512   : > { %4842 = vmatpush1.bf16.msra.mxu1 %v4841_v12  ;;  %9071 = vst [vmem:[#allocation3_spill] sm:$0xff] %v7077_v3 }
 0x513   : > { %4929 = vmatpush1.bf16.msra.mxu0 %v4928_v55  ;;  %4843 = vmatprep.subr.bf16.mxu1 %v9022_v33 }
 0x514   : > { %4930 = vmatprep.subr.bf16.mxu0 %v9022_v33 }
 0x516   : > { %4845 = vmatpush1.bf16.msra.mxu1 %v4844_v0 }
 0x517   : > { %4932 = vmatpush1.bf16.msra.mxu0 %v4931_v22  ;;  %4846 = vmatprep.subr.bf16.mxu1 %v9022_v33 }
 0x518   : > { %4933 = vmatprep.subr.bf16.mxu0 %v9022_v33 }
 0x51a   : > { %4848 = vmatpush1.bf16.msra.mxu1 %v4847_v27 }
 0x51b   : > { %4849 = vmatprep.subr.bf16.mxu1 %v9022_v33 }
 0x51e   : > { %4851 = vmatpush1.bf16.msra.mxu1 %v4850_v31  ;;  %v2578_v31 = vld [vmem:[%s8734_s9 + $0x210] sm:$0xff] }
 0x51f   : > { %4852 = vmatprep.subr.bf16.mxu1 %v9022_v33  ;;  %v4937_v32 = vpack.c.bf16 %v2579_v37, %v2578_v31  ;;  %v6999_v31 = vld [vmem:[%s8734_s9 + $0x2b8] sm:$0xff]  ;;  %v7004_v37 = vld [vmem:[%s8734_s9 + $0x2c0] sm:$0xff] }
 0x522   : > { %4854 = vmatpush1.bf16.msra.mxu1 %v4853_v58 }
 0x523   : > { %4855 = vmatprep.subr.bf16.mxu1 %v9022_v33 }
 0x526   : > { %4857 = vmatpush1.bf16.msra.mxu1 %v4856_v14 }
 0x527   : > { %4858 = vmatprep.subr.bf16.mxu1 %v9022_v33 }
 0x52a   : > { %4860 = vmatpush1.bf16.msra.mxu1 %v4859_v24  ;;  %v6872_v24 = vld [vmem:[%s8734_s9 + $0x230] sm:$0xff] }
 0x52b   : > { %4861 = vmatprep.subr.bf16.mxu1 %v9022_v33 }
 0x52e   : > { %4863 = vmatpush1.bf16.msra.mxu1 %v4862_v48 }
 0x52f   : > { %4864 = vmatprep.subr.bf16.mxu1 %v9022_v33 }
 0x532   : > { %4866 = vmatpush1.bf16.msra.mxu1 %v4865_v61  ;;  %v6889_v61 = vld [vmem:[%s8734_s9 + $0x240] sm:$0xff] }
 0x533   : > { %4867 = vmatprep.subr.bf16.mxu1 %v9022_v33 }
 0x536   : > { %4869 = vmatpush1.bf16.msra.mxu1 %v4868_v40  ;;  %v6905_v40 = vld [vmem:[%s8734_s9 + $0x258] sm:$0xff] }
 0x537   : > { %4870 = vmatprep.subr.bf16.mxu1 %v9022_v33 }
 0x53a   : > { %4872 = vmatpush1.bf16.msra.mxu1 %v4871_v59 }
 0x53b   : > { %4873 = vmatprep.subr.bf16.mxu1 %v9022_v33 }
 0x53e   : > { %4875 = vmatpush1.bf16.msra.mxu1 %v4874_v8  ;;  %v6929_v8 = vld [vmem:[%s8734_s9 + $0x278] sm:$0xff] }
 0x53f   : > { %4876 = vmatprep.subr.bf16.mxu1 %v9022_v33 }
 0x542   : > { %4878 = vmatpush1.bf16.msra.mxu1 %v4877_v18 }
 0x543   : > { %4879 = vmatprep.subr.bf16.mxu1 %v9022_v33 }
 0x546   : > { %4881 = vmatpush1.bf16.msra.mxu1 %v4880_v19  ;;  %v6954_v19 = vld [vmem:[%s8734_s9 + $0x298] sm:$0xff] }
 0x547   : > { %4882 = vmatprep.subr.bf16.mxu1 %v9022_v33 }
 0x54a   : > { %4884 = vmatpush1.bf16.msra.mxu1 %v4883_v9  ;;  %v4940_v9 = vpack.c.bf16 %v2581_v26, %v6864_v63 }
 0x5a6   : > { %v4681_v7 = vpop.f32.mrb[4].mxu1 }
 0x5a7   : > { %v1937_v49 = vpop.f32.mrb[5].mxu1  ;;  %v6781_v25 = vadd.f32 %v4681_v7, %v6772_v47  ;;  %v4943_v7 = vpack.c.bf16 %v6877_v62, %v6872_v24 }
 0x5a8   : > { %v6775_v45 = vadd.f32 %v6772_v47, %v1937_v49 }
 0x5a9   : > { %9057 = vst [vmem:[#allocation10_spill] sm:$0xff] %v6781_v25  ;;  %v2313_v0 = vrot.slane %v6781_v25, 7  ;;  %v2414_v54 = vrot.slane %v6781_v25, 1 }
 0x5aa   : > { %v4684_v29 = vpop.f32.mrb[6].mxu1  ;;  %v2312_v51 = vrot.slane %v6775_v45, 7  ;;  %v2189_v30 = vrot.slane %v6775_v45, %v6778_v41  ;;  %v2413_v20 = vrot.slane %v6775_v45, 1 }
 0x5ab   : > { %v6784_v52 = vadd.f32 %v4684_v29, %v6772_v47  ;;  %v1947_v28 = vpop.f32.mrb[7].mxu1 }
 0x5ac   : > { %v6791_v44 = vadd.f32 %v6772_v47, %v1947_v28  ;;  %v6852_v57 = vsel %vm2342_vm4, %v2312_v51, %v2313_v0 }
 0x5ad   : > { %v6803_v12 = vrot.slane %v6784_v52, 7  ;;  %v6807_v55 = vrot.slane %v6784_v52, 1  ;;  %v6846_v21 = vrot.slane %v6784_v52, %v6800_v46  ;;  %9062 = vst [vmem:[#allocation23_spill] sm:$0xff] %v6852_v57 }
 0x5ae   : > { %9058 = vst [vmem:[#allocation15_spill] sm:$0xff] %v6791_v44  ;;  %v6810_v17 = vpop.f32.mrb[8].mxu1  ;;  %2727 = vmatprep.mubr.f32.mxu1 %v6791_v44  ;;  %v6816_v50 = vrot.slane %v6791_v44, 1  ;;  %v6824_v56 = vrot.slane %v6791_v44, 7  ;;  %v6859_v14 = vrot.slane %v6791_v44, %v6778_v41 }
 0x5af   : > { %v1957_v13 = vpop.f32.mrb[9].mxu1  ;;  %v2375_v22 = vsel %vm2342_vm4, %v6803_v12, %v2312_v51  ;;  %v2476_v5 = vsel %vm2443_vm5, %v6807_v55, %v2413_v20  ;;  %v6978_v51 = vld [vmem:[%s8734_s9 + $0x2a8] sm:$0xff] }
 0x5b0   : > { %9059 = vst [vmem:[#allocation13_spill] sm:$0xff] %v6816_v50  ;;  %v6828_v27 = vsel %vm2170_vm3, %v2189_v30, %v2375_v22  ;;  %v6834_v6 = vsel %vm2443_vm5, %v6816_v50, %v6807_v55  ;;  %v6880_v38 = vadd.f32 %v6772_v47, %v1957_v13  ;;  %v2373_v42 = vsel %vm2342_vm4, %v2313_v0, %v6824_v56  ;;  %v6983_v30 = vld [vmem:[%s8734_s9 + $0x2b0] sm:$0xff] }
 0x5b1   : > { %9060 = vst [vmem:[#allocation19_spill] sm:$0xff] %v6828_v27  ;;  %9061 = vst [vmem:[#allocation17_spill] sm:$0xff] %v6834_v6  ;;  %2952 = vmatprep.mubr.f32.mxu0 %v6828_v27  ;;  %v2479_v59 = vsel %vm2177_vm6, %v6846_v21, %v2476_v5  ;;  %v6939_v18 = vsel %vm2170_vm3, %v6859_v14, %v2373_v42  ;;  %v6990_v13 = vsel %vm2443_vm5, %v2413_v20, %v2414_v54  ;;  %v7009_v20 = vld [vmem:[%s8734_s9 + $0x2c8] sm:$0xff] }
 0x5b2   : > { %v4690_v58 = vpop.f32.mrb[10].mxu1  ;;  %2953 = vmatmul.mubr.f32.vlgmr.msra.gmra.mrb[0].mxu0 %v6834_v6  ;;  %9063 = vst [vmem:[#allocation21_spill] sm:$0xff] %v6939_v18  ;;  %v8822_v36 = vrot.slane %v6880_v38, 7  ;;  %9065 = vst [vmem:[#allocation25_spill] sm:$0xff] %v6990_v13  ;;  %v7013_v5 = vadd.f32 %v6810_v17, %v6772_v47  ;;  %v7020_v26 = vsel %vm2342_vm4, %v6824_v56, %v6803_v12  ;;  %v7030_v17 = vld [vmem:[%s8734_s9 + $0x2d0] sm:$0xff] }
 0x5b3   : > { %4935 = vmatpush1.bf16.msra.mxu0 %v4934_v16  ;;  %v1967_v48 = vpop.f32.mrb[11].mxu1  ;;  %2957 = vmatprep.mubr.f32.mxu0 %v6852_v57  ;;  %9067 = vst [vmem:[#allocation29_spill] sm:$0xff] %v7020_v26  ;;  %v2474_v24 = vsel %vm2443_vm5, %v2414_v54, %v6816_v50  ;;  %v2193_v62 = vrot.slane %v6880_v38, %v6778_v41  ;;  %v2415_v16 = vrot.slane %v6880_v38, 1 }
 0x5b4   : > { %4936 = vmatprep.subr.bf16.mxu0 %v9022_v33  ;;  %v6986_v0 = vadd.f32 %v6772_v47, %v1967_v48  ;;  %9066 = vst [vmem:[#allocation31_spill] sm:$0xff] %v7013_v5  ;;  %v7035_v48 = vld [vmem:[%s8734_s9 + $0x2d8] sm:$0xff]  ;;  %v7038_v42 = vadd.f32 %v4690_v58, %v6772_v47  ;;  %v2371_v54 = vsel %vm2342_vm4, %v6803_v12, %v8822_v36  ;;  %v7052_v58 = vld [vmem:[%s8734_s9 + $0x2e0] sm:$0xff] }
 0x5b5   : > { %v2257_v57 = vrot.slane %v7013_v5, %v6800_v46 }
 0x5b6   : > { %v4693_v60 = vpop.f32.mrb[12].mxu1  ;;  %2958 = vmatmul.mubr.f32.gmra.mrb[2].mxu0 %v2479_v59  ;;  %9064 = vst [vmem:[#allocation27_spill] sm:$0xff] %v6986_v0  ;;  %9068 = vst [vmem:[#allocation37_spill] sm:$0xff] %v7038_v42  ;;  %v2253_v59 = vrot.slane %v6781_v25, %v6800_v46  ;;  %v2316_v12 = vrot.slane %v6986_v0, 7  ;;  %v2417_v29 = vrot.slane %v6986_v0, 1  ;;  %v2317_v49 = vrot.slane %v7038_v42, 7 }
 0x5b7   : > { %v1977_v34 = vpop.f32.mrb[13].mxu1  ;;  %2962 = vmatprep.mubr.f32.mxu0 %v6939_v18  ;;  %4938 = vmatpush1.bf16.msra.mxu0 %v4937_v32  ;;  %v7088_v36 = vadd.f32 %v4693_v60, %v6772_v47  ;;  %v7093_v18 = vsel %vm2170_vm3, %v2193_v62, %v2371_v54  ;;  %v2472_v60 = vsel %vm2443_vm5, %v6807_v55, %v2415_v16  ;;  %v2418_v55 = vrot.slane %v7038_v42, 1 }
 0x5b8   : > { %4939 = vmatprep.subr.bf16.mxu0 %v9022_v33  ;;  %v7055_v22 = vadd.f32 %v6772_v47, %v1977_v34  ;;  %v7072_v34 = vld [vmem:[%s8734_s9 + $0x2f0] sm:$0xff]  ;;  %v7081_v28 = vsel %vm2177_vm6, %v2253_v59, %v2474_v24  ;;  %9074 = vst [vmem:[#allocation5_spill] sm:$0xff] %v7093_v18  ;;  %v2315_v24 = vrot.slane %v7013_v5, 7  ;;  %v2416_v59 = vrot.slane %v7013_v5, 1 }
 0x5b9   : > { %9070 = vst [vmem:[#allocation2_spill] sm:$0xff] %v7072_v34  ;;  %9072 = vst [vmem:[#allocation4_spill] sm:$0xff] %v7081_v28  ;;  %v2197_v54 = vrot.slane %v6986_v0, %v6778_v41  ;;  %v9076_v5 = vrot.slane %v6880_v38, 7  ;;  %v2319_v27 = vrot.slane %v7088_v36, 7 }
 0x5ba   : > { %v4696_v63 = vpop.f32.mrb[14].mxu1  ;;  %2963 = vmatmul.mubr.f32.gmra.mrb[4].mxu0 %v6990_v13  ;;  %9069 = vst [vmem:[#allocation34_spill] sm:$0xff] %v7055_v22  ;;  %9073 = vst [vmem:[#allocation49_spill] sm:$0xff] %v7088_v36  ;;  %v2470_v62 = vsel %vm2443_vm5, %v2416_v59, %v2417_v29  ;;  %v2419_v0 = vrot.slane %v7055_v22, 1  ;;  %v7137_v25 = vsel %vm2443_vm5, %v2415_v16, %v2416_v59 }
 0x5bb   : > { %v1987_v32 = vpop.f32.mrb[15].mxu1  ;;  %2967 = vmatprep.mubr.f32.mxu0 %v7020_v26  ;;  %4941 = vmatpush1.bf16.msra.mxu0 %v4940_v9  ;;  %v7067_v9 = vld [vmem:[%s8734_s9 + $0x2e8] sm:$0xff]  ;;  %v7128_v3 = vsel %vm2342_vm4, %v9076_v5, %v2315_v24  ;;  %9079 = vst [vmem:[#allocation8_spill] sm:$0xff] %v7137_v25  ;;  %v2201_v5 = vrot.slane %v7055_v22, %v6778_v41 }
 0x5bc   : > { %4942 = vmatprep.subr.bf16.mxu0 %v9022_v33  ;;  %9077 = vst [vmem:[#allocation54_spill] sm:$0xff] %v7128_v3  ;;  %v2261_v16 = vrot.slane %v7038_v42, %v6800_v46 }
 0x5be   : > { %v4699_v13 = vpop.f32.mrb[16].mxu1  ;;  %2968 = vmatmul.mubr.f32.gmra.mrb[6].mxu0 %v7081_v28  ;;  %v2369_v28 = vsel %vm2342_vm4, %v2315_v24, %v2316_v12  ;;  %v7155_v24 = vadd.f32 %v4696_v63, %v6772_v47 }
 0x5bf   : > { %v7097_v44 = vpop.f32.mrb[17].mxu1  ;;  %2972 = vmatprep.mubr.f32.mxu0 %v7093_v18  ;;  %4944 = vmatpush1.bf16.msra.mxu0 %v4943_v7  ;;  %v2318_v18 = vrot.slane %v7055_v22, 7  ;;  %v7116_v7 = vadd.f32 %v6772_v47, %v1987_v32  ;;  %v7133_v32 = vsel %vm2177_vm6, %v6846_v21, %v2472_v60  ;;  %v9081_v21 = vpack.c.bf16 %v6894_v35, %v6889_v61 }
 0x5c0   : > { %4945 = vmatprep.subr.bf16.mxu0 %v9022_v33  ;;  %9078 = vst [vmem:[#allocation7_spill] sm:$0xff] %v7133_v32  ;;  %9082 = vst [vmem:[#allocation56_spill] sm:$0xff] %v7155_v24  ;;  %v7159_v59 = vsel %vm2170_vm3, %v2197_v54, %v2369_v28  ;;  %v7170_v61 = vsel %vm2443_vm5, %v2417_v29, %v2418_v55  ;;  %v2468_v35 = vsel %vm2443_vm5, %v2418_v55, %v2419_v0 }
 0x5c1   : > { %9075 = vst [vmem:[#allocation6_spill] sm:$0xff] %v7116_v7  ;;  %9083 = vst [vmem:[#allocation55_spill] sm:$0xff] %v7159_v59  ;;  %v2367_v60 = vsel %vm2342_vm4, %v2317_v49, %v2318_v18  ;;  %v2320_v63 = vrot.slane %v7116_v7, 7  ;;  %v2420_v28 = vrot.slane %v7088_v36, 1  ;;  %v7188_v54 = vsel %vm2342_vm4, %v2318_v18, %v2319_v27 }
 0x5c2   : > { %v4702_v34 = vpop.f32.mrb[18].mxu1  ;;  %2973 = vmatmul.mubr.f32.gmra.mrb[8].mxu0 %v6834_v6  ;;  %v7145_v6 = vsel %vm2342_vm4, %v2316_v12, %v2317_v49  ;;  %v7163_v12 = vsel %vm2177_vm6, %v2257_v57, %v2470_v62  ;;  %9085 = vst [vmem:[#allocation9_spill] sm:$0xff] %v7170_v61  ;;  %v2640_v57 = vld [vmem:[%s8734_s9 + $0x400] sm:$0xff]  ;;  %v2641_v49 = vld [vmem:[%s8734_s9 + $0x408] sm:$0xff]  ;;  %9086 = vst [vmem:[#allocation11_spill] sm:$0xff] %v7188_v54  ;;  %v2265_v55 = vrot.slane %v7088_v36, %v6800_v46 }
 0x5c3   : > { %v7140_v50 = vpop.f32.mrb[19].mxu1  ;;  %2977 = vmatprep.mubr.f32.mxu0 %v7128_v3  ;;  %9080 = vst [vmem:[#allocation53_spill] sm:$0xff] %v7145_v6  ;;  %4947 = vmatpush1.bf16.msra.mxu0 %v9081_v21  ;;  %9084 = vst [vmem:[#allocation57_spill] sm:$0xff] %v7163_v12  ;;  %v7183_v62 = vadd.f32 %v4702_v34, %v6772_v47  ;;  %v2421_v21 = vrot.slane %v7116_v7, 1  ;;  %v7199_v34 = vsel %vm2170_vm3, %v2201_v5, %v2367_v60 }
 0x5c4   : > { %4948 = vmatprep.subr.bf16.mxu0 %v9022_v33  ;;  %9087 = vst [vmem:[#allocation12_spill] sm:$0xff] %v7199_v34  ;;  %v7204_v18 = vpack.c.bf16 %v2641_v49, %v2640_v57  ;;  %v8859_v3 = vrot.slane %v7155_v24, 7  ;;  %v7218_v5 = vadd.f32 %v4699_v13, %v6772_v47 }
 0x5c5   : > { %v8857_v60 = vrot.slane %v7183_v62, 1  ;;  %v2277_v49 = vrot.slane %v7183_v62, %v6800_v46 }
 0x5c6   : > { %v4705_v29 = vpop.f32.mrb[20].mxu1  ;;  %2978 = vmatmul.mubr.f32.gmra.mrb[10].mxu0 %v7133_v32  ;;  %v9088_v32 = vpack.c.bf16 %v6905_v40, %v6899_v1  ;;  %v2365_v1 = vsel %vm2342_vm4, %v2319_v27, %v2320_v63  ;;  %v7224_v40 = vsel %vm2443_vm5, %v2419_v0, %v2420_v28  ;;  %5030 = vmatprep.subr.bf16.mxu1 %v7204_v18 }
 0x5c7   : > { %v7194_v22 = vadd.f32 %v4705_v29, %v6772_v47  ;;  %v2017_v42 = vpop.f32.mrb[21].mxu1  ;;  %2982 = vmatprep.mubr.f32.mxu0 %v7159_v59  ;;  %v7211_v29 = vsel %vm2177_vm6, %v2261_v16, %v2468_v35  ;;  %v2205_v59 = vrot.slane %v7116_v7, %v6778_v41  ;;  %9090 = vst [vmem:[#allocation16_spill] sm:$0xff] %v7224_v40 }
 0x5c8   : > { %4950 = vmatpush1.bf16.msra.mxu0 %v9088_v32  ;;  %v7207_v36 = vadd.f32 %v6772_v47, %v2017_v42  ;;  %9089 = vst [vmem:[#allocation14_spill] sm:$0xff] %v7211_v29  ;;  %v8858_v42 = vrot.slane %v7155_v24, 1  ;;  %v2466_v16 = vsel %vm2443_vm5, %v2420_v28, %v2421_v21  ;;  %v7237_v0 = vadd.f32 %v6772_v47, %v7097_v44 }
 0x5c9   : > { %4951 = vmatprep.subr.bf16.mxu0 %v9022_v33  ;;  %v9091_v28 = vpack.c.bf16 %v6915_v39, %v6910_v23  ;;  %v7253_v44 = vsel %vm2170_vm3, %v2205_v59, %v2365_v1  ;;  %v7270_v39 = vsel %vm2177_vm6, %v2265_v55, %v2466_v16 }
 0x5ca   : > { %v4708_v32 = vpop.f32.mrb[22].mxu1  ;;  %2983 = vmatmul.mubr.f32.gmra.mrb[12].mxu0 %v7137_v25  ;;  %v8856_v27 = vrot.slane %v7207_v36, 1  ;;  %9092 = vst [vmem:[#allocation18_spill] sm:$0xff] %v7253_v44  ;;  %9094 = vst [vmem:[#allocation20_spill] sm:$0xff] %v7270_v39  ;;  %v7276_v59 = vsel %vm2443_vm5, %v2421_v21, %v8858_v42  ;;  %v9096_v42 = vpack.c.bf16 %v6929_v8, %v6924_v15  ;;  %v9097_v15 = vrot.slane %v7194_v22, 1 }
 0x5cb   : > { %v7240_v35 = vadd.f32 %v4708_v32, %v6772_v47  ;;  %v2027_v57 = vpop.f32.mrb[23].mxu1  ;;  %2987 = vmatprep.mubr.f32.mxu0 %v7145_v6  ;;  %v7259_v32 = vsel %vm2342_vm4, %v2320_v63, %v8859_v3  ;;  %9095 = vst [vmem:[#allocation33_spill] sm:$0xff] %v7276_v59  ;;  %v8865_v63 = vrot.slane %v7194_v22, 7  ;;  %v2281_v3 = vrot.slane %v7194_v22, %v6800_v46 }
 0x5cc   : > { %4953 = vmatpush1.bf16.msra.mxu0 %v9091_v28  ;;  %v7249_v13 = vadd.f32 %v6772_v47, %v2027_v57  ;;  %9093 = vst [vmem:[#allocation40_spill] sm:$0xff] %v7259_v32  ;;  %v2460_v23 = vsel %vm2443_vm5, %v8857_v60, %v8856_v27 }
 0x5cd   : > { %4954 = vmatprep.subr.bf16.mxu0 %v9022_v33  ;;  %v7281_v1 = vsel %vm2177_vm6, %v2277_v49, %v2460_v23  ;;  %v2209_v49 = vrot.slane %v7237_v0, %v6778_v41 }
 0x5ce   : > { %v4711_v57 = vpop.f32.mrb[24].mxu1  ;;  %2988 = vmatmul.mubr.f32.gmra.mrb[14].mxu0 %v7163_v12  ;;  %v2221_v28 = vrot.slane %v7249_v13, %v6778_v41  ;;  %v8864_v55 = vrot.slane %v7249_v13, 7  ;;  %v8866_v27 = vrot.slane %v7249_v13, 1  ;;  %v9098_v12 = vpack.c.bf16 %v6944_v10, %v6934_v43 }
 0x5cf   : > { %v7290_v21 = vadd.f32 %v4711_v57, %v6772_v47  ;;  %v2037_v60 = vpop.f32.mrb[25].mxu1  ;;  %2992 = vmatprep.mubr.f32.mxu0 %v7199_v34  ;;  %v2322_v57 = vrot.slane %v7237_v0, 7 }
 0x5d0   : > { %4956 = vmatpush1.bf16.msra.mxu0 %v9096_v42  ;;  %v7302_v16 = vadd.f32 %v6772_v47, %v2037_v60  ;;  %v2357_v23 = vsel %vm2342_vm4, %v8865_v63, %v8864_v55  ;;  %v2458_v8 = vsel %vm2443_vm5, %v9097_v15, %v8866_v27  ;;  %v2285_v27 = vrot.slane %v7240_v35, %v6800_v46 }
 0x5d1   : > { %4957 = vmatprep.subr.bf16.mxu0 %v9022_v33  ;;  %v7322_v60 = vsel %vm2170_vm3, %v2221_v28, %v2357_v23  ;;  %v7327_v25 = vsel %vm2177_vm6, %v2281_v3, %v2458_v8  ;;  %v7337_v28 = vadd.f32 %v6772_v47, %v7140_v50  ;;  %v9099_v50 = vrot.slane %v7155_v24, 7 }
 0x5d2   : > { %v4714_v55 = vpop.f32.mrb[26].mxu1  ;;  %2993 = vmatmul.mubr.f32.gmra.mrb[16].mxu0 %v7170_v61  ;;  %v2225_v63 = vrot.slane %v7302_v16, %v6778_v41  ;;  %v8873_v15 = vrot.slane %v7302_v16, 7  ;;  %v9100_v8 = vrot.slane %v7240_v35, 7  ;;  %v9101_v10 = vrot.slane %v7302_v16, 1 }
 0x5d3   : > { %v7340_v23 = vadd.f32 %v4714_v55, %v6772_v47  ;;  %v2047_v3 = vpop.f32.mrb[27].mxu1  ;;  %2997 = vmatprep.mubr.f32.mxu0 %v7188_v54  ;;  %v2363_v55 = vsel %vm2342_vm4, %v9099_v50, %v2322_v57  ;;  %v9103_v61 = vrot.slane %v7218_v5, 7 }
 0x5d4   : > { %4959 = vmatpush1.bf16.msra.mxu0 %v9098_v12  ;;  %v7350_v42 = vadd.f32 %v6772_v47, %v2047_v3  ;;  %v2355_v43 = vsel %vm2342_vm4, %v9100_v8, %v8873_v15  ;;  %v9102_v12 = vrot.slane %v7240_v35, 1 }
 0x5d5   : > { %4960 = vmatprep.subr.bf16.mxu0 %v9022_v33  ;;  %v7373_v50 = vsel %vm2342_vm4, %v2322_v57, %v9103_v61  ;;  %v7377_v7 = vsel %vm2170_vm3, %v2225_v63, %v2355_v43  ;;  %v2289_v61 = vrot.slane %v7290_v21, %v6800_v46  ;;  %v7410_v57 = vsel %vm2170_vm3, %v2209_v49, %v2363_v55 }
 0x5d6   : > { %v2456_v3 = vsel %vm2443_vm5, %v9102_v12, %v9101_v10  ;;  %9104 = vst [vmem:[#allocation36_spill] sm:$0xff] %v7373_v50  ;;  %9105 = vst [vmem:[#allocation43_spill] sm:$0xff] %v7377_v7  ;;  %v4717_v15 = vpop.f32.mrb[28].mxu1  ;;  %2998 = vmatmul.mubr.f32.gmra.mrb[18].mxu0 %v7211_v29  ;;  %v2229_v10 = vrot.slane %v7350_v42, %v6778_v41  ;;  %v9109_v12 = vpack.c.bf16 %v6954_v19, %v6949_v53 }
 0x5d7   : > { %v7382_v8 = vsel %vm2177_vm6, %v2285_v27, %v2456_v3  ;;  %v7391_v63 = vadd.f32 %v4717_v15, %v6772_v47  ;;  %v2057_v43 = vpop.f32.mrb[29].mxu1  ;;  %3002 = vmatprep.mubr.f32.mxu0 %v7253_v44  ;;  %v9107_v27 = vrot.slane %v7237_v0, 1  ;;  %v9108_v3 = vrot.slane %v7155_v24, 1  ;;  %9111 = vst [vmem:[#allocation24_spill] sm:$0xff] %v7410_v57 }
 0x5d8   : > { %9106 = vst [vmem:[#allocation22_spill] sm:$0xff] %v7382_v8  ;;  %4962 = vmatpush1.bf16.msra.mxu0 %v9109_v12  ;;  %v7406_v15 = vadd.f32 %v6772_v47, %v2057_v43  ;;  %v9112_v29 = vrot.slane %v7350_v42, 7  ;;  %v9114_v19 = vrot.slane %v7350_v42, 1  ;;  %v9115_v12 = vrot.slane %v7290_v21, 1 }
 0x5d9   : > { %v2464_v54 = vsel %vm2443_vm5, %v9108_v3, %v9107_v27  ;;  %4963 = vmatprep.subr.bf16.mxu0 %v9022_v33  ;;  %v9113_v27 = vrot.slane %v7290_v21, 7 }
 0x5da   : > { %9110 = vst [vmem:[#allocation45_spill] sm:$0xff] %v7406_v15  ;;  %v2454_v43 = vsel %vm2443_vm5, %v9115_v12, %v9114_v19  ;;  %3003 = vmatmul.mubr.f32.gmra.mrb[20].mxu0 %v7224_v40  ;;  %v9120_v12 = vpack.c.bf16 %v6978_v51, %v6973_v2  ;;  %v2213_v19 = vrot.slane %v7337_v28, %v6778_v41  ;;  %v9124_v2 = vrot.slane %v7406_v15, 1 }
 0x5db   : > { %v2353_v53 = vsel %vm2342_vm4, %v9113_v27, %v9112_v29  ;;  %v7433_v44 = vsel %vm2177_vm6, %v2289_v61, %v2454_v43  ;;  %v4720_v29 = vpop.f32.mrb[30].mxu1  ;;  %v2233_v27 = vrot.slane %v7406_v15, %v6778_v41  ;;  %3007 = vmatprep.mubr.f32.mxu0 %v7259_v32  ;;  %v9118_v61 = vrot.slane %v7155_v24, %v6800_v46 }
 0x5dc   : > { %v7428_v49 = vsel %vm2170_vm3, %v2229_v10, %v2353_v53  ;;  %9117 = vst [vmem:[#allocation42_spill] sm:$0xff] %v7433_v44  ;;  %v7442_v10 = vadd.f32 %v4720_v29, %v6772_v47  ;;  %v2067_v53 = vpop.f32.mrb[31].mxu1  ;;  %4965 = vmatpush1.bf16.msra.mxu0 %v9120_v12  ;;  %v2293_v29 = vrot.slane %v7340_v23, %v6800_v46  ;;  %v9125_v51 = vrot.slane %v7340_v23, 1 }
 0x5dd   : > { %9116 = vst [vmem:[#allocation39_spill] sm:$0xff] %v7428_v49  ;;  %v7450_v43 = vsel %vm2177_vm6, %v9118_v61, %v2464_v54  ;;  %v7459_v3 = vadd.f32 %v6772_v47, %v2067_v53  ;;  %4966 = vmatprep.subr.bf16.mxu0 %v9022_v33  ;;  %v9122_v54 = vrot.slane %v7406_v15, 7  ;;  %v9123_v61 = vrot.slane %v7340_v23, 7 }
 0x5de   : > { %9119 = vst [vmem:[#allocation47_spill] sm:$0xff] %v7450_v43  ;;  %v2452_v12 = vsel %vm2443_vm5, %v9125_v51, %v9124_v2  ;;  %v9126_v53 = vrot.slane %v7337_v28, 7  ;;  %v9127_v40 = vrot.slane %v7218_v5, 7  ;;  %v4723_v15 = vpop.f32.mrb[32].mxu1  ;;  %3008 = vmatmul.mubr.f32.gmra.mrb[22].mxu0 %v7270_v39 }
 0x5df   : > { %9121 = vst [vmem:[#allocation26_spill] sm:$0xff] %v7459_v3  ;;  %v2351_v55 = vsel %vm2342_vm4, %v9123_v61, %v9122_v54  ;;  %v7489_v61 = vsel %vm2177_vm6, %v2293_v29, %v2452_v12  ;;  %v2237_v2 = vrot.slane %v7459_v3, %v6778_v41  ;;  %3012 = vmatprep.mubr.f32.mxu0 %v7410_v57  ;;  %v9130_v29 = vrot.slane %v7218_v5, 1 }
 0x5e0   : > { %v2361_v32 = vsel %vm2342_vm4, %v9127_v40, %v9126_v53  ;;  %v7484_v24 = vsel %vm2170_vm3, %v2233_v27, %v2351_v55  ;;  %9129 = vst [vmem:[#allocation44_spill] sm:$0xff] %v7489_v61  ;;  %v7498_v55 = vadd.f32 %v4723_v15, %v6772_v47  ;;  %v2077_v27 = vpop.f32.mrb[33].mxu1  ;;  %v9131_v12 = vrot.slane %v7237_v0, 1 }
 0x5e1   : > { %9128 = vst [vmem:[#allocation28_spill] sm:$0xff] %v7484_v24  ;;  %v9132_v40 = vpack.c.bf16 %v6999_v31, %v6983_v30  ;;  %v2297_v15 = vrot.slane %v7391_v63, %v6800_v46  ;;  %v7516_v53 = vadd.f32 %v6772_v47, %v2077_v27  ;;  %v9134_v57 = vrot.slane %v7459_v3, 7 }
 0x5e2   : > { %v7507_v54 = vsel %vm2443_vm5, %v9131_v12, %v9130_v29  ;;  %v9135_v29 = vrot.slane %v7391_v63, 7  ;;  %v9136_v30 = vrot.slane %v7459_v3, 1  ;;  %v9137_v31 = vrot.slane %v7391_v63, 1  ;;  %3013 = vmatmul.mubr.f32.gmra.mrb[24].mxu0 %v7276_v59 }
 0x5e3   : > { %4968 = vmatpush1.bf16.msra.mxu0 %v9132_v40  ;;  %9133 = vst [vmem:[#allocation46_spill] sm:$0xff] %v7516_v53  ;;  %v2339_v27 = vrot.slane %v7498_v55, 7  ;;  %v7535_v39 = vsel %vm2170_vm3, %v2213_v19, %v2361_v32  ;;  %v7552_v32 = vrot.slane %v7516_v53, 7  ;;  %v7555_v19 = vrot.slane %v7516_v53, 1  ;;  %3017 = vmatprep.mubr.f32.mxu0 %v7373_v50 }
 0x5e4   : > { %4969 = vmatprep.subr.bf16.mxu0 %v9022_v33  ;;  %v2349_v12 = vsel %vm2342_vm4, %v9135_v29, %v9134_v57  ;;  %v2450_v40 = vsel %vm2443_vm5, %v9137_v31, %v9136_v30  ;;  %9138 = vst [vmem:[#allocation51_spill] sm:$0xff] %v7535_v39  ;;  %v4726_v29 = vpop.f32.mrb[34].mxu1  ;;  %v7549_v30 = vrot.slane %v7516_v53, %v6778_v41  ;;  %v8897_v53 = vrot.slane %v7442_v10, 1 }
 0x5e5   : > { %v7539_v51 = vsel %vm2170_vm3, %v2237_v2, %v2349_v12  ;;  %v7543_v57 = vsel %vm2177_vm6, %v2297_v15, %v2450_v40  ;;  %v2642_v2 = vld [vmem:[%s8734_s9 + $0x410] sm:$0xff]  ;;  %v2643_v15 = vld [vmem:[%s8734_s9 + $0x418] sm:$0xff]  ;;  %v7564_v12 = vadd.f32 %v4726_v29, %v6772_v47  ;;  %v2087_v31 = vpop.f32.mrb[35].mxu1  ;;  %v2376_v40 = vsel %vm2342_vm4, %v2339_v27, %v6824_v56 }
 0x5e6   : > { %9139 = vst [vmem:[#allocation30_spill] sm:$0xff] %v7539_v51  ;;  %9140 = vst [vmem:[#allocation32_spill] sm:$0xff] %v7543_v57  ;;  %v9141_v3 = vpack.c.bf16 %v7009_v20, %v7004_v37  ;;  %v2301_v59 = vrot.slane %v7442_v10, %v6800_v46  ;;  %v7577_v57 = vadd.f32 %v6772_v47, %v2087_v31  ;;  %v9142_v56 = vrot.slane %v7442_v10, 7 }
 0x5e7   : > { %v2377_v29 = vsel %vm2170_vm3, %v6859_v14, %v2376_v40  ;;  %v7591_v20 = vsel %vm2342_vm4, %v7552_v32, %v2339_v27  ;;  %v2448_v14 = vsel %vm2443_vm5, %v8897_v53, %v7555_v19  ;;  %v5033_v31 = vpack.c.bf16 %v2643_v15, %v2642_v2  ;;  %3018 = vmatmul.mubr.f32.gmra.mrb[26].mxu0 %v7450_v43  ;;  %v2644_v53 = vld [vmem:[%s8734_s9 + $0x420] sm:$0xff]  ;;  %v2645_v2 = vld [vmem:[%s8734_s9 + $0x428] sm:$0xff] }
 0x5e8   : > { %4971 = vmatpush1.bf16.msra.mxu0 %v9141_v3  ;;  %v2347_v37 = vsel %vm2342_vm4, %v9142_v56, %v7552_v32  ;;  %9143 = vst [vmem:[#allocation48_spill] sm:$0xff] %v7591_v20  ;;  %2728 = vmatmul.mubr.f32.vlgmr.msra.gmra.mrb[36].mxu1 %v2377_v29  ;;  %v7604_v3 = vrot.slane %v7498_v55, 1  ;;  %v7610_v40 = vsel %vm2177_vm6, %v2301_v59, %v2448_v14  ;;  %v9146_v59 = vrot.slane %v7183_v62, 7 }
 0x5e9   : > { %4972 = vmatprep.subr.bf16.mxu0 %v9022_v33  ;;  %v7596_v47 = vsel %vm2170_vm3, %v7549_v30, %v2347_v37  ;;  %2732 = vmatprep.mubr.f32.mxu1 %v6784_v52  ;;  %9145 = vst [vmem:[#allocation35_spill] sm:$0xff] %v7610_v40  ;;  %v2245_v29 = vrot.slane %v7577_v57, %v6778_v41  ;;  %v2441_v37 = vrot.slane %v7577_v57, 1  ;;  %v9147_v15 = vrot.slane %v7337_v28, 7 }
 0x5ea   : > { %9144 = vst [vmem:[#allocation50_spill] sm:$0xff] %v7596_v47  ;;  %3022 = vmatprep.mubr.f32.mxu0 %v7535_v39  ;;  %v2326_v56 = vrot.slane %v7207_v36, 7  ;;  %v9148_v43 = vpack.c.bf16 %v7035_v48, %v7030_v17  ;;  %v2305_v40 = vrot.slane %v7498_v55, %v6800_v46  ;;  %v2442_v20 = vrot.slane %v7564_v12, 1  ;;  %5032 = vmatpush3.bf16.msra.mxu1 %v7204_v18  ;;  %v2646_v18 = vld [vmem:[%s8734_s9 + $0x430] sm:$0xff] }
 0x5eb   : > { %v7629_v14 = vsel %vm2342_vm4, %v9147_v15, %v9146_v59  ;;  %v9149_v39 = vrot.slane %v7337_v28, 1  ;;  %v9150_v50 = vrot.slane %v7218_v5, 1  ;;  %v9151_v59 = vrot.slane %v7577_v57, 7  ;;  %5034 = vmatprep.subr.bf16.mxu1 %v5033_v31  ;;  %3023 = vmatmul.mubr.f32.gmra.mrb[28].mxu0 %v7507_v54 }
 0x5ec   : > { %4974 = vmatpush1.bf16.msra.mxu0 %v9148_v43  ;;  %v2447_v43 = vsel %vm2443_vm5, %v7604_v3, %v2441_v37  ;;  %2733 = vmatmul.mubr.f32.gmra.mrb[38].mxu1 %v7020_v26  ;;  %v2217_v15 = vrot.slane %v7207_v36, %v6778_v41 }
 0x5ed   : > { %v2462_v47 = vsel %vm2443_vm5, %v9150_v50, %v9149_v39  ;;  %4975 = vmatprep.subr.bf16.mxu0 %v9022_v33  ;;  %v2346_v17 = vsel %vm2342_vm4, %v2339_v27, %v9151_v59  ;;  %v7661_v50 = vsel %vm2177_vm6, %v2305_v40, %v2447_v43  ;;  %v5037_v27 = vpack.c.bf16 %v2645_v2, %v2644_v53 }
 0x5ee   : > { %v7657_v39 = vsel %vm2170_vm3, %v2245_v29, %v2346_v17  ;;  %2737 = vmatprep.mubr.f32.mxu1 %v6775_v45  ;;  %v2647_v29 = vld [vmem:[%s8734_s9 + $0x438] sm:$0xff]  ;;  %v7675_v59 = vsel %vm2443_vm5, %v2441_v37, %v2442_v20  ;;  %v2309_v53 = vrot.slane %v7564_v12, %v6800_v46  ;;  %3027 = vmatprep.mubr.f32.mxu0 %v7629_v14  ;;  %v9154_v2 = vrot.slane %v7183_v62, 7 }
 0x5ef   : > { %9152 = vst [vmem:[#allocation38_spill] sm:$0xff] %v7657_v39  ;;  %9153 = vst [vmem:[#allocation52_spill] sm:$0xff] %v7675_v59  ;;  %v9155_v17 = vpack.c.bf16 %v7067_v9, %v7052_v58  ;;  %v2445_v43 = vsel %vm2443_vm5, %v2442_v20, %v7555_v19  ;;  %v9156_v37 = vld [vmem:[#allocation13_spill] sm:$0xff]  ;;  %5036 = vmatpush3.bf16.msra.mxu1 %v5033_v31  ;;  %v9159_v9 = vrot.slane %v7564_v12, 7 }
 0x5f0   : > { %v2359_v41 = vsel %vm2342_vm4, %v9154_v2, %v2326_v56  ;;  %v2477_v48 = vsel %vm2443_vm5, %v7604_v3, %v9156_v37  ;;  %v7697_v59 = vsel %vm2177_vm6, %v2309_v53, %v2445_v43  ;;  %v9160_v2 = vld [vmem:[#allocation19_spill] sm:$0xff]  ;;  %5038 = vmatprep.subr.bf16.mxu1 %v5037_v27  ;;  %v5041_v53 = vpack.c.bf16 %v2647_v29, %v2646_v18 }
 0x5f1   : > { %4977 = vmatpush1.bf16.msra.mxu0 %v9155_v17  ;;  %9157 = vst [vmem:[#allocation41_spill] sm:$0xff] %v7697_v59  ;;  %v7701_v58 = vsel %vm2177_vm6, %v2305_v40, %v2477_v48  ;;  %v2344_v20 = vsel %vm2342_vm4, %v9159_v9, %v7552_v32  ;;  %2738 = vmatmul.mubr.f32.gmra.mrb[40].mxu1 %v9160_v2  ;;  %v9163_v48 = vld [vmem:[#allocation10_spill] sm:$0xff]  ;;  %v9168_v29 = vld [vmem:[#allocation23_spill] sm:$0xff]  ;;  %v2650_v2 = vld [vmem:[%s8734_s9 + $0x450] sm:$0xff] }
 0x5f2   : > { %4978 = vmatprep.subr.bf16.mxu0 %v9022_v33  ;;  %9158 = vst [vmem:[#allocation58_spill] sm:$0xff] %v7701_v58  ;;  %v9161_v17 = vrot.slane %v7218_v5, %v6800_v46  ;;  %v7719_v40 = vsel %vm2170_vm3, %v7549_v30, %v2344_v20  ;;  %2742 = vmatprep.mubr.f32.mxu1 %v9163_v48  ;;  %v2649_v46 = vld [vmem:[%s8734_s9 + $0x448] sm:$0xff]  ;;  %v9172_v20 = vrot.slane %v7194_v22, 7 }
 0x5f3   : > { %9162 = vst [vmem:[#allocation13_spill] sm:$0xff] %v7719_v40  ;;  %v7725_v32 = vsel %vm2170_vm3, %v2217_v15, %v2359_v41  ;;  %v9165_v30 = vld [vmem:[#allocation3_spill] sm:$0xff]  ;;  %5040 = vmatpush3.bf16.msra.mxu1 %v5037_v27  ;;  %v9169_v15 = vrot.slane %v7183_v62, 1  ;;  %v9170_v41 = vrot.slane %v7337_v28, 1  ;;  %v5045_v37 = vpack.c.bf16 %v2649_v46, %v2648_v11  ;;  %v9173_v11 = vld [vmem:[#allocation21_spill] sm:$0xff] }
 0x5f4   : > { %v7714_v31 = vsel %vm2177_vm6, %v9161_v17, %v2462_v47  ;;  %9164 = vst [vmem:[#allocation19_spill] sm:$0xff] %v7725_v32  ;;  %v9166_v47 = vld [vmem:[#allocation2_spill] sm:$0xff]  ;;  %5042 = vmatprep.subr.bf16.mxu1 %v5041_v53  ;;  %v9171_v9 = vld [vmem:[#allocation15_spill] sm:$0xff]  ;;  %v7753_v27 = vsel %vm2342_vm4, %v2326_v56, %v9172_v20  ;;  %v2651_v17 = vld [vmem:[%s8734_s9 + $0x458] sm:$0xff] }
 0x5f5   : > { %3028 = vmatmul.mubr.f32.gmra.mrb[30].mxu0 %v7714_v31  ;;  %v9167_v18 = vpack.c.bf16 %v9165_v30, %v9166_v47  ;;  %2743 = vmatmul.mubr.f32.gmra.mrb[42].mxu1 %v9168_v29  ;;  %v7745_v43 = vsel %vm2443_vm5, %v9170_v41, %v9169_v15  ;;  %v5049_v46 = vpack.c.bf16 %v2651_v17, %v2650_v2  ;;  %v2652_v56 = vld [vmem:[%s8734_s9 + $0x460] sm:$0xff]  ;;  %v2653_v30 = vld [vmem:[%s8734_s9 + $0x468] sm:$0xff]  ;;  %v9175_v47 = vrot.slane %v7207_v36, 1  ;;  %v2654_v20 = vld [vmem:[%s8734_s9 + $0x470] sm:$0xff] }
 0x5f6   : > { %3032 = vmatprep.mubr.f32.mxu0 %v7725_v32  ;;  %2747 = vmatprep.mubr.f32.mxu1 %v9171_v9  ;;  %v5053_v29 = vpack.c.bf16 %v2653_v30, %v2652_v56  ;;  %v9176_v15 = vrot.slane %v7240_v35, 7  ;;  %v9177_v41 = vrot.slane %v7249_v13, 7  ;;  %v2655_v2 = vld [vmem:[%s8734_s9 + $0x478] sm:$0xff]  ;;  %v9179_v30 = vld [vmem:[#allocation31_spill] sm:$0xff] }
 0x5f7   : > { %4980 = vmatpush1.bf16.msra.mxu0 %v9167_v18  ;;  %5044 = vmatpush3.bf16.msra.mxu1 %v5041_v53  ;;  %v9174_v53 = vrot.slane %v7194_v22, 1  ;;  %v9178_v17 = vld [vmem:[#allocation5_spill] sm:$0xff]  ;;  %v5057_v56 = vpack.c.bf16 %v2655_v2, %v2654_v20  ;;  %v9185_v20 = vrot.slane %v7290_v21, 7  ;;  %v9186_v2 = vrot.slane %v7302_v16, 7  ;;  %v9188_v40 = vld [vmem:[#allocation55_spill] sm:$0xff] }
 0x5f8   : > { %4981 = vmatprep.subr.bf16.mxu0 %v9022_v33  ;;  %5046 = vmatprep.subr.bf16.mxu1 %v5045_v37 }
 0x5f9   : > { %3033 = vmatmul.mubr.f32.gmra.mrb[32].mxu0 %v7745_v43  ;;  %2748 = vmatmul.mubr.f32.gmra.mrb[44].mxu1 %v9173_v11  ;;  %v7779_v18 = vsel %vm2443_vm5, %v9175_v47, %v9174_v53  ;;  %v9180_v53 = vld [vmem:[#allocation54_spill] sm:$0xff]  ;;  %v9181_v47 = vrot.slane %v7240_v35, 1  ;;  %v9204_v11 = vld [vmem:[#allocation45_spill] sm:$0xff] }
 0x5fa   : > { %3037 = vmatprep.mubr.f32.mxu0 %v7753_v27  ;;  %2752 = vmatprep.mubr.f32.mxu1 %v6784_v52  ;;  %v9205_v58 = vrot.slane %v9204_v11, 7 }
 0x5fb   : > { %5048 = vmatpush3.bf16.msra.mxu1 %v5045_v37  ;;  %v7789_v37 = vsel %vm2342_vm4, %v9177_v41, %v9176_v15  ;;  %v9182_v15 = vrot.slane %v7249_v13, 1  ;;  %v9184_v41 = vld [vmem:[#allocation27_spill] sm:$0xff] }
 0x5fc   : > { %5050 = vmatprep.subr.bf16.mxu1 %v5049_v46 }
 0x5fd   : > { %3038 = vmatmul.mubr.f32.gmra.mrb[34].mxu0 %v7281_v1  ;;  %2753 = vmatmul.mubr.f32.gmra.mrb[46].mxu1 %v7020_v26  ;;  %v9200_v26 = vrot.slane %v7350_v42, 1 }
 0x5fe   : > { %3042 = vmatprep.mubr.f32.mxu0 %v7322_v60  ;;  %2757 = vmatprep.mubr.f32.mxu1 %v6880_v38 }
 0x5ff   : > { %5052 = vmatpush3.bf16.msra.mxu1 %v5049_v46  ;;  %v7809_v46 = vsel %vm2443_vm5, %v9182_v15, %v9181_v47  ;;  %v9189_v47 = vld [vmem:[#allocation37_spill] sm:$0xff]  ;;  %v9190_v15 = vrot.slane %v7290_v21, 1 }
 0x600   : > { %5054 = vmatprep.subr.bf16.mxu1 %v5053_v29  ;;  %9183 = vst [vmem:[#allocation10_spill] sm:$0xff] %v7809_v46 }
 0x601   : > { %3043 = vmatmul.mubr.f32.gmra.mrb[36].mxu0 %v7779_v18  ;;  %2758 = vmatmul.mubr.f32.gmra.mrb[48].mxu1 %v9178_v17 }
 0x602   : > { %3047 = vmatprep.mubr.f32.mxu0 %v7789_v37  ;;  %2762 = vmatprep.mubr.f32.mxu1 %v9179_v30 }
 0x603   : > { %5056 = vmatpush3.bf16.msra.mxu1 %v5053_v29  ;;  %v7819_v29 = vsel %vm2342_vm4, %v9186_v2, %v9185_v20  ;;  %v9193_v2 = vld [vmem:[#allocation34_spill] sm:$0xff] }
 0x604   : > { %5058 = vmatprep.subr.bf16.mxu1 %v5057_v56  ;;  %9187 = vst [vmem:[#allocation3_spill] sm:$0xff] %v7819_v29 }
 0x605   : > { %3048 = vmatmul.mubr.f32.gmra.mrb[38].mxu0 %v7327_v25  ;;  %2763 = vmatmul.mubr.f32.gmra.mrb[50].mxu1 %v9180_v53  ;;  %v9191_v53 = vrot.slane %v7302_v16, 1 }
 0x606   : > { %3052 = vmatprep.mubr.f32.mxu0 %v7377_v7  ;;  %2767 = vmatprep.mubr.f32.mxu1 %v9184_v41 }
 0x607   : > { %5060 = vmatpush3.bf16.msra.mxu1 %v5057_v56  ;;  %v7833_v20 = vsel %vm2443_vm5, %v9191_v53, %v9190_v15  ;;  %v9194_v56 = vrot.slane %v7340_v23, 7  ;;  %v9198_v53 = vld [vmem:[#allocation11_spill] sm:$0xff]  ;;  %v9199_v15 = vrot.slane %v7340_v23, 1 }
 0x608   : > { %9192 = vst [vmem:[#allocation2_spill] sm:$0xff] %v7833_v20 }
 0x609   : > { %3053 = vmatmul.mubr.f32.gmra.mrb[40].mxu0 %v7809_v46  ;;  %2768 = vmatmul.mubr.f32.gmra.mrb[52].mxu1 %v9188_v40  ;;  %v9195_v40 = vrot.slane %v7350_v42, 7 }
 0x60a   : > { %3057 = vmatprep.mubr.f32.mxu0 %v7819_v29  ;;  %2772 = vmatprep.mubr.f32.mxu1 %v9189_v47 }
 0x60b   : > { %v7843_v17 = vsel %vm2342_vm4, %v9195_v40, %v9194_v56  ;;  %v7857_v40 = vsel %vm2443_vm5, %v9200_v26, %v9199_v15  ;;  %v9202_v56 = vld [vmem:[#allocation6_spill] sm:$0xff]  ;;  %v9209_v26 = vld [vmem:[#allocation40_spill] sm:$0xff]  ;;  %v9210_v15 = vrot.slane %v7391_v63, 1 }
 0x60c   : > { %9196 = vst [vmem:[#allocation23_spill] sm:$0xff] %v7843_v17  ;;  %9201 = vst [vmem:[#allocation15_spill] sm:$0xff] %v7857_v40 }
 0x60d   : > { %3058 = vmatmul.mubr.f32.gmra.mrb[42].mxu0 %v7382_v8  ;;  %2773 = vmatmul.mubr.f32.gmra.mrb[54].mxu1 %v7145_v6  ;;  %v9197_v6 = vld [vmem:[#allocation49_spill] sm:$0xff]  ;;  %v9219_v8 = vld [vmem:[#allocation36_spill] sm:$0xff] }
 0x60e   : > { %3062 = vmatprep.mubr.f32.mxu0 %v7428_v49  ;;  %2777 = vmatprep.mubr.f32.mxu1 %v9193_v2 }
 0x611   : > { %3063 = vmatmul.mubr.f32.gmra.mrb[44].mxu0 %v7833_v20  ;;  %2778 = vmatmul.mubr.f32.gmra.mrb[56].mxu1 %v7199_v34  ;;  %v9203_v34 = vrot.slane %v7391_v63, 7 }
 0x612   : > { %3067 = vmatprep.mubr.f32.mxu0 %v7843_v17  ;;  %2782 = vmatprep.mubr.f32.mxu1 %v9197_v6 }
 0x613   : > { %v7867_v59 = vsel %vm2342_vm4, %v9205_v58, %v9203_v34  ;;  %v9213_v58 = vrot.slane %v7442_v10, 7 }
 0x614   : > { %9206 = vst [vmem:[#allocation31_spill] sm:$0xff] %v7867_v59 }
 0x615   : > { %3068 = vmatmul.mubr.f32.gmra.mrb[46].mxu0 %v7433_v44  ;;  %2783 = vmatmul.mubr.f32.gmra.mrb[58].mxu1 %v9198_v53  ;;  %v9207_v53 = vld [vmem:[#allocation18_spill] sm:$0xff]  ;;  %v9208_v44 = vld [vmem:[#allocation56_spill] sm:$0xff] }
 0x616   : > { %3072 = vmatprep.mubr.f32.mxu0 %v7484_v24  ;;  %2787 = vmatprep.mubr.f32.mxu1 %v9202_v56 }
 0x619   : > { %3073 = vmatmul.mubr.f32.gmra.mrb[48].mxu0 %v7857_v40  ;;  %2788 = vmatmul.mubr.f32.gmra.mrb[60].mxu1 %v9207_v53  ;;  %v9211_v40 = vrot.slane %v9204_v11, 1  ;;  %v9214_v53 = vld [vmem:[#allocation26_spill] sm:$0xff] }
 0x61a   : > { %3077 = vmatprep.mubr.f32.mxu0 %v7867_v59  ;;  %2792 = vmatprep.mubr.f32.mxu1 %v9208_v44  ;;  %v9221_v46 = vrot.slane %v9214_v53, 1 }
 0x61b   : > { %v7881_v34 = vsel %vm2443_vm5, %v9211_v40, %v9210_v15  ;;  %v9217_v40 = vld [vmem:[#allocation32_spill] sm:$0xff]  ;;  %v9218_v15 = vld [vmem:[#allocation50_spill] sm:$0xff] }
 0x61c   : > { %9212 = vst [vmem:[#allocation27_spill] sm:$0xff] %v7881_v34 }
 0x61d   : > { %3078 = vmatmul.mubr.f32.gmra.mrb[50].mxu0 %v7489_v61  ;;  %2793 = vmatmul.mubr.f32.gmra.mrb[62].mxu1 %v9209_v26  ;;  %v9215_v61 = vrot.slane %v9214_v53, 7  ;;  %v9216_v26 = vld [vmem:[#allocation24_spill] sm:$0xff] }
 0x61e   : > { %3082 = vmatprep.mubr.f32.mxu0 %v7539_v51  ;;  %2797 = vmatprep.mubr.f32.mxu1 %v7237_v0 }
 0x61f   : > { %v7891_v20 = vsel %vm2342_vm4, %v9215_v61, %v9213_v58  ;;  %v9222_v58 = vld [vmem:[#allocation48_spill] sm:$0xff] }
 0x621   : > { %3083 = vmatmul.mubr.f32.gmra.mrb[52].mxu0 %v7881_v34  ;;  %2798 = vmatmul.mubr.f32.gmra.mrb[64].mxu1 %v9216_v26  ;;  %v9220_v34 = vrot.slane %v7442_v10, 1  ;;  %v9223_v26 = vld [vmem:[#allocation51_spill] sm:$0xff] }
 0x622   : > { %3087 = vmatprep.mubr.f32.mxu0 %v7891_v20  ;;  %2802 = vmatprep.mubr.f32.mxu1 %v7218_v5 }
 0x623   : > { %v7905_v61 = vsel %vm2443_vm5, %v9221_v46, %v9220_v34  ;;  %v7919_v46 = vsel %vm2443_vm5, %v7555_v19, %v7604_v3  ;;  %v9225_v34 = vrot.slane %v7564_v12, 7  ;;  %v2609_v19 = vld [vmem:[%s8734_s9 + $0x308] sm:$0xff]  ;;  %v9228_v3 = vld [vmem:[#allocation25_spill] sm:$0xff] }
 0x625   : > { %3088 = vmatmul.mubr.f32.gmra.mrb[54].mxu0 %v9217_v40  ;;  %2803 = vmatmul.mubr.f32.gmra.mrb[66].mxu1 %v9219_v8  ;;  %v9224_v40 = vld [vmem:[#allocation35_spill] sm:$0xff] }
 0x626   : > { %3092 = vmatprep.mubr.f32.mxu0 %v9218_v15  ;;  %2807 = vmatprep.mubr.f32.mxu1 %v7337_v28 }
 0x629   : > { %3093 = vmatmul.mubr.f32.gmra.mrb[56].mxu0 %v7905_v61  ;;  %2808 = vmatmul.mubr.f32.gmra.mrb[68].mxu1 %v9223_v26  ;;  %v9226_v26 = vrot.slane %v7577_v57, 7 }
 0x62a   : > { %3097 = vmatprep.mubr.f32.mxu0 %v9222_v58  ;;  %2812 = vmatprep.mubr.f32.mxu1 %v7183_v62 }
 0x62b   : > { %v7929_v8 = vsel %vm2342_vm4, %v9226_v26, %v9225_v34  ;;  %v2610_v26 = vld [vmem:[%s8734_s9 + $0x310] sm:$0xff]  ;;  %v2611_v34 = vld [vmem:[%s8734_s9 + $0x318] sm:$0xff] }
 0x62c   : > { %9227 = vst [vmem:[#allocation37_spill] sm:$0xff] %v7929_v8 }
 0x62d   : > { %3098 = vmatmul.mubr.f32.gmra.mrb[58].mxu0 %v9224_v40  ;;  %2813 = vmatmul.mubr.f32.gmra.mrb[70].mxu1 %v7629_v14 }
 0x62e   : > { %3102 = vmatprep.mubr.f32.mxu0 %v7657_v39  ;;  %2817 = vmatprep.mubr.f32.mxu1 %v7207_v36  ;;  %v2608_v39 = vld [vmem:[%s8734_s9 + $0x300] sm:$0xff] }
 0x62f   : > { %v4982_v4 = vpack.c.bf16 %v2609_v19, %v2608_v39  ;;  %v2612_v39 = vld [vmem:[%s8734_s9 + $0x320] sm:$0xff]  ;;  %v2613_v19 = vld [vmem:[%s8734_s9 + $0x328] sm:$0xff] }
 0x631   : > { %3103 = vmatmul.mubr.f32.gmra.mrb[60].mxu0 %v7919_v46  ;;  %2818 = vmatmul.mubr.f32.gmra.mrb[72].mxu1 %v7725_v32  ;;  %v4985_v32 = vpack.c.bf16 %v2611_v34, %v2610_v26  ;;  %v2616_v26 = vld [vmem:[%s8734_s9 + $0x340] sm:$0xff]  ;;  %v2617_v34 = vld [vmem:[%s8734_s9 + $0x348] sm:$0xff] }
 0x632   : > { %3107 = vmatprep.mubr.f32.mxu0 %v7929_v8  ;;  %2822 = vmatprep.mubr.f32.mxu1 %v7194_v22  ;;  %v9229_v8 = vld [vmem:[#allocation4_spill] sm:$0xff] }
 0x635   : > { %3108 = vmatmul.mubr.f32.gmra.mrb[62].mxu0 %v7661_v50  ;;  %2823 = vmatmul.mubr.f32.gmra.mrb[74].mxu1 %v7753_v27 }
 0x636   : > { %3177 = vmatprep.mubr.f32.mxu0 %v9228_v3  ;;  %2827 = vmatprep.mubr.f32.mxu1 %v7249_v13  ;;  %v2614_v3 = vld [vmem:[%s8734_s9 + $0x330] sm:$0xff] }
 0x639   : > { %3178 = vmatmul.mubr.f32.vlgmr.msra.gmra.mrb[0].mxu0 %v6775_v45  ;;  %2828 = vmatmul.mubr.f32.gmra.mrb[76].mxu1 %v7322_v60  ;;  %v9230_v45 = vld [vmem:[#allocation17_spill] sm:$0xff] }
 0x63a   : > { %4983 = vmatpush1.bf16.msra.mxu0 %v4982_v4  ;;  %3182 = vmatprep.mubr.f32.mxu0 %v9229_v8  ;;  %v4988_v8 = vpack.c.bf16 %v2613_v19, %v2612_v39  ;;  %v2615_v4 = vld [vmem:[%s8734_s9 + $0x338] sm:$0xff]  ;;  %v9232_v39 = vld [vmem:[#allocation8_spill] sm:$0xff]  ;;  %v4994_v19 = vpack.c.bf16 %v2617_v34, %v2616_v26  ;;  %v2620_v26 = vld [vmem:[%s8734_s9 + $0x360] sm:$0xff] }
 0x63b   : > { %4984 = vmatprep.subr.bf16.mxu0 %v9022_v33  ;;  %2832 = vmatprep.mubr.f32.mxu1 %v7240_v35  ;;  %v2621_v34 = vld [vmem:[%s8734_s9 + $0x368] sm:$0xff] }
 0x63d   : > { %3183 = vmatmul.mubr.f32.gmra.mrb[2].mxu0 %v9163_v48  ;;  %2833 = vmatmul.mubr.f32.gmra.mrb[78].mxu1 %v7789_v37  ;;  %v9231_v48 = vld [vmem:[#allocation7_spill] sm:$0xff] }
 0x63e   : > { %3187 = vmatprep.mubr.f32.mxu0 %v9230_v45  ;;  %4986 = vmatpush1.bf16.msra.mxu0 %v4985_v32  ;;  %v4991_v32 = vpack.c.bf16 %v2615_v4, %v2614_v3  ;;  %v2619_v3 = vld [vmem:[%s8734_s9 + $0x358] sm:$0xff] }
 0x63f   : > { %4987 = vmatprep.subr.bf16.mxu0 %v9022_v33  ;;  %2837 = vmatprep.mubr.f32.mxu1 %v7302_v16  ;;  %v9233_v4 = vld [vmem:[#allocation57_spill] sm:$0xff] }
 0x641   : > { %3188 = vmatmul.mubr.f32.gmra.mrb[4].mxu0 %v9171_v9  ;;  %2838 = vmatmul.mubr.f32.gmra.mrb[80].mxu1 %v7377_v7  ;;  %v9240_v7 = vld [vmem:[#allocation47_spill] sm:$0xff] }
 0x642   : > { %3192 = vmatprep.mubr.f32.mxu0 %v9231_v48  ;;  %4989 = vmatpush1.bf16.msra.mxu0 %v4988_v8  ;;  %v2618_v8 = vld [vmem:[%s8734_s9 + $0x350] sm:$0xff] }
 0x643   : > { %4990 = vmatprep.subr.bf16.mxu0 %v9022_v33  ;;  %2842 = vmatprep.mubr.f32.mxu1 %v7290_v21 }
 0x645   : > { %3193 = vmatmul.mubr.f32.gmra.mrb[6].mxu0 %v6784_v52  ;;  %2843 = vmatmul.mubr.f32.gmra.mrb[82].mxu1 %v7819_v29  ;;  %v9234_v29 = vld [vmem:[#allocation9_spill] sm:$0xff] }
 0x646   : > { %3197 = vmatprep.mubr.f32.mxu0 %v9232_v39  ;;  %4992 = vmatpush1.bf16.msra.mxu0 %v4991_v32  ;;  %v4997_v32 = vpack.c.bf16 %v2619_v3, %v2618_v8  ;;  %v2622_v8 = vld [vmem:[%s8734_s9 + $0x370] sm:$0xff]  ;;  %v2623_v3 = vld [vmem:[%s8734_s9 + $0x378] sm:$0xff] }
 0x647   : > { %4993 = vmatprep.subr.bf16.mxu0 %v9022_v33  ;;  %2847 = vmatprep.mubr.f32.mxu1 %v7350_v42 }
 0x649   : > { %3198 = vmatmul.mubr.f32.gmra.mrb[8].mxu0 %v6880_v38  ;;  %2848 = vmatmul.mubr.f32.gmra.mrb[84].mxu1 %v7428_v49  ;;  %v9235_v49 = vld [vmem:[#allocation14_spill] sm:$0xff] }
 0x64a   : > { %3202 = vmatprep.mubr.f32.mxu0 %v9233_v4  ;;  %4995 = vmatpush1.bf16.msra.mxu0 %v4994_v19  ;;  %v5000_v19 = vpack.c.bf16 %v2621_v34, %v2620_v26  ;;  %v2624_v26 = vld [vmem:[%s8734_s9 + $0x380] sm:$0xff]  ;;  %v2625_v34 = vld [vmem:[%s8734_s9 + $0x388] sm:$0xff] }
 0x64b   : > { %4996 = vmatprep.subr.bf16.mxu0 %v9022_v33  ;;  %2852 = vmatprep.mubr.f32.mxu1 %v7340_v23 }
 0x64d   : > { %3203 = vmatmul.mubr.f32.gmra.mrb[10].mxu0 %v9179_v30  ;;  %2853 = vmatmul.mubr.f32.gmra.mrb[86].mxu1 %v7843_v17  ;;  %v9236_v17 = vld [vmem:[#allocation16_spill] sm:$0xff] }
 0x64e   : > { %3207 = vmatprep.mubr.f32.mxu0 %v9234_v29  ;;  %4998 = vmatpush1.bf16.msra.mxu0 %v4997_v32  ;;  %v5003_v32 = vpack.c.bf16 %v2623_v3, %v2622_v8  ;;  %v2626_v8 = vld [vmem:[%s8734_s9 + $0x390] sm:$0xff]  ;;  %v2627_v3 = vld [vmem:[%s8734_s9 + $0x398] sm:$0xff] }
 0x64f   : > { %4999 = vmatprep.subr.bf16.mxu0 %v9022_v33  ;;  %2857 = vmatprep.mubr.f32.mxu1 %v9204_v11 }
 0x651   : > { %3208 = vmatmul.mubr.f32.gmra.mrb[12].mxu0 %v9184_v41  ;;  %2858 = vmatmul.mubr.f32.gmra.mrb[88].mxu1 %v7484_v24  ;;  %v9237_v24 = vld [vmem:[#allocation20_spill] sm:$0xff] }
 0x652   : > { %3212 = vmatprep.mubr.f32.mxu0 %v9235_v49  ;;  %5001 = vmatpush1.bf16.msra.mxu0 %v5000_v19  ;;  %v5006_v19 = vpack.c.bf16 %v2625_v34, %v2624_v26  ;;  %v2628_v26 = vld [vmem:[%s8734_s9 + $0x3a0] sm:$0xff]  ;;  %v2629_v34 = vld [vmem:[%s8734_s9 + $0x3a8] sm:$0xff] }
 0x653   : > { %5002 = vmatprep.subr.bf16.mxu0 %v9022_v33  ;;  %2862 = vmatprep.mubr.f32.mxu1 %v7391_v63 }
 0x655   : > { %3213 = vmatmul.mubr.f32.gmra.mrb[14].mxu0 %v9189_v47  ;;  %2863 = vmatmul.mubr.f32.gmra.mrb[90].mxu1 %v7867_v59  ;;  %v9238_v59 = vld [vmem:[#allocation33_spill] sm:$0xff] }
 0x656   : > { %3217 = vmatprep.mubr.f32.mxu0 %v9236_v17  ;;  %5004 = vmatpush1.bf16.msra.mxu0 %v5003_v32  ;;  %v5009_v32 = vpack.c.bf16 %v2627_v3, %v2626_v8  ;;  %v2630_v8 = vld [vmem:[%s8734_s9 + $0x3b0] sm:$0xff]  ;;  %v2631_v3 = vld [vmem:[%s8734_s9 + $0x3b8] sm:$0xff] }
 0x657   : > { %5005 = vmatprep.subr.bf16.mxu0 %v9022_v33  ;;  %2867 = vmatprep.mubr.f32.mxu1 %v9214_v53 }
 0x659   : > { %3218 = vmatmul.mubr.f32.gmra.mrb[16].mxu0 %v9193_v2  ;;  %2868 = vmatmul.mubr.f32.gmra.mrb[92].mxu1 %v7539_v51  ;;  %v9239_v51 = vld [vmem:[#allocation46_spill] sm:$0xff] }
 0x65a   : > { %3222 = vmatprep.mubr.f32.mxu0 %v9237_v24  ;;  %5007 = vmatpush1.bf16.msra.mxu0 %v5006_v19  ;;  %v5012_v19 = vpack.c.bf16 %v2629_v34, %v2628_v26  ;;  %v2632_v26 = vld [vmem:[%s8734_s9 + $0x3c0] sm:$0xff]  ;;  %v2633_v34 = vld [vmem:[%s8734_s9 + $0x3c8] sm:$0xff] }
 0x65b   : > { %5008 = vmatprep.subr.bf16.mxu0 %v9022_v33  ;;  %2872 = vmatprep.mubr.f32.mxu1 %v7442_v10 }
 0x65d   : > { %3223 = vmatmul.mubr.f32.gmra.mrb[18].mxu0 %v9197_v6  ;;  %2873 = vmatmul.mubr.f32.gmra.mrb[94].mxu1 %v7891_v20 }
 0x65e   : > { %3227 = vmatprep.mubr.f32.mxu0 %v9238_v59  ;;  %5010 = vmatpush1.bf16.msra.mxu0 %v5009_v32  ;;  %v5015_v32 = vpack.c.bf16 %v2631_v3, %v2630_v8  ;;  %v2634_v8 = vld [vmem:[%s8734_s9 + $0x3d0] sm:$0xff]  ;;  %v2635_v3 = vld [vmem:[%s8734_s9 + $0x3d8] sm:$0xff] }
 0x65f   : > { %5011 = vmatprep.subr.bf16.mxu0 %v9022_v33  ;;  %2877 = vmatprep.mubr.f32.mxu1 %v9239_v51 }
 0x661   : > { %3228 = vmatmul.mubr.f32.gmra.mrb[20].mxu0 %v9202_v56  ;;  %2878 = vmatmul.mubr.f32.gmra.mrb[96].mxu1 %v9218_v15 }
 0x662   : > { %3232 = vmatprep.mubr.f32.mxu0 %v9240_v7  ;;  %5013 = vmatpush1.bf16.msra.mxu0 %v5012_v19  ;;  %v5018_v19 = vpack.c.bf16 %v2633_v34, %v2632_v26  ;;  %v2636_v26 = vld [vmem:[%s8734_s9 + $0x3e0] sm:$0xff]  ;;  %v2637_v34 = vld [vmem:[%s8734_s9 + $0x3e8] sm:$0xff] }
 0x663   : > { %5014 = vmatprep.subr.bf16.mxu0 %v9022_v33  ;;  %2882 = vmatprep.mubr.f32.mxu1 %v7498_v55 }
 0x665   : > { %3233 = vmatmul.mubr.f32.gmra.mrb[22].mxu0 %v9208_v44  ;;  %2883 = vmatmul.mubr.f32.gmra.mrb[98].mxu1 %v9222_v58 }
 0x666   : > { %3237 = vmatprep.mubr.f32.mxu0 %v7507_v54  ;;  %5016 = vmatpush1.bf16.msra.mxu0 %v5015_v32  ;;  %v5021_v32 = vpack.c.bf16 %v2635_v3, %v2634_v8  ;;  %v2639_v8 = vld [vmem:[%s8734_s9 + $0x3f8] sm:$0xff]  ;;  %v9256_v3 = vld [vmem:[#allocation55_spill] sm:$0xff] }
 0x667   : > { %5017 = vmatprep.subr.bf16.mxu0 %v9022_v33  ;;  %4759 = vmatprep.mubr.f32.mxu1 %v9230_v45  ;;  %v5024_v45 = vpack.c.bf16 %v2637_v34, %v2636_v26  ;;  %v9257_v26 = vld [vmem:[#allocation53_spill] sm:$0xff] }
 0x669   : > { %3238 = vmatmul.mubr.f32.gmra.mrb[24].mxu0 %v7237_v0  ;;  %4760 = vmatmul.mubr.f32.vlgmr.msra.gmra.mrb[100].mxu1 %v9231_v48 }
 0x66a   : > { %3242 = vmatprep.mubr.f32.mxu0 %v7714_v31  ;;  %5019 = vmatpush1.bf16.msra.mxu0 %v5018_v19  ;;  %v2638_v19 = vld [vmem:[%s8734_s9 + $0x3f0] sm:$0xff] }
 0x66b   : > { %5020 = vmatprep.subr.bf16.mxu0 %v9022_v33  ;;  %4762 = vmatprep.mubr.f32.mxu1 %v9232_v39  ;;  %v5027_v48 = vpack.c.bf16 %v2639_v8, %v2638_v19  ;;  %v9259_v8 = vld [vmem:[#allocation11_spill] sm:$0xff] }
 0x66d   : > { %3243 = vmatmul.mubr.f32.gmra.mrb[26].mxu0 %v7218_v5  ;;  %4763 = vmatmul.mubr.f32.gmra.mrb[102].mxu1 %v9233_v4  ;;  %v9255_v4 = vld [vmem:[#allocation54_spill] sm:$0xff] }
 0x66e   : > { %3247 = vmatprep.mubr.f32.mxu0 %v7745_v43  ;;  %5022 = vmatpush1.bf16.msra.mxu0 %v5021_v32 }
 0x66f   : > { %5023 = vmatprep.subr.bf16.mxu0 %v9022_v33  ;;  %4765 = vmatprep.mubr.f32.mxu1 %v9234_v29  ;;  %v9253_v29 = vld [vmem:[#allocation29_spill] sm:$0xff] }
 0x671   : > { %3248 = vmatmul.mubr.f32.gmra.mrb[28].mxu0 %v7337_v28  ;;  %4766 = vmatmul.mubr.f32.gmra.mrb[104].mxu1 %v9235_v49  ;;  %v9244_v49 = vld [vmem:[#allocation42_spill] sm:$0xff] }
 0x672   : > { %3252 = vmatprep.mubr.f32.mxu0 %v7281_v1  ;;  %5025 = vmatpush1.bf16.msra.mxu0 %v5024_v45  ;;  %v9258_v45 = vld [vmem:[#allocation12_spill] sm:$0xff] }
 0x673   : > { %5026 = vmatprep.subr.bf16.mxu0 %v9022_v33  ;;  %4768 = vmatprep.mubr.f32.mxu1 %v9236_v17  ;;  %v9241_v33 = vld [vmem:[#allocation10_spill] sm:$0xff]  ;;  %v9252_v17 = vld [vmem:[#allocation21_spill] sm:$0xff] }
 0x675   : > { %3253 = vmatmul.mubr.f32.gmra.mrb[30].mxu0 %v7183_v62  ;;  %4769 = vmatmul.mubr.f32.gmra.mrb[106].mxu1 %v9237_v24  ;;  %v9242_v24 = vld [vmem:[#allocation22_spill] sm:$0xff] }
 0x676   : > { %3257 = vmatprep.mubr.f32.mxu0 %v7779_v18  ;;  %5028 = vmatpush1.bf16.msra.mxu0 %v5027_v48 }
 0x677   : > { %4771 = vmatprep.mubr.f32.mxu1 %v9238_v59  ;;  %v9248_v59 = vld [vmem:[#allocation32_spill] sm:$0xff] }
 0x679   : > { %3258 = vmatmul.mubr.f32.gmra.mrb[32].mxu0 %v7207_v36  ;;  %4772 = vmatmul.mubr.f32.gmra.mrb[108].mxu1 %v9240_v7  ;;  %v9243_v7 = vld [vmem:[#allocation2_spill] sm:$0xff] }
 0x67a   : > { %3262 = vmatprep.mubr.f32.mxu0 %v7327_v25  ;;  %4774 = vmatprep.mubr.f32.mxu1 %v7507_v54  ;;  %v9247_v54 = vld [vmem:[#allocation27_spill] sm:$0xff] }
 0x67d   : > { %3263 = vmatmul.mubr.f32.gmra.mrb[34].mxu0 %v7194_v22  ;;  %4775 = vmatmul.mubr.f32.gmra.mrb[110].mxu1 %v7714_v31  ;;  %v9249_v31 = vld [vmem:[#allocation52_spill] sm:$0xff] }
 0x67e   : > { %3267 = vmatprep.mubr.f32.mxu0 %v9241_v33  ;;  %4777 = vmatprep.mubr.f32.mxu1 %v7745_v43  ;;  %v9250_v43 = vld [vmem:[#allocation41_spill] sm:$0xff] }
 0x681   : > { %3268 = vmatmul.mubr.f32.gmra.mrb[36].mxu0 %v7249_v13  ;;  %4778 = vmatmul.mubr.f32.gmra.mrb[112].mxu1 %v7281_v1  ;;  %v9245_v1 = vld [vmem:[#allocation15_spill] sm:$0xff] }
 0x682   : > { %3272 = vmatprep.mubr.f32.mxu0 %v9242_v24  ;;  %4780 = vmatprep.mubr.f32.mxu1 %v7779_v18  ;;  %v9251_v18 = vld [vmem:[#allocation58_spill] sm:$0xff] }
 0x685   : > { %3273 = vmatmul.mubr.f32.gmra.mrb[38].mxu0 %v7240_v35  ;;  %4781 = vmatmul.mubr.f32.gmra.mrb[114].mxu1 %v7327_v25  ;;  %v9246_v25 = vld [vmem:[#allocation44_spill] sm:$0xff] }
 0x686   : > { %3277 = vmatprep.mubr.f32.mxu0 %v9243_v7  ;;  %4783 = vmatprep.mubr.f32.mxu1 %v9241_v33  ;;  %v9260_v33 = vld [vmem:[#allocation18_spill] sm:$0xff] }
 0x689   : > { %3278 = vmatmul.mubr.f32.gmra.mrb[40].mxu0 %v7302_v16  ;;  %4784 = vmatmul.mubr.f32.gmra.mrb[116].mxu1 %v9242_v24 }
 0x68a   : > { %3282 = vmatprep.mubr.f32.mxu0 %v9244_v49  ;;  %4786 = vmatprep.mubr.f32.mxu1 %v9243_v7  ;;  %v9261_v7 = vld [vmem:[#allocation40_spill] sm:$0xff] }
 0x68d   : > { %3283 = vmatmul.mubr.f32.gmra.mrb[42].mxu0 %v7290_v21  ;;  %4787 = vmatmul.mubr.f32.gmra.mrb[118].mxu1 %v9244_v49 }
 0x68e   : > { %3287 = vmatprep.mubr.f32.mxu0 %v9245_v1  ;;  %4789 = vmatprep.mubr.f32.mxu1 %v9245_v1  ;;  %v9262_v1 = vld [vmem:[#allocation24_spill] sm:$0xff] }
 0x691   : > { %3288 = vmatmul.mubr.f32.gmra.mrb[44].mxu0 %v7350_v42  ;;  %4790 = vmatmul.mubr.f32.gmra.mrb[120].mxu1 %v9246_v25 }
 0x692   : > { %3292 = vmatprep.mubr.f32.mxu0 %v9246_v25  ;;  %4792 = vmatprep.mubr.f32.mxu1 %v9247_v54 }
 0x695   : > { %3293 = vmatmul.mubr.f32.gmra.mrb[46].mxu0 %v7340_v23  ;;  %4793 = vmatmul.mubr.f32.gmra.mrb[122].mxu1 %v9248_v59 }
 0x696   : > { %3297 = vmatprep.mubr.f32.mxu0 %v9247_v54  ;;  %4795 = vmatprep.mubr.f32.mxu1 %v7905_v61  ;;  %v9263_v54 = vld [vmem:[#allocation36_spill] sm:$0xff] }
 0x699   : > { %3298 = vmatmul.mubr.f32.gmra.mrb[48].mxu0 %v9204_v11  ;;  %4796 = vmatmul.mubr.f32.gmra.mrb[124].mxu1 %v9224_v40 }
 0x69a   : > { %3302 = vmatprep.mubr.f32.mxu0 %v9248_v59  ;;  %4798 = vmatprep.mubr.f32.mxu1 %v7919_v46 }
 0x69d   : > { %3303 = vmatmul.mubr.f32.gmra.mrb[50].mxu0 %v7391_v63  ;;  %4799 = vmatmul.mubr.f32.gmra.mrb[126].mxu1 %v7661_v50 }
 0x69e   : > { %3307 = vmatprep.mubr.f32.mxu0 %v7905_v61  ;;  %4801 = vmatprep.mubr.f32.mxu1 %v9249_v31  ;;  %v9254_v61 = vld [vmem:[#allocation5_spill] sm:$0xff] }
 0x6a1   : > { %3308 = vmatmul.mubr.f32.gmra.mrb[52].mxu0 %v9214_v53  ;;  %4802 = vmatmul.mubr.f32.gmra.mrb[128].mxu1 %v9250_v43 }
 0x6a2   : > { %3312 = vmatprep.mubr.f32.mxu0 %v9224_v40  ;;  %4804 = vmatprep.mubr.f32.mxu1 %v7919_v46 }
 0x6a5   : > { %3313 = vmatmul.mubr.f32.gmra.mrb[54].mxu0 %v7442_v10  ;;  %4805 = vmatmul.mubr.f32.gmra.mrb[130].mxu1 %v9251_v18 }
 0x6a6   : > { %3317 = vmatprep.mubr.f32.mxu0 %v7919_v46 }
 0x6a9   : > { %3318 = vmatmul.mubr.f32.gmra.mrb[56].mxu0 %v9239_v51 }
 0x6aa   : > { %3322 = vmatprep.mubr.f32.mxu0 %v7661_v50 }
 0x6ad   : > { %3323 = vmatmul.mubr.f32.gmra.mrb[58].mxu0 %v7498_v55 }
 0x6ae   : > { %3327 = vmatprep.mubr.f32.mxu0 %v9249_v31  ;;  %v9264_v31 = vld [vmem:[#allocation51_spill] sm:$0xff] }
 0x6b1   : > { %3328 = vmatmul.mubr.f32.gmra.mrb[60].mxu0 %v7577_v57 }
 0x6b2   : > { %3332 = vmatprep.mubr.f32.mxu0 %v9250_v43 }
 0x6b5   : > { %3333 = vmatmul.mubr.f32.gmra.mrb[62].mxu0 %v7564_v12 }
 0x6b6   : > { %3402 = vmatprep.mubr.f32.mxu0 %v9171_v9 }
 0x6b9   : > { %3403 = vmatmul.mubr.f32.vlgmr.msra.gmra.mrb[0].mxu0 %v9252_v17  ;;  %v9265_v17 = vld [vmem:[#allocation19_spill] sm:$0xff] }
 0x6ba   : > { %3407 = vmatprep.mubr.f32.mxu0 %v6784_v52 }
 0x6bb   : > { %v8172_v50 = vpop.f32.mrb[36].mxu1 }
 0x6bc   : > { %v2731_v40 = vpop.f32.mrb[37].mxu1 }
 0x6bd   : > { %3408 = vmatmul.mubr.f32.gmra.mrb[2].mxu0 %v9253_v29 }
 0x6be   : > { %3412 = vmatprep.mubr.f32.mxu0 %v6880_v38 }
 0x6bf   : > { %v8176_v46 = vpop.f32.mrb[38].mxu1 }
 0x6c0   : > { %v2736_v39 = vpop.f32.mrb[39].mxu1 }
 0x6c1   : > { %3413 = vmatmul.mubr.f32.gmra.mrb[4].mxu0 %v9254_v61 }
 0x6c2   : > { %3417 = vmatprep.mubr.f32.mxu0 %v9179_v30 }
 0x6c4   : > { %v8180_v9 = vpop.f32.mrb[40].mxu1 }
 0x6c5   : > { %3418 = vmatmul.mubr.f32.gmra.mrb[6].mxu0 %v9255_v4  ;;  %v2741_v52 = vpop.f32.mrb[41].mxu1 }
 0x6c6   : > { %3422 = vmatprep.mubr.f32.mxu0 %v9184_v41 }
 0x6c8   : > { %v8184_v38 = vpop.f32.mrb[42].mxu1 }
 0x6c9   : > { %3423 = vmatmul.mubr.f32.gmra.mrb[8].mxu0 %v9256_v3  ;;  %v2746_v32 = vpop.f32.mrb[43].mxu1  ;;  %v9272_v3 = vld [vmem:[#allocation23_spill] sm:$0xff] }
 0x6ca   : > { %3427 = vmatprep.mubr.f32.mxu0 %v9189_v47 }
 0x6cc   : > { %v8188_v30 = vpop.f32.mrb[44].mxu1 }
 0x6cd   : > { %3428 = vmatmul.mubr.f32.gmra.mrb[10].mxu0 %v9257_v26  ;;  %v2751_v34 = vpop.f32.mrb[45].mxu1  ;;  %v9274_v26 = vld [vmem:[#allocation28_spill] sm:$0xff] }
 0x6ce   : > { %3432 = vmatprep.mubr.f32.mxu0 %v9193_v2 }
 0x6d0   : > { %v8192_v41 = vpop.f32.mrb[46].mxu1 }
 0x6d1   : > { %3433 = vmatmul.mubr.f32.gmra.mrb[12].mxu0 %v9258_v45  ;;  %v2756_v19 = vpop.f32.mrb[47].mxu1  ;;  %v9276_v45 = vld [vmem:[#allocation31_spill] sm:$0xff] }
 0x6d2   : > { %3437 = vmatprep.mubr.f32.mxu0 %v9197_v6 }
 0x6d4   : > { %v8196_v47 = vpop.f32.mrb[48].mxu1 }
 0x6d5   : > { %3438 = vmatmul.mubr.f32.gmra.mrb[14].mxu0 %v9259_v8  ;;  %v2761_v48 = vpop.f32.mrb[49].mxu1  ;;  %v9278_v8 = vld [vmem:[#allocation30_spill] sm:$0xff] }
 0x6d6   : > { %3442 = vmatprep.mubr.f32.mxu0 %v9202_v56 }
 0x6d8   : > { %v8200_v2 = vpop.f32.mrb[50].mxu1 }
 0x6d9   : > { %3443 = vmatmul.mubr.f32.gmra.mrb[16].mxu0 %v9260_v33  ;;  %v2766_v24 = vpop.f32.mrb[51].mxu1 }
 0x6da   : > { %3447 = vmatprep.mubr.f32.mxu0 %v9208_v44 }
 0x6dc   : > { %v8204_v6 = vpop.f32.mrb[52].mxu1 }
 0x6dd   : > { %3448 = vmatmul.mubr.f32.gmra.mrb[18].mxu0 %v9261_v7  ;;  %v2771_v49 = vpop.f32.mrb[53].mxu1 }
 0x6de   : > { %3452 = vmatprep.mubr.f32.mxu0 %v7237_v0  ;;  %v8280_v49 = vpop.permute.xlu0 %3820 }
 0x6e0   : > { %v8208_v56 = vpop.f32.mrb[54].mxu1 }
 0x6e1   : > { %3453 = vmatmul.mubr.f32.gmra.mrb[20].mxu0 %v9262_v1  ;;  %v2776_v25 = vpop.f32.mrb[55].mxu1 }
 0x6e2   : > { %3457 = vmatprep.mubr.f32.mxu0 %v7218_v5  ;;  %v9285_v25 = vld [vmem:[#allocation37_spill] sm:$0xff] }
 0x6e4   : > { %v8212_v44 = vpop.f32.mrb[56].mxu1 }
 0x6e5   : > { %3458 = vmatmul.mubr.f32.gmra.mrb[22].mxu0 %v9263_v54  ;;  %v2781_v59 = vpop.f32.mrb[57].mxu1 }
 0x6e6   : > { %3462 = vmatprep.mubr.f32.mxu0 %v7337_v28  ;;  %v8288_v59 = vpop.permute.xlu1 %3822 }
 0x6e8   : > { %v8216_v0 = vpop.f32.mrb[58].mxu1 }
 0x6e9   : > { %3463 = vmatmul.mubr.f32.gmra.mrb[24].mxu0 %v9264_v31  ;;  %v2786_v43 = vpop.f32.mrb[59].mxu1  ;;  %v8290_v31 = vpop.permute.xlu0 %3824 }
 0x6ea   : > { %3467 = vmatprep.mubr.f32.mxu0 %v7183_v62  ;;  %v9287_v43 = vld [vmem:[#allocation13_spill] sm:$0xff] }
 0x6ec   : > { %v8220_v5 = vpop.f32.mrb[60].mxu1 }
 0x6ed   : > { %3468 = vmatmul.mubr.f32.gmra.mrb[26].mxu0 %v7629_v14  ;;  %v2791_v18 = vpop.f32.mrb[61].mxu1 }
 0x6ee   : > { %3472 = vmatprep.mubr.f32.mxu0 %v7207_v36 }
 0x6f0   : > { %v8224_v28 = vpop.f32.mrb[62].mxu1 }
 0x6f1   : > { %3473 = vmatmul.mubr.f32.gmra.mrb[28].mxu0 %v9265_v17  ;;  %v2796_v29 = vpop.f32.mrb[63].mxu1  ;;  %v8297_v17 = vpop.permute.xlu1 %3826 }
 0x6f2   : > { %3477 = vmatprep.mubr.f32.mxu0 %v7194_v22  ;;  %v8299_v29 = vpop.permute.xlu0 %3828 }
 0x6f4   : > { %v8228_v62 = vpop.f32.mrb[64].mxu1 }
 0x6f5   : > { %3478 = vmatmul.mubr.f32.gmra.mrb[30].mxu0 %v7753_v27  ;;  %v2801_v40 = vpop.f32.mrb[65].mxu1  ;;  %v9266_v27 = vld [vmem:[#allocation43_spill] sm:$0xff] }
 0x6f6   : > { %3482 = vmatprep.mubr.f32.mxu0 %v7249_v13 }
 0x6f8   : > { %v8232_v36 = vpop.f32.mrb[66].mxu1 }
 0x6f9   : > { %3483 = vmatmul.mubr.f32.gmra.mrb[32].mxu0 %v7322_v60  ;;  %v2806_v14 = vpop.f32.mrb[67].mxu1  ;;  %v9268_v60 = vld [vmem:[#allocation3_spill] sm:$0xff] }
 0x6fa   : > { %3487 = vmatprep.mubr.f32.mxu0 %v7240_v35 }
 0x6fc   : > { %v8236_v22 = vpop.f32.mrb[68].mxu1 }
 0x6fd   : > { %3488 = vmatmul.mubr.f32.gmra.mrb[34].mxu0 %v7789_v37  ;;  %v2811_v61 = vpop.f32.mrb[69].mxu1  ;;  %v9270_v37 = vld [vmem:[#allocation39_spill] sm:$0xff] }
 0x6fe   : > { %3492 = vmatprep.mubr.f32.mxu0 %v7302_v16  ;;  %v8305_v61 = vpop.permute.xlu1 %3830 }
 0x700   : > { %v8240_v13 = vpop.f32.mrb[70].mxu1 }
 0x701   : > { %3493 = vmatmul.mubr.f32.gmra.mrb[36].mxu0 %v9266_v27  ;;  %9267 = vst [vmem:[#allocation34_spill] sm:$0xff] %v8240_v13  ;;  %v2816_v39 = vpop.f32.mrb[71].mxu1 }
 0x702   : > { %3497 = vmatprep.mubr.f32.mxu0 %v7290_v21  ;;  %v8307_v39 = vpop.permute.xlu0 %3832 }
 0x704   : > { %v8244_v35 = vpop.f32.mrb[72].mxu1 }
 0x705   : > { %3498 = vmatmul.mubr.f32.gmra.mrb[38].mxu0 %v9268_v60  ;;  %9269 = vst [vmem:[#allocation49_spill] sm:$0xff] %v8244_v35  ;;  %v2821_v4 = vpop.f32.mrb[73].mxu1 }
 0x706   : > { %3502 = vmatprep.mubr.f32.mxu0 %v7350_v42  ;;  %v8313_v4 = vpop.permute.xlu1 %3834 }
 0x708   : > { %v8248_v16 = vpop.f32.mrb[74].mxu1 }
 0x709   : > { %3503 = vmatmul.mubr.f32.gmra.mrb[40].mxu0 %v9270_v37  ;;  %9271 = vst [vmem:[#allocation6_spill] sm:$0xff] %v8248_v16  ;;  %v2826_v52 = vpop.f32.mrb[75].mxu1 }
 0x70a   : > { %3507 = vmatprep.mubr.f32.mxu0 %v7340_v23 }
 0x70c   : > { %v8252_v21 = vpop.f32.mrb[76].mxu1 }
 0x70d   : > { %3508 = vmatmul.mubr.f32.gmra.mrb[42].mxu0 %v9272_v3  ;;  %9273 = vst [vmem:[#allocation45_spill] sm:$0xff] %v8252_v21  ;;  %v2831_v32 = vpop.f32.mrb[77].mxu1 }
 0x70e   : > { %3512 = vmatprep.mubr.f32.mxu0 %v9204_v11  ;;  %v8323_v32 = vpop.permute.xlu1 %3838 }
 0x710   : > { %v8256_v42 = vpop.f32.mrb[78].mxu1 }
 0x711   : > { %3513 = vmatmul.mubr.f32.gmra.mrb[44].mxu0 %v9274_v26  ;;  %9275 = vst [vmem:[#allocation56_spill] sm:$0xff] %v8256_v42  ;;  %v2836_v34 = vpop.f32.mrb[79].mxu1 }
 0x712   : > { %3517 = vmatprep.mubr.f32.mxu0 %v7391_v63 }
 0x714   : > { %v8260_v23 = vpop.f32.mrb[80].mxu1 }
 0x715   : > { %3518 = vmatmul.mubr.f32.gmra.mrb[46].mxu0 %v9276_v45  ;;  %9277 = vst [vmem:[#allocation26_spill] sm:$0xff] %v8260_v23  ;;  %v2841_v19 = vpop.f32.mrb[81].mxu1 }
 0x716   : > { %3522 = vmatprep.mubr.f32.mxu0 %v9214_v53 }
 0x718   : > { %v8264_v11 = vpop.f32.mrb[82].mxu1 }
 0x719   : > { %3523 = vmatmul.mubr.f32.gmra.mrb[48].mxu0 %v9278_v8  ;;  %9279 = vst [vmem:[#allocation50_spill] sm:$0xff] %v8264_v11  ;;  %v2846_v48 = vpop.f32.mrb[83].mxu1  ;;  %v8333_v8 = vpop.permute.xlu1 %3842 }
 0x71a   : > { %3527 = vmatprep.mubr.f32.mxu0 %v7442_v10 }
 0x71c   : > { %v8268_v63 = vpop.f32.mrb[84].mxu1 }
 0x71d   : > { %3528 = vmatmul.mubr.f32.gmra.mrb[50].mxu0 %v7891_v20  ;;  %9280 = vst [vmem:[#allocation48_spill] sm:$0xff] %v8268_v63  ;;  %v2851_v33 = vpop.f32.mrb[85].mxu1  ;;  %v9283_v20 = vld [vmem:[#allocation38_spill] sm:$0xff] }
 0x71e   : > { %3532 = vmatprep.mubr.f32.mxu0 %v9239_v51 }
 0x720   : > { %v8272_v53 = vpop.f32.mrb[86].mxu1 }
 0x721   : > { %3533 = vmatmul.mubr.f32.gmra.mrb[52].mxu0 %v9218_v15  ;;  %9281 = vst [vmem:[#allocation35_spill] sm:$0xff] %v8272_v53  ;;  %v2856_v24 = vpop.f32.mrb[87].mxu1 }
 0x722   : > { %3537 = vmatprep.mubr.f32.mxu0 %v7498_v55 }
 0x724   : > { %v8276_v10 = vpop.f32.mrb[88].mxu1 }
 0x725   : > { %3538 = vmatmul.mubr.f32.gmra.mrb[54].mxu0 %v9222_v58  ;;  %9282 = vst [vmem:[#allocation25_spill] sm:$0xff] %v8276_v10  ;;  %v2861_v7 = vpop.f32.mrb[89].mxu1 }
 0x726   : > { %3542 = vmatprep.mubr.f32.mxu0 %v7577_v57 }
 0x728   : > { %v8282_v1 = vpop.f32.mrb[90].mxu1 }
 0x729   : > { %3543 = vmatmul.mubr.f32.gmra.mrb[56].mxu0 %v9283_v20  ;;  %9284 = vst [vmem:[#allocation4_spill] sm:$0xff] %v8282_v1  ;;  %v2866_v15 = vpop.f32.mrb[91].mxu1  ;;  %v8343_v20 = vpop.permute.xlu1 %3846 }
 0x72a   : > { %3547 = vmatprep.mubr.f32.mxu0 %v7564_v12 }
 0x72c   : > { %v8286_v54 = vpop.f32.mrb[92].mxu1 }
 0x72d   : > { %3548 = vmatmul.mubr.f32.gmra.mrb[58].mxu0 %v9285_v25  ;;  %9286 = vst [vmem:[#allocation17_spill] sm:$0xff] %v8286_v54  ;;  %v2871_v57 = vpop.f32.mrb[93].mxu1 }
 0x72e   : > { %3552 = vmatprep.mubr.f32.mxu0 %v9239_v51 }
 0x730   : > { %v8294_v12 = vpop.f32.mrb[94].mxu1 }
 0x731   : > { %3553 = vmatmul.mubr.f32.gmra.mrb[60].mxu0 %v9287_v43  ;;  %9288 = vst [vmem:[#allocation7_spill] sm:$0xff] %v8294_v12  ;;  %v2876_v18 = vpop.f32.mrb[95].mxu1 }
 0x732   : > { %3557 = vmatprep.mubr.f32.mxu0 %v7498_v55  ;;  %v8353_v18 = vpop.permute.xlu1 %3850 }
 0x734   : > { %v8301_v51 = vpop.f32.mrb[96].mxu1 }
 0x735   : > { %3558 = vmatmul.mubr.f32.gmra.mrb[62].mxu0 %v9222_v58  ;;  %9289 = vst [vmem:[#allocation8_spill] sm:$0xff] %v8301_v51  ;;  %v2881_v40 = vpop.f32.mrb[97].mxu1  ;;  %v8315_v58 = vpop.permute.xlu0 %3836 }
 0x736   : > { %v8363_v12 = vpop.permute.xlu1 %3854 }
 0x737   : > { %9292 = vst [vmem:[#allocation14_spill] sm:$0xff] %v8363_v12 }
 0x738   : > { %v8303_v14 = vpop.f32.mrb[98].mxu1 }
 0x739   : > { %9290 = vst [vmem:[#allocation57_spill] sm:$0xff] %v8303_v14  ;;  %v2886_v27 = vpop.f32.mrb[99].mxu1  ;;  %v8327_v34 = vpop.permute.xlu0 %3840 }
 0x73a   : > { %v8373_v63 = vpop.permute.xlu1 %3858 }
 0x73b   : > { %9297 = vst [vmem:[#allocation47_spill] sm:$0xff] %v8373_v63 }
 0x73c   : > { %v8309_v55 = vpop.f32.mrb[100].mxu1 }
 0x73d   : > { %v8311_v60 = vpop.f32.mrb[101].mxu1  ;;  %v8335_v48 = vpop.permute.xlu0 %3844 }
 0x73e   : > { %v8383_v16 = vpop.permute.xlu1 %3862 }
 0x73f   : > { %9302 = vst [vmem:[#allocation15_spill] sm:$0xff] %v8383_v16 }
 0x740   : > { %v8317_v37 = vpop.f32.mrb[102].mxu1 }
 0x741   : > { %v8319_v52 = vpop.f32.mrb[103].mxu1  ;;  %v8347_v25 = vpop.permute.xlu0 %3848 }
 0x742   : > { %v8393_v63 = vpop.permute.xlu1 %3866 }
 0x743   : > { %9307 = vst [vmem:[#allocation41_spill] sm:$0xff] %v8393_v63 }
 0x744   : > { %v8321_v3 = vpop.f32.mrb[104].mxu1 }
 0x745   : > { %v8325_v26 = vpop.f32.mrb[105].mxu1  ;;  %v8355_v40 = vpop.permute.xlu0 %3852 }
 0x746   : > { %v8403_v16 = vpop.permute.xlu1 %3870 }
 0x747   : > { %9312 = vst [vmem:[#allocation54_spill] sm:$0xff] %v8403_v16 }
 0x748   : > { %v8329_v45 = vpop.f32.mrb[106].mxu1 }
 0x749   : > { %v8331_v19 = vpop.f32.mrb[107].mxu1  ;;  %v8367_v1 = vpop.permute.xlu0 %3856 }
 0x74a   : > { %9294 = vst [vmem:[#allocation20_spill] sm:$0xff] %v8367_v1 }
 0x74c   : > { %v8337_v33 = vpop.f32.mrb[108].mxu1 }
 0x74d   : > { %v8339_v24 = vpop.f32.mrb[109].mxu1  ;;  %v8375_v11 = vpop.permute.xlu0 %3860 }
 0x74e   : > { %9298 = vst [vmem:[#allocation10_spill] sm:$0xff] %v8375_v11 }
 0x750   : > { %v8341_v7 = vpop.f32.mrb[110].mxu1 }
 0x751   : > { %v8345_v15 = vpop.f32.mrb[111].mxu1  ;;  %v8387_v35 = vpop.permute.xlu0 %3864 }
 0x752   : > { %9304 = vst [vmem:[#allocation27_spill] sm:$0xff] %v8387_v35 }
 0x754   : > { %v8349_v57 = vpop.f32.mrb[112].mxu1 }
 0x755   : > { %v8351_v43 = vpop.f32.mrb[113].mxu1  ;;  %v8395_v11 = vpop.permute.xlu0 %3868 }
 0x756   : > { %9308 = vst [vmem:[#allocation58_spill] sm:$0xff] %v8395_v11 }
 0x758   : > { %v8357_v27 = vpop.f32.mrb[114].mxu1 }
 0x759   : > { %v8359_v14 = vpop.f32.mrb[115].mxu1  ;;  %v8407_v35 = vpop.permute.xlu0 %3872 }
 0x75a   : > { %9314 = vst [vmem:[#allocation53_spill] sm:$0xff] %v8407_v35 }
 0x75c   : > { %v8361_v51 = vpop.f32.mrb[116].mxu1 }
 0x75d   : > { %9291 = vst [vmem:[#allocation9_spill] sm:$0xff] %v8361_v51  ;;  %v8365_v54 = vpop.f32.mrb[117].mxu1  ;;  %v8415_v63 = vpop.permute.xlu0 %3876 }
 0x75e   : > { %9293 = vst [vmem:[#allocation16_spill] sm:$0xff] %v8365_v54  ;;  %9318 = vst [vmem:[#allocation40_spill] sm:$0xff] %v8415_v63 }
 0x760   : > { %v8369_v10 = vpop.f32.mrb[118].mxu1 }
 0x761   : > { %9295 = vst [vmem:[#allocation33_spill] sm:$0xff] %v8369_v10  ;;  %v8371_v53 = vpop.f32.mrb[119].mxu1 }
 0x762   : > { %9296 = vst [vmem:[#allocation46_spill] sm:$0xff] %v8371_v53  ;;  %v8413_v53 = vpop.permute.xlu1 %3874 }
 0x763   : > { %9317 = vst [vmem:[#allocation18_spill] sm:$0xff] %v8413_v53 }
 0x764   : > { %v8377_v23 = vpop.f32.mrb[120].mxu1 }
 0x765   : > { %9299 = vst [vmem:[#allocation22_spill] sm:$0xff] %v8377_v23  ;;  %v8379_v42 = vpop.f32.mrb[121].mxu1 }
 0x766   : > { %9300 = vst [vmem:[#allocation2_spill] sm:$0xff] %v8379_v42  ;;  %v8417_v11 = vpop.permute.xlu1 %3878 }
 0x767   : > { %9319 = vst [vmem:[#allocation24_spill] sm:$0xff] %v8417_v11 }
 0x768   : > { %v8381_v21 = vpop.f32.mrb[122].mxu1 }
 0x769   : > { %9301 = vst [vmem:[#allocation42_spill] sm:$0xff] %v8381_v21  ;;  %v8385_v51 = vpop.f32.mrb[123].mxu1 }
 0x76a   : > { %9303 = vst [vmem:[#allocation44_spill] sm:$0xff] %v8385_v51 }
 0x76c   : > { %v8389_v1 = vpop.f32.mrb[124].mxu1 }
 0x76d   : > { %9305 = vst [vmem:[#allocation32_spill] sm:$0xff] %v8389_v1  ;;  %v8391_v10 = vpop.f32.mrb[125].mxu1 }
 0x76e   : > { %9306 = vst [vmem:[#allocation52_spill] sm:$0xff] %v8391_v10 }
 0x770   : > { %v8397_v23 = vpop.f32.mrb[126].mxu1 }
 0x771   : > { %9309 = vst [vmem:[#allocation21_spill] sm:$0xff] %v8397_v23  ;;  %v8399_v42 = vpop.f32.mrb[127].mxu1  ;;  %v8419_v23 = vpop.permute.xlu0 %3880 }
 0x772   : > { %9310 = vst [vmem:[#allocation29_spill] sm:$0xff] %v8399_v42  ;;  %9320 = vst [vmem:[#allocation36_spill] sm:$0xff] %v8419_v23  ;;  %v8429_v42 = vpop.permute.xlu1 %3882 }
 0x773   : > { %9321 = vst [vmem:[#allocation51_spill] sm:$0xff] %v8429_v42 }
 0x774   : > { %v8401_v21 = vpop.f32.mrb[128].mxu1 }
 0x775   : > { %9311 = vst [vmem:[#allocation5_spill] sm:$0xff] %v8401_v21  ;;  %v8405_v51 = vpop.f32.mrb[129].mxu1  ;;  %v8424_v21 = vld [vmem:[%s8735_s10] ss:$0 sm:$0xff] }
 0x776   : > { %9313 = vst [vmem:[#allocation55_spill] sm:$0xff] %v8405_v51  ;;  %v5378_v51 = vld [vmem:[%s5515_s30] sm:$0xff]  ;;  %v2730_v63 = vadd.f32 %v8424_v21, %v8172_v50  ;;  %v2735_v16 = vadd.f32 %v8424_v21, %v8176_v46  ;;  %v3919_v54 = vpop.permute.xlu1 %3918  ;;  %v2740_v46 = vadd.f32 %v8424_v21, %v8180_v9  ;;  %v2745_v9 = vadd.f32 %v8424_v21, %v8184_v38 }
 0x777   : > { %v2750_v38 = vadd.f32 %v8424_v21, %v8188_v30  ;;  %v2755_v30 = vadd.f32 %v8424_v21, %v8192_v41  ;;  %v2760_v41 = vadd.f32 %v8424_v21, %v8196_v47  ;;  %v2765_v47 = vadd.f32 %v8424_v21, %v8200_v2 }
 0x778   : > { %v8409_v1 = vpop.f32.mrb[130].mxu1  ;;  %v2770_v2 = vadd.f32 %v8424_v21, %v8204_v6  ;;  %v2775_v6 = vadd.f32 %v8424_v21, %v8208_v56  ;;  %v2780_v56 = vadd.f32 %v8424_v21, %v8212_v44  ;;  %v2785_v44 = vadd.f32 %v8424_v21, %v8216_v0 }
 0x779   : > { %9315 = vst [vmem:[#allocation12_spill] sm:$0xff] %v8409_v1  ;;  %v8411_v10 = vpop.f32.mrb[131].mxu1  ;;  %v4012_v1 = vsel %vm523_vm1, %v5378_v51, %v8280_v49  ;;  %v5379_v51 = vld [vmem:[%s5515_s30 + $0x8] sm:$0xff]  ;;  %v2790_v0 = vadd.f32 %v8424_v21, %v8220_v5  ;;  %v2795_v5 = vadd.f32 %v8424_v21, %v8224_v28  ;;  %v2800_v28 = vadd.f32 %v8424_v21, %v8228_v62 }
 0x77a   : > { %9316 = vst [vmem:[#allocation11_spill] sm:$0xff] %v8411_v10  ;;  %v3917_v10 = vpop.permute.xlu0 %3916  ;;  %v4013_v42 = vsel %vm523_vm1, %v5379_v51, %v8288_v59  ;;  %v2805_v62 = vadd.f32 %v8424_v21, %v8232_v36  ;;  %v2810_v36 = vadd.f32 %v8424_v21, %v8236_v22  ;;  %v9322_v22 = vld [vmem:[#allocation34_spill] sm:$0xff] }
 0x77b   : > { %v4045_v35 = vsel %vm4044_vm7, %v4012_v1, %v3917_v10  ;;  %v5380_v10 = vld [vmem:[%s5515_s30 + $0x10] sm:$0xff] }
 0x77c   : > { %v4078_v12 = vsel %vm4077_vm8, %v4045_v35, 0.0  ;;  %v4046_v35 = vsel %vm4044_vm7, %v4013_v42, %v3919_v54 }
 0x77e   : > { %v3921_v59 = vpop.permute.xlu0 %3920 }
 0x78c   : > { %v3404_v11 = vpop.f32.mrb[0].mxu0 }
 0x78d   : > { %v5062_v53 = vadd.f32 %v3404_v11, %v2730_v63  ;;  %v3406_v23 = vpop.f32.mrb[1].mxu0 }
 0x78f   : > { %v3630_v49 = vadd.f32 %v5062_v53, %v8311_v60 }
 0x790   : > { %v3409_v50 = vpop.f32.mrb[2].mxu0 }
 0x791   : > { %v3788_v13 = vmax.f32 %v3630_v49, 0.0  ;;  %v5064_v11 = vadd.f32 %v3409_v50, %v2735_v16  ;;  %v3411_v23 = vpop.f32.mrb[3].mxu0  ;;  %v4014_v16 = vsel %vm523_vm1, %v5380_v10, %v8290_v31  ;;  %v4079_v50 = vsel %vm4077_vm8, %v4046_v35, 0.0 }
 0x792   : > { %v4047_v54 = vsel %vm4044_vm7, %v4014_v16, %v3921_v59  ;;  %v5382_v16 = vld [vmem:[%s5515_s30 + $0x20] sm:$0xff] }
 0x793   : > { %v4110_v63 = vadd.f32 %v4078_v12, %v3788_v13  ;;  %v3635_v53 = vadd.f32 %v5064_v11, %v8309_v55  ;;  %v5381_v12 = vld [vmem:[%s5515_s30 + $0x18] sm:$0xff]  ;;  %v3923_v55 = vpop.permute.xlu1 %3922 }
 0x794   : > { %v3414_v1 = vpop.f32.mrb[4].mxu0  ;;  %v4015_v31 = vsel %vm523_vm1, %v5381_v12, %v8297_v17  ;;  %v4016_v17 = vsel %vm523_vm1, %v5382_v16, %v8299_v29 }
 0x795   : > { %4142 = vst [vmem:[%s8445_s19] sm:$0xff] %v4110_v63  ;;  %v3789_v60 = vmax.f32 %v3635_v53, 0.0  ;;  %v5066_v49 = vadd.f32 %v3414_v1, %v2740_v46  ;;  %v3416_v51 = vpop.f32.mrb[5].mxu0  ;;  %v4080_v53 = vsel %vm4077_vm8, %v4047_v54, 0.0  ;;  %v3925_v1 = vpop.permute.xlu0 %3924 }
 0x797   : > { %v4111_v13 = vadd.f32 %v4079_v50, %v3789_v60  ;;  %v3640_v42 = vadd.f32 %v5066_v49, %v8319_v52  ;;  %v4048_v52 = vsel %vm4044_vm7, %v4015_v31, %v3923_v55  ;;  %v3927_v54 = vpop.permute.xlu1 %3926 }
 0x798   : > { %v3419_v11 = vpop.f32.mrb[6].mxu0  ;;  %v4081_v50 = vsel %vm4077_vm8, %v4048_v52, 0.0 }
 0x799   : > { %4143 = vst [vmem:[%s8445_s19 + $0x8] sm:$0xff] %v4111_v13  ;;  %v3790_v23 = vmax.f32 %v3640_v42, 0.0  ;;  %v5068_v46 = vadd.f32 %v3419_v11, %v2745_v9  ;;  %v3421_v63 = vpop.f32.mrb[7].mxu0  ;;  %v5383_v42 = vld [vmem:[%s5515_s30 + $0x28] sm:$0xff] }
 0x79a   : > { %v4017_v29 = vsel %vm523_vm1, %v5383_v42, %v8305_v61 }
 0x79b   : > { %v4112_v35 = vadd.f32 %v4080_v53, %v3790_v23  ;;  %v3645_v10 = vadd.f32 %v5068_v46, %v8317_v37  ;;  %v4049_v37 = vsel %vm4044_vm7, %v4016_v17, %v3925_v1  ;;  %v4050_v46 = vsel %vm4044_vm7, %v4017_v29, %v3927_v54  ;;  %v5384_v53 = vld [vmem:[%s5515_s30 + $0x30] sm:$0xff]  ;;  %v5386_v29 = vld [vmem:[%s5515_s30 + $0x40] sm:$0xff] }
 0x79c   : > { %v3424_v59 = vpop.f32.mrb[8].mxu0  ;;  %v4082_v23 = vsel %vm4077_vm8, %v4049_v37, 0.0  ;;  %v4018_v61 = vsel %vm523_vm1, %v5384_v53, %v8307_v39  ;;  %v4083_v17 = vsel %vm4077_vm8, %v4050_v46, 0.0 }
 0x79d   : > { %4144 = vst [vmem:[%s8445_s19 + $0x10] sm:$0xff] %v4112_v35  ;;  %v3791_v60 = vmax.f32 %v3645_v10, 0.0  ;;  %v5070_v49 = vadd.f32 %v3424_v59, %v2750_v38  ;;  %v3426_v51 = vpop.f32.mrb[9].mxu0  ;;  %v3929_v38 = vpop.permute.xlu0 %3928 }
 0x79e   : > { %v4051_v1 = vsel %vm4044_vm7, %v4018_v61, %v3929_v38 }
 0x79f   : > { %v4113_v9 = vadd.f32 %v4081_v50, %v3791_v60  ;;  %v3650_v13 = vadd.f32 %v5070_v49, %v8325_v26  ;;  %v5385_v60 = vld [vmem:[%s5515_s30 + $0x38] sm:$0xff]  ;;  %v3931_v49 = vpop.permute.xlu1 %3930  ;;  %v4084_v37 = vsel %vm4077_vm8, %v4051_v1, 0.0 }
 0x7a0   : > { %v3429_v12 = vpop.f32.mrb[10].mxu0  ;;  %v4019_v39 = vsel %vm523_vm1, %v5385_v60, %v8313_v4  ;;  %v4020_v4 = vsel %vm523_vm1, %v5386_v29, %v8315_v58 }
 0x7a1   : > { %4145 = vst [vmem:[%s8445_s19 + $0x18] sm:$0xff] %v4113_v9  ;;  %v3792_v31 = vmax.f32 %v3650_v13, 0.0  ;;  %v5072_v55 = vadd.f32 %v3429_v12, %v2755_v30  ;;  %v3431_v11 = vpop.f32.mrb[11].mxu0  ;;  %v4052_v13 = vsel %vm4044_vm7, %v4019_v39, %v3931_v49  ;;  %v3933_v54 = vpop.permute.xlu0 %3932 }
 0x7a3   : > { %v4114_v26 = vadd.f32 %v4082_v23, %v3792_v31  ;;  %v3655_v63 = vadd.f32 %v5072_v55, %v8321_v3  ;;  %v4085_v23 = vsel %vm4077_vm8, %v4052_v13, 0.0 }
 0x7a4   : > { %v3434_v52 = vpop.f32.mrb[12].mxu0 }
 0x7a5   : > { %4146 = vst [vmem:[%s8445_s19 + $0x20] sm:$0xff] %v4114_v26  ;;  %v3793_v35 = vmax.f32 %v3655_v63, 0.0  ;;  %v5074_v10 = vadd.f32 %v3434_v52, %v2760_v41  ;;  %v3436_v16 = vpop.f32.mrb[13].mxu0  ;;  %v4053_v41 = vsel %vm4044_vm7, %v4020_v4, %v3933_v54  ;;  %v5387_v26 = vld [vmem:[%s5515_s30 + $0x48] sm:$0xff]  ;;  %v3935_v63 = vpop.permute.xlu1 %3934  ;;  %v5390_v4 = vld [vmem:[%s5515_s30 + $0x60] sm:$0xff] }
 0x7a6   : > { %v4021_v58 = vsel %vm523_vm1, %v5387_v26, %v8323_v32 }
 0x7a7   : > { %v4115_v3 = vadd.f32 %v4083_v17, %v3793_v35  ;;  %v3660_v59 = vadd.f32 %v5074_v10, %v8331_v19  ;;  %v4086_v35 = vsel %vm4077_vm8, %v4053_v41, 0.0  ;;  %v4054_v10 = vsel %vm4044_vm7, %v4021_v58, %v3935_v63  ;;  %v5388_v17 = vld [vmem:[%s5515_s30 + $0x50] sm:$0xff] }
 0x7a8   : > { %v3439_v51 = vpop.f32.mrb[14].mxu0  ;;  %v4022_v32 = vsel %vm523_vm1, %v5388_v17, %v8327_v34  ;;  %v4087_v39 = vsel %vm4077_vm8, %v4054_v10, 0.0 }
 0x7a9   : > { %4147 = vst [vmem:[%s8445_s19 + $0x28] sm:$0xff] %v4115_v3  ;;  %v3794_v50 = vmax.f32 %v3660_v59, 0.0  ;;  %v5076_v30 = vadd.f32 %v3439_v51, %v2765_v47  ;;  %v3441_v9 = vpop.f32.mrb[15].mxu0  ;;  %v3937_v47 = vpop.permute.xlu0 %3936 }
 0x7aa   : > { %v4055_v49 = vsel %vm4044_vm7, %v4022_v32, %v3937_v47 }
 0x7ab   : > { %v4116_v19 = vadd.f32 %v4084_v37, %v3794_v50  ;;  %v3665_v42 = vadd.f32 %v5076_v30, %v8329_v45  ;;  %v5389_v50 = vld [vmem:[%s5515_s30 + $0x58] sm:$0xff]  ;;  %v3939_v30 = vpop.permute.xlu1 %3938 }
 0x7ac   : > { %v3444_v12 = vpop.f32.mrb[16].mxu0  ;;  %v4023_v34 = vsel %vm523_vm1, %v5389_v50, %v8333_v8  ;;  %v4024_v8 = vsel %vm523_vm1, %v5390_v4, %v8335_v48  ;;  %v5395_v4 = vld [vmem:[%s5515_s30 + $0x88] sm:$0xff] }
 0x7ad   : > { %4148 = vst [vmem:[%s8445_s19 + $0x30] sm:$0xff] %v4116_v19  ;;  %v3795_v31 = vmax.f32 %v3665_v42, 0.0  ;;  %v5078_v55 = vadd.f32 %v3444_v12, %v2770_v2  ;;  %v3446_v11 = vpop.f32.mrb[17].mxu0  ;;  %v4088_v19 = vsel %vm4077_vm8, %v4055_v49, 0.0  ;;  %v4056_v42 = vsel %vm4044_vm7, %v4023_v34, %v3939_v30  ;;  %v3941_v54 = vpop.permute.xlu0 %3940  ;;  %v5394_v34 = vld [vmem:[%s5515_s30 + $0x80] sm:$0xff] }
 0x7af   : > { %v4117_v45 = vadd.f32 %v4085_v23, %v3795_v31  ;;  %v3670_v46 = vadd.f32 %v5078_v55, %v8339_v24  ;;  %v4089_v23 = vsel %vm4077_vm8, %v4056_v42, 0.0 }
 0x7b0   : > { %v3449_v53 = vpop.f32.mrb[18].mxu0 }
 0x7b1   : > { %4149 = vst [vmem:[%s8445_s19 + $0x38] sm:$0xff] %v4117_v45  ;;  %v3796_v61 = vmax.f32 %v3670_v46, 0.0  ;;  %v5080_v38 = vadd.f32 %v3449_v53, %v2775_v6  ;;  %v3451_v52 = vpop.f32.mrb[19].mxu0  ;;  %v4057_v6 = vsel %vm4044_vm7, %v4024_v8, %v3941_v54  ;;  %v5391_v45 = vld [vmem:[%s5515_s30 + $0x68] sm:$0xff]  ;;  %v3943_v46 = vpop.permute.xlu1 %3942 }
 0x7b2   : > { %v4025_v48 = vsel %vm523_vm1, %v5391_v45, %v8343_v20  ;;  %v9326_v45 = vld [vmem:[#allocation9_spill] sm:$0xff] }
 0x7b3   : > { %v4118_v24 = vadd.f32 %v4086_v35, %v3796_v61  ;;  %v3675_v16 = vadd.f32 %v5080_v38, %v8337_v33  ;;  %v4090_v61 = vsel %vm4077_vm8, %v4057_v6, 0.0  ;;  %v4058_v38 = vsel %vm4044_vm7, %v4025_v48, %v3943_v46  ;;  %v5392_v35 = vld [vmem:[%s5515_s30 + $0x70] sm:$0xff] }
 0x7b4   : > { %v3454_v1 = vpop.f32.mrb[20].mxu0  ;;  %v4026_v20 = vsel %vm523_vm1, %v5392_v35, %v8347_v25  ;;  %v4091_v32 = vsel %vm4077_vm8, %v4058_v38, 0.0  ;;  %v5396_v46 = vld [vmem:[%s5515_s30 + $0x90] sm:$0xff] }
 0x7b5   : > { %4150 = vst [vmem:[%s8445_s19 + $0x40] sm:$0xff] %v4118_v24  ;;  %v3797_v3 = vmax.f32 %v3675_v16, 0.0  ;;  %v5082_v59 = vadd.f32 %v3454_v1, %v2780_v56  ;;  %v3456_v60 = vpop.f32.mrb[21].mxu0  ;;  %v3945_v56 = vpop.permute.xlu0 %3944 }
 0x7b6   : > { %v4059_v47 = vsel %vm4044_vm7, %v4026_v20, %v3945_v56 }
 0x7b7   : > { %v4119_v33 = vadd.f32 %v4087_v39, %v3797_v3  ;;  %v3680_v51 = vadd.f32 %v5082_v59, %v8345_v15  ;;  %v5393_v3 = vld [vmem:[%s5515_s30 + $0x78] sm:$0xff]  ;;  %v3947_v59 = vpop.permute.xlu1 %3946 }
 0x7b8   : > { %v3459_v9 = vpop.f32.mrb[22].mxu0  ;;  %v4027_v25 = vsel %vm523_vm1, %v5393_v3, %v8353_v18  ;;  %v4028_v18 = vsel %vm523_vm1, %v5394_v34, %v8355_v40  ;;  %v9324_v40 = vld [vmem:[#allocation14_spill] sm:$0xff] }
 0x7b9   : > { %4151 = vst [vmem:[%s8445_s19 + $0x48] sm:$0xff] %v4119_v33  ;;  %v3798_v37 = vmax.f32 %v3680_v51, 0.0  ;;  %v5084_v2 = vadd.f32 %v3459_v9, %v2785_v44  ;;  %v3461_v13 = vpop.f32.mrb[23].mxu0  ;;  %v4092_v33 = vsel %vm4077_vm8, %v4059_v47, 0.0  ;;  %v4060_v51 = vsel %vm4044_vm7, %v4027_v25, %v3947_v59  ;;  %v3949_v30 = vpop.permute.xlu0 %3948  ;;  %v9331_v59 = vld [vmem:[#allocation45_spill] sm:$0xff] }
 0x7ba   : > { %v4061_v42 = vsel %vm4044_vm7, %v4028_v18, %v3949_v30  ;;  %v4029_v8 = vsel %vm523_vm1, %v5395_v4, %v9324_v40 }
 0x7bb   : > { %v4120_v15 = vadd.f32 %v4088_v19, %v3798_v37  ;;  %v3685_v29 = vadd.f32 %v5084_v2, %v8341_v7  ;;  %v4093_v19 = vsel %vm4077_vm8, %v4060_v51, 0.0  ;;  %v3951_v54 = vpop.permute.xlu1 %3950  ;;  %v9333_v51 = vld [vmem:[#allocation10_spill] sm:$0xff] }
 0x7bc   : > { %v3464_v12 = vpop.f32.mrb[24].mxu0 }
 0x7bd   : > { %4152 = vst [vmem:[%s8445_s19 + $0x50] sm:$0xff] %v4120_v15  ;;  %v3799_v31 = vmax.f32 %v3685_v29, 0.0  ;;  %v5086_v55 = vadd.f32 %v3464_v12, %v2790_v0  ;;  %v3466_v11 = vpop.f32.mrb[25].mxu0  ;;  %v2815_v0 = vadd.f32 %v8424_v21, %v9322_v22  ;;  %v9323_v15 = vld [vmem:[#allocation16_spill] sm:$0xff] }
 0x7bf   : > { %v4121_v7 = vadd.f32 %v4089_v23, %v3799_v31  ;;  %v3690_v41 = vadd.f32 %v5086_v55, %v8351_v43  ;;  %v4094_v23 = vsel %vm4077_vm8, %v4061_v42, 0.0 }
 0x7c0   : > { %v3469_v26 = vpop.f32.mrb[26].mxu0 }
 0x7c1   : > { %4153 = vst [vmem:[%s8445_s19 + $0x58] sm:$0xff] %v4121_v7  ;;  %v3800_v58 = vmax.f32 %v3690_v41, 0.0  ;;  %v5088_v63 = vadd.f32 %v3469_v26, %v2795_v5  ;;  %v3471_v53 = vpop.f32.mrb[27].mxu0  ;;  %v9325_v5 = vld [vmem:[#allocation49_spill] sm:$0xff]  ;;  %v4062_v7 = vsel %vm4044_vm7, %v4029_v8, %v3951_v54  ;;  %v9327_v26 = vld [vmem:[#allocation20_spill] sm:$0xff] }
 0x7c2   : > { %v2820_v6 = vadd.f32 %v8424_v21, %v9325_v5 }
 0x7c3   : > { %v4122_v43 = vadd.f32 %v4090_v61, %v3800_v58  ;;  %v3695_v52 = vadd.f32 %v5088_v63, %v8349_v57  ;;  %v4030_v58 = vsel %vm523_vm1, %v5396_v46, %v9327_v26  ;;  %v3953_v63 = vpop.permute.xlu0 %3952 }
 0x7c4   : > { %v3474_v10 = vpop.f32.mrb[28].mxu0  ;;  %v4063_v20 = vsel %vm4044_vm7, %v4030_v58, %v3953_v63 }
 0x7c5   : > { %4154 = vst [vmem:[%s8445_s19 + $0x60] sm:$0xff] %v4122_v43  ;;  %v3801_v24 = vmax.f32 %v3695_v52, 0.0  ;;  %v5090_v16 = vadd.f32 %v3474_v10, %v2800_v28  ;;  %v3476_v17 = vpop.f32.mrb[29].mxu0  ;;  %v4095_v43 = vsel %vm4077_vm8, %v4062_v7, 0.0  ;;  %v9328_v52 = vld [vmem:[#allocation6_spill] sm:$0xff]  ;;  %v4096_v25 = vsel %vm4077_vm8, %v4063_v20, 0.0 }
 0x7c6   : > { %v2825_v35 = vadd.f32 %v8424_v21, %v9328_v52  ;;  %v9329_v10 = vld [vmem:[#allocation46_spill] sm:$0xff]  ;;  %v9330_v17 = vld [vmem:[#allocation47_spill] sm:$0xff] }
 0x7c7   : > { %v4123_v57 = vadd.f32 %v4091_v32, %v3801_v24  ;;  %v3700_v1 = vadd.f32 %v5090_v16, %v8359_v14  ;;  %v5397_v16 = vld [vmem:[%s5515_s30 + $0x98] sm:$0xff] }
 0x7c8   : > { %v3479_v60 = vpop.f32.mrb[30].mxu0  ;;  %v4031_v32 = vsel %vm523_vm1, %v5397_v16, %v9330_v17 }
 0x7c9   : > { %4155 = vst [vmem:[%s8445_s19 + $0x68] sm:$0xff] %v4123_v57  ;;  %v3802_v39 = vmax.f32 %v3700_v1, 0.0  ;;  %v5092_v44 = vadd.f32 %v3479_v60, %v2805_v62  ;;  %v3481_v49 = vpop.f32.mrb[31].mxu0  ;;  %v3955_v62 = vpop.permute.xlu1 %3954  ;;  %v2830_v60 = vadd.f32 %v8424_v21, %v9331_v59 }
 0x7ca   : > { %v9332_v49 = vld [vmem:[#allocation33_spill] sm:$0xff] }
 0x7cb   : > { %v4124_v14 = vadd.f32 %v4092_v33, %v3802_v39  ;;  %v3705_v50 = vadd.f32 %v5092_v44, %v8357_v27  ;;  %v4064_v39 = vsel %vm4044_vm7, %v4031_v32, %v3955_v62 }
 0x7cc   : > { %v3484_v9 = vpop.f32.mrb[32].mxu0 }
 0x7cd   : > { %4156 = vst [vmem:[%s8445_s19 + $0x70] sm:$0xff] %v4124_v14  ;;  %v3803_v37 = vmax.f32 %v3705_v50, 0.0  ;;  %v5094_v2 = vadd.f32 %v3484_v9, %v2810_v36  ;;  %v3486_v13 = vpop.f32.mrb[33].mxu0  ;;  %v5398_v36 = vld [vmem:[%s5515_s30 + $0xa0] sm:$0xff]  ;;  %v3957_v50 = vpop.permute.xlu0 %3956 }
 0x7ce   : > { %v4032_v14 = vsel %vm523_vm1, %v5398_v36, %v9333_v51  ;;  %v3959_v4 = vpop.permute.xlu1 %3958 }
 0x7cf   : > { %v4125_v27 = vadd.f32 %v4093_v19, %v3803_v37  ;;  %v3710_v29 = vadd.f32 %v5094_v2, %v9323_v15  ;;  %v4097_v37 = vsel %vm4077_vm8, %v4064_v39, 0.0  ;;  %v9334_v2 = vld [vmem:[#allocation56_spill] sm:$0xff]  ;;  %v4065_v19 = vsel %vm4044_vm7, %v4032_v14, %v3957_v50  ;;  %v9336_v15 = vld [vmem:[#allocation15_spill] sm:$0xff] }
 0x7d0   : > { %v3489_v12 = vpop.f32.mrb[34].mxu0  ;;  %v2835_v13 = vadd.f32 %v8424_v21, %v9334_v2 }
 0x7d1   : > { %4157 = vst [vmem:[%s8445_s19 + $0x78] sm:$0xff] %v4125_v27  ;;  %v3804_v31 = vmax.f32 %v3710_v29, 0.0  ;;  %v5096_v55 = vadd.f32 %v3489_v12, %v2815_v0  ;;  %v3491_v11 = vpop.f32.mrb[35].mxu0  ;;  %v9335_v0 = vld [vmem:[#allocation2_spill] sm:$0xff]  ;;  %v5399_v27 = vld [vmem:[%s5515_s30 + $0xa8] sm:$0xff]  ;;  %v3961_v46 = vpop.permute.xlu0 %3960 }
 0x7d2   : > { %v4033_v29 = vsel %vm523_vm1, %v5399_v27, %v9336_v15  ;;  %v3963_v16 = vpop.permute.xlu1 %3962 }
 0x7d3   : > { %v4126_v41 = vadd.f32 %v4094_v23, %v3804_v31  ;;  %v3715_v48 = vadd.f32 %v5096_v55, %v9326_v45  ;;  %v4098_v31 = vsel %vm4077_vm8, %v4065_v19, 0.0  ;;  %v9337_v55 = vld [vmem:[#allocation26_spill] sm:$0xff]  ;;  %v4066_v23 = vsel %vm4044_vm7, %v4033_v29, %v3959_v4  ;;  %v9339_v45 = vld [vmem:[#allocation27_spill] sm:$0xff] }
 0x7d4   : > { %v3494_v53 = vpop.f32.mrb[36].mxu0  ;;  %v2840_v11 = vadd.f32 %v8424_v21, %v9337_v55 }
 0x7d5   : > { %4158 = vst [vmem:[%s8445_s19 + $0x80] sm:$0xff] %v4126_v41  ;;  %v3805_v61 = vmax.f32 %v3715_v48, 0.0  ;;  %v5098_v28 = vadd.f32 %v3494_v53, %v2820_v6  ;;  %v3496_v38 = vpop.f32.mrb[37].mxu0  ;;  %v9338_v6 = vld [vmem:[#allocation22_spill] sm:$0xff]  ;;  %v5400_v41 = vld [vmem:[%s5515_s30 + $0xb0] sm:$0xff]  ;;  %v3965_v36 = vpop.permute.xlu0 %3964 }
 0x7d6   : > { %v4034_v48 = vsel %vm523_vm1, %v5400_v41, %v9339_v45  ;;  %v3967_v27 = vpop.permute.xlu1 %3966 }
 0x7d7   : > { %v4127_v56 = vadd.f32 %v4095_v43, %v3805_v61  ;;  %v3720_v24 = vadd.f32 %v5098_v28, %v9329_v10  ;;  %v4099_v61 = vsel %vm4077_vm8, %v4066_v23, 0.0  ;;  %v9340_v28 = vld [vmem:[#allocation50_spill] sm:$0xff]  ;;  %v4067_v43 = vsel %vm4044_vm7, %v4034_v48, %v3961_v46  ;;  %v9342_v10 = vld [vmem:[#allocation41_spill] sm:$0xff] }
 0x7d8   : > { %v3499_v47 = vpop.f32.mrb[38].mxu0  ;;  %v2845_v38 = vadd.f32 %v8424_v21, %v9340_v28 }
 0x7d9   : > { %4159 = vst [vmem:[%s8445_s19 + $0x88] sm:$0xff] %v4127_v56  ;;  %v3806_v57 = vmax.f32 %v3720_v24, 0.0  ;;  %v5100_v1 = vadd.f32 %v3499_v47, %v2825_v35  ;;  %v3501_v3 = vpop.f32.mrb[39].mxu0  ;;  %v9341_v35 = vld [vmem:[#allocation44_spill] sm:$0xff]  ;;  %v5401_v56 = vld [vmem:[%s5515_s30 + $0xb8] sm:$0xff]  ;;  %v3969_v41 = vpop.permute.xlu0 %3968 }
 0x7da   : > { %v4035_v24 = vsel %vm523_vm1, %v5401_v56, %v9342_v10  ;;  %v3971_v56 = vpop.permute.xlu1 %3970 }
 0x7db   : > { %v4128_v44 = vadd.f32 %v4096_v25, %v3806_v57  ;;  %v3725_v33 = vadd.f32 %v5100_v1, %v9332_v49  ;;  %v4100_v57 = vsel %vm4077_vm8, %v4067_v43, 0.0  ;;  %v9343_v1 = vld [vmem:[#allocation48_spill] sm:$0xff]  ;;  %v4068_v25 = vsel %vm4044_vm7, %v4035_v24, %v3963_v16  ;;  %v9345_v49 = vld [vmem:[#allocation58_spill] sm:$0xff] }
 0x7dc   : > { %v3504_v34 = vpop.f32.mrb[40].mxu0  ;;  %v2850_v3 = vadd.f32 %v8424_v21, %v9343_v1 }
 0x7dd   : > { %4160 = vst [vmem:[%s8445_s19 + $0x90] sm:$0xff] %v4128_v44  ;;  %v3807_v18 = vmax.f32 %v3725_v33, 0.0  ;;  %v5102_v30 = vadd.f32 %v3504_v34, %v2830_v60  ;;  %v3506_v9 = vpop.f32.mrb[41].mxu0  ;;  %v9344_v60 = vld [vmem:[#allocation42_spill] sm:$0xff] }
 0x7de   : > { %v5402_v44 = vld [vmem:[%s5515_s30 + $0xc0] sm:$0xff] }
 0x7df   : > { %v4129_v22 = vadd.f32 %v4097_v37, %v3807_v18  ;;  %v3730_v42 = vadd.f32 %v5102_v30, %v9335_v0  ;;  %v4036_v33 = vsel %vm523_vm1, %v5402_v44, %v9345_v49  ;;  %v4101_v18 = vsel %vm4077_vm8, %v4068_v25, 0.0  ;;  %v9346_v30 = vld [vmem:[#allocation35_spill] sm:$0xff]  ;;  %v9348_v0 = vld [vmem:[#allocation54_spill] sm:$0xff]  ;;  %v3973_v44 = vpop.permute.xlu0 %3972 }
 0x7e0   : > { %v3509_v40 = vpop.f32.mrb[42].mxu0  ;;  %v2855_v9 = vadd.f32 %v8424_v21, %v9346_v30  ;;  %v4069_v37 = vsel %vm4044_vm7, %v4036_v33, %v3965_v36 }
 0x7e1   : > { %4161 = vst [vmem:[%s8445_s19 + $0x98] sm:$0xff] %v4129_v22  ;;  %v3808_v8 = vmax.f32 %v3730_v42, 0.0  ;;  %v5104_v54 = vadd.f32 %v3509_v40, %v2835_v13  ;;  %v3511_v12 = vpop.f32.mrb[43].mxu0  ;;  %v9347_v13 = vld [vmem:[#allocation52_spill] sm:$0xff]  ;;  %v5403_v22 = vld [vmem:[%s5515_s30 + $0xc8] sm:$0xff] }
 0x7e2   : > { %v4037_v42 = vsel %vm523_vm1, %v5403_v22, %v9348_v0  ;;  %v3975_v22 = vpop.permute.xlu1 %3974 }
 0x7e3   : > { %v4130_v5 = vadd.f32 %v4098_v31, %v3808_v8  ;;  %v3735_v7 = vadd.f32 %v5104_v54, %v9338_v6  ;;  %v4102_v8 = vsel %vm4077_vm8, %v4069_v37, 0.0  ;;  %v9349_v54 = vld [vmem:[#allocation25_spill] sm:$0xff]  ;;  %v4070_v31 = vsel %vm4044_vm7, %v4037_v42, %v3967_v27 }
 0x7e4   : > { %v3514_v26 = vpop.f32.mrb[44].mxu0  ;;  %v2860_v12 = vadd.f32 %v8424_v21, %v9349_v54  ;;  %v9351_v6 = vld [vmem:[#allocation53_spill] sm:$0xff] }
 0x7e5   : > { %4162 = vst [vmem:[%s8445_s19 + $0xa0] sm:$0xff] %v4130_v5  ;;  %v3809_v58 = vmax.f32 %v3735_v7, 0.0  ;;  %v5106_v63 = vadd.f32 %v3514_v26, %v2840_v11  ;;  %v3516_v53 = vpop.f32.mrb[45].mxu0  ;;  %v9350_v11 = vld [vmem:[#allocation32_spill] sm:$0xff] }
 0x7e6   : > { %v5404_v5 = vld [vmem:[%s5515_s30 + $0xd0] sm:$0xff] }
 0x7e7   : > { %v4131_v52 = vadd.f32 %v4099_v61, %v3809_v58  ;;  %v3740_v20 = vadd.f32 %v5106_v63, %v9341_v35  ;;  %v4038_v7 = vsel %vm523_vm1, %v5404_v5, %v9351_v6  ;;  %v4103_v58 = vsel %vm4077_vm8, %v4070_v31, 0.0  ;;  %v9352_v63 = vld [vmem:[#allocation4_spill] sm:$0xff]  ;;  %v9354_v35 = vld [vmem:[#allocation18_spill] sm:$0xff]  ;;  %v3977_v5 = vpop.permute.xlu0 %3976 }
 0x7e8   : > { %v3519_v17 = vpop.f32.mrb[46].mxu0  ;;  %v2865_v53 = vadd.f32 %v8424_v21, %v9352_v63  ;;  %v4071_v61 = vsel %vm4044_vm7, %v4038_v7, %v3969_v41 }
 0x7e9   : > { %4163 = vst [vmem:[%s8445_s19 + $0xa8] sm:$0xff] %v4131_v52  ;;  %v3810_v32 = vmax.f32 %v3740_v20, 0.0  ;;  %v5108_v62 = vadd.f32 %v3519_v17, %v2845_v38  ;;  %v3521_v47 = vpop.f32.mrb[47].mxu0  ;;  %v9353_v38 = vld [vmem:[#allocation29_spill] sm:$0xff] }
 0x7ea   : > { %v5405_v52 = vld [vmem:[%s5515_s30 + $0xd8] sm:$0xff] }
 0x7eb   : > { %v4132_v59 = vadd.f32 %v4100_v57, %v3810_v32  ;;  %v3745_v39 = vadd.f32 %v5108_v62, %v9344_v60  ;;  %v4039_v20 = vsel %vm523_vm1, %v5405_v52, %v9354_v35  ;;  %v4104_v32 = vsel %vm4077_vm8, %v4071_v61, 0.0  ;;  %v9355_v62 = vld [vmem:[#allocation17_spill] sm:$0xff]  ;;  %v9357_v60 = vld [vmem:[#allocation40_spill] sm:$0xff]  ;;  %v3979_v52 = vpop.permute.xlu1 %3978 }
 0x7ec   : > { %v3524_v51 = vpop.f32.mrb[48].mxu0  ;;  %v2870_v47 = vadd.f32 %v8424_v21, %v9355_v62  ;;  %v4072_v57 = vsel %vm4044_vm7, %v4039_v20, %v3971_v56 }
 0x7ed   : > { %4164 = vst [vmem:[%s8445_s19 + $0xb0] sm:$0xff] %v4132_v59  ;;  %v3811_v14 = vmax.f32 %v3745_v39, 0.0  ;;  %v5110_v50 = vadd.f32 %v3524_v51, %v2850_v3  ;;  %v3526_v34 = vpop.f32.mrb[49].mxu0  ;;  %v9356_v3 = vld [vmem:[#allocation21_spill] sm:$0xff]  ;;  %v5406_v59 = vld [vmem:[%s5515_s30 + $0xe0] sm:$0xff] }
 0x7ee   : > { %v4040_v39 = vsel %vm523_vm1, %v5406_v59, %v9357_v60 }
 0x7ef   : > { %v4133_v2 = vadd.f32 %v4101_v18, %v3811_v14  ;;  %v3750_v19 = vadd.f32 %v5110_v50, %v9347_v13  ;;  %v4105_v14 = vsel %vm4077_vm8, %v4072_v57, 0.0  ;;  %v9358_v50 = vld [vmem:[#allocation7_spill] sm:$0xff]  ;;  %v4073_v18 = vsel %vm4044_vm7, %v4040_v39, %v3973_v44  ;;  %v9360_v13 = vld [vmem:[#allocation24_spill] sm:$0xff] }
 0x7f0   : > { %v3529_v15 = vpop.f32.mrb[50].mxu0  ;;  %v2875_v34 = vadd.f32 %v8424_v21, %v9358_v50 }
 0x7f1   : > { %4165 = vst [vmem:[%s8445_s19 + $0xb8] sm:$0xff] %v4133_v2  ;;  %v3812_v29 = vmax.f32 %v3750_v19, 0.0  ;;  %v5112_v4 = vadd.f32 %v3529_v15, %v2855_v9  ;;  %v3531_v40 = vpop.f32.mrb[51].mxu0  ;;  %v9359_v9 = vld [vmem:[#allocation55_spill] sm:$0xff] }
 0x7f2   : > { %v5407_v2 = vld [vmem:[%s5515_s30 + $0xe8] sm:$0xff] }
 0x7f3   : > { %v4134_v55 = vadd.f32 %v4102_v8, %v3812_v29  ;;  %v3755_v23 = vadd.f32 %v5112_v4, %v9350_v11  ;;  %v4041_v19 = vsel %vm523_vm1, %v5407_v2, %v9360_v13  ;;  %v4106_v29 = vsel %vm4077_vm8, %v4073_v18, 0.0  ;;  %v9361_v4 = vld [vmem:[#allocation8_spill] sm:$0xff] }
 0x7f4   : > { %v3534_v45 = vpop.f32.mrb[52].mxu0  ;;  %v2880_v40 = vadd.f32 %v8424_v21, %v9361_v4  ;;  %v4074_v8 = vsel %vm4044_vm7, %v4041_v19, %v3975_v22  ;;  %v9363_v11 = vld [vmem:[#allocation36_spill] sm:$0xff] }
 0x7f5   : > { %4166 = vst [vmem:[%s8445_s19 + $0xc0] sm:$0xff] %v4134_v55  ;;  %v3813_v48 = vmax.f32 %v3755_v23, 0.0  ;;  %v5114_v46 = vadd.f32 %v3534_v45, %v2860_v12  ;;  %v3536_v26 = vpop.f32.mrb[53].mxu0  ;;  %v9362_v12 = vld [vmem:[#allocation5_spill] sm:$0xff]  ;;  %v5408_v55 = vld [vmem:[%s5515_s30 + $0xf0] sm:$0xff] }
 0x7f6   : > { %v4042_v23 = vsel %vm523_vm1, %v5408_v55, %v9363_v11 }
 0x7f7   : > { %v4135_v28 = vadd.f32 %v4103_v58, %v3813_v48  ;;  %v3760_v43 = vadd.f32 %v5114_v46, %v9353_v38  ;;  %v4107_v48 = vsel %vm4077_vm8, %v4074_v8, 0.0  ;;  %v9364_v46 = vld [vmem:[#allocation57_spill] sm:$0xff]  ;;  %v4075_v58 = vsel %vm4044_vm7, %v4042_v23, %v3977_v5  ;;  %v9366_v38 = vld [vmem:[#allocation51_spill] sm:$0xff] }
 0x7f8   : > { %v3539_v10 = vpop.f32.mrb[54].mxu0  ;;  %v2885_v26 = vadd.f32 %v8424_v21, %v9364_v46 }
 0x7f9   : > { %4167 = vst [vmem:[%s8445_s19 + $0xc8] sm:$0xff] %v4135_v28  ;;  %v3814_v24 = vmax.f32 %v3760_v43, 0.0  ;;  %v5116_v16 = vadd.f32 %v3539_v10, %v2865_v53  ;;  %v3541_v17 = vpop.f32.mrb[55].mxu0  ;;  %v9365_v53 = vld [vmem:[#allocation11_spill] sm:$0xff]  ;;  %v5409_v28 = vld [vmem:[%s5515_s30 + $0xf8] sm:$0xff] }
 0x7fa   : > { %v4043_v43 = vsel %vm523_vm1, %v5409_v28, %v9366_v38  ;;  %v9367_v17 = vld [vmem:[#allocation12_spill] sm:$0xff] }
 0x7fb   : > { %v4136_v1 = vadd.f32 %v4104_v32, %v3814_v24  ;;  %v3765_v25 = vadd.f32 %v5116_v16, %v9356_v3  ;;  %v4108_v24 = vsel %vm4077_vm8, %v4075_v58, 0.0  ;;  %v4076_v21 = vsel %vm4044_vm7, %v4043_v43, %v3979_v52 }
 0x7fc   : > { %v3544_v49 = vpop.f32.mrb[56].mxu0 }
 0x7fd   : > { %4168 = vst [vmem:[%s8445_s19 + $0xd0] sm:$0xff] %v4136_v1  ;;  %v3815_v33 = vmax.f32 %v3765_v25, 0.0  ;;  %v5118_v36 = vadd.f32 %v3544_v49, %v2870_v47  ;;  %v3546_v51 = vpop.f32.mrb[57].mxu0  ;;  %v4109_v47 = vsel %vm4077_vm8, %v4076_v21, 0.0 }
 0x7ff   : > { %v4137_v30 = vadd.f32 %v4105_v14, %v3815_v33  ;;  %v3770_v37 = vadd.f32 %v5118_v36, %v9359_v9 }
 0x800   : > { %v3549_v0 = vpop.f32.mrb[58].mxu0 }
 0x801   : > { %4169 = vst [vmem:[%s8445_s19 + $0xd8] sm:$0xff] %v4137_v30  ;;  %v3816_v42 = vmax.f32 %v3770_v37, 0.0  ;;  %v5120_v27 = vadd.f32 %v3549_v0, %v2875_v34  ;;  %v3551_v15 = vpop.f32.mrb[59].mxu0 }
 0x803   : > { %v4138_v54 = vadd.f32 %v4106_v29, %v3816_v42  ;;  %v3775_v31 = vadd.f32 %v5120_v27, %v9362_v12 }
 0x804   : > { %v3554_v6 = vpop.f32.mrb[60].mxu0 }
 0x805   : > { %4170 = vst [vmem:[%s8445_s19 + $0xe0] sm:$0xff] %v4138_v54  ;;  %v3817_v7 = vmax.f32 %v3775_v31, 0.0  ;;  %v5122_v41 = vadd.f32 %v3554_v6, %v2880_v40  ;;  %v3556_v45 = vpop.f32.mrb[61].mxu0 }
 0x807   : > { %v4139_v63 = vadd.f32 %v4107_v48, %v3817_v7  ;;  %v3780_v61 = vadd.f32 %v5122_v41, %v9365_v53 }
 0x808   : > { %v3559_v35 = vpop.f32.mrb[62].mxu0 }
 0x809   : > { %4171 = vst [vmem:[%s8445_s19 + $0xe8] sm:$0xff] %v4139_v63  ;;  %v3818_v20 = vmax.f32 %v3780_v61, 0.0  ;;  %v5124_v56 = vadd.f32 %v3559_v35, %v2885_v26  ;;  %v3561_v10 = vpop.f32.mrb[63].mxu0 }
 0x80b   : > { %v4140_v16 = vadd.f32 %v4108_v24, %v3818_v20  ;;  %v3785_v32 = vadd.f32 %v5124_v56, %v9367_v17 }
 0x80d   : > { %4172 = vst [vmem:[%s8445_s19 + $0xf0] sm:$0xff] %v4140_v16  ;;  %v3819_v62 = vmax.f32 %v3785_v32, 0.0 }
 0x80f   : > { %v4141_v57 = vadd.f32 %v4109_v47, %v3819_v62 }
 0x811   : > { %4173 = vst [vmem:[%s8445_s19 + $0xf8] sm:$0xff] %v4141_v57 }
 0x812 PF: > { %s21_s17 = sadd.s32 1, %s5416_s17  }
 0x813   : > { %p18_p4 = scmp.ge.s32.totalorder %s21_s17, 4  }
 0x815   :  { %20 = sbr.rel (!%p18_p4) target bundleno = 1 (0x1), region = 102 }

</bundles_post_ra>
